<compile_context>
chip_gen: v7x
topology: tpu7x:2x2x1
jax: 0.10.0
libtpu: 0.0.40
codegen_flags: <defaults>
</compile_context>

<pallas_src>
from functools import partial

import jax
import jax.numpy as jnp
from jax import lax
from jax.experimental import pallas as pl
from jax.experimental.pallas import tpu as pltpu

_LANE = 128
# Scoped-VMEM defaults are only 16 MiB (v5e) / 32 MiB (v6e, v7x); raise the
# budget so larger edge tiles fit while staying under v7x's 64 MiB physical.
_VMEM_LIMIT_BYTES = 48 * 1024 * 1024


# ------------------------- Pallas kernels -------------------------

def _deg_kernel(col_ref, w_ref, dis_ref):
    """deg[n] = sum_e w[e] * (col[e] == n) for this node tile; finalize deg^-1/2."""
    nt = pl.program_id(0)          # node tile  (parallel)
    et = pl.program_id(1)          # edge tile  (arbitrary; accumulated)

    @pl.when(et == 0)
    def _():
        dis_ref[...] = jnp.zeros_like(dis_ref)

    col = col_ref[...]                       # (ER, 128) int32, lane-dense
    w = w_ref[...]                           # (ER, 128) float32
    er, lane = col.shape
    tn = dis_ref.shape[1]
    base = nt * tn
    node_ids = base + lax.broadcasted_iota(jnp.int32, (er, lane, tn), 2)
    # fused select: no separate cast + multiply over the (edges, nodes) plane
    contrib = jnp.where(col[:, :, None] == node_ids, w[:, :, None], 0.0)
    acc2d = jnp.sum(contrib, axis=0)                             # (128, tn)
    dis_ref[...] += jnp.sum(acc2d, axis=0, keepdims=True)        # (1, tn)

    @pl.when(et == pl.num_programs(1) - 1)
    def _():
        deg = dis_ref[...]
        # deg^-0.5 with masked_fill(inf, 0) semantics (deg == 0 -> 0)
        dis_ref[...] = jnp.where(deg > 0.0, lax.rsqrt(deg), 0.0)


def _norm_kernel(row_ref, col_ref, w_ref, dis_ref, out_ref, dr_ref, dc_ref):
    """norm_w[e] = dis[row[e]] * w[e] * dis[col[e]], accumulated over node tiles."""
    nt = pl.program_id(1)          # node tile (arbitrary; accumulated)

    @pl.when(nt == 0)
    def _():
        dr_ref[...] = jnp.zeros_like(dr_ref)
        dc_ref[...] = jnp.zeros_like(dc_ref)

    row = row_ref[...]                       # (ER, 128) int32
    col = col_ref[...]                       # (ER, 128) int32
    dis = dis_ref[...]                       # (1, tn)   float32
    er, lane = row.shape
    tn = dis.shape[1]
    base = nt * tn
    node_ids = base + lax.broadcasted_iota(jnp.int32, (er, lane, tn), 2)
    dis3 = dis[None, :, :]                   # (1, 1, tn)
    # each endpoint matches exactly one node tile -> sum over tiles = gather
    dr_ref[...] += jnp.sum(
        jnp.where(row[:, :, None] == node_ids, dis3, 0.0), axis=2)
    dc_ref[...] += jnp.sum(
        jnp.where(col[:, :, None] == node_ids, dis3, 0.0), axis=2)

    @pl.when(nt == pl.num_programs(1) - 1)
    def _():
        # lane-dense (ER, 128) store
        out_ref[...] = dr_ref[...] * w_ref[...] * dc_ref[...]


# ------------------------- wrappers -------------------------

def gcn_norm_pallas(row, col, w, num_nodes, tile_e=1024, tile_n=512):
    """row, col: (E,) int32; w: (E,) float32. Returns normalized weights (E,)."""
    assert tile_e % (8 * _LANE) == 0, "tile_e must be a multiple of 1024"
    assert tile_n % _LANE == 0, "tile_n must be a multiple of 128"

    E = row.shape[0]
    e_pad = pl.cdiv(E, tile_e) * tile_e
    n_pad = pl.cdiv(num_nodes, tile_n) * tile_n
    er = tile_e // _LANE
    n_edge_tiles = e_pad // tile_e
    n_node_tiles = n_pad // tile_n

    def pad_edges(a, fill):
        if e_pad == E:
            return a
        return jnp.concatenate([a, jnp.full((e_pad - E,), fill, a.dtype)])

    # lane-dense (E_pad//128, 128) layout; pad edges point at node 0 with w=0
    row2 = pad_edges(row.astype(jnp.int32), 0).reshape(e_pad // _LANE, _LANE)
    col2 = pad_edges(col.astype(jnp.int32), 0).reshape(e_pad // _LANE, _LANE)
    w2 = pad_edges(w.astype(jnp.float32), 0.0).reshape(e_pad // _LANE, _LANE)

    compiler_params = pltpu.CompilerParams(
        dimension_semantics=("parallel", "arbitrary"),
        vmem_limit_bytes=_VMEM_LIMIT_BYTES)

    # Kernel 1: degree accumulation + deg^-1/2.
    # grid = (node tiles [parallel], edge tiles [arbitrary, accumulated]).
    dis = pl.pallas_call(
        _deg_kernel,
        out_shape=jax.ShapeDtypeStruct((1, n_pad), jnp.float32),
        grid=(n_node_tiles, n_edge_tiles),
        in_specs=[
            pl.BlockSpec((er, _LANE), lambda nt, et: (et, 0)),   # col
            pl.BlockSpec((er, _LANE), lambda nt, et: (et, 0)),   # w
        ],
        out_specs=pl.BlockSpec((1, tile_n), lambda nt, et: (0, nt)),
        compiler_params=compiler_params,
    )(col2, w2)

    # Kernel 2: per-edge normalization.
    # grid = (edge tiles [parallel], node tiles [arbitrary, accumulated]);
    # output block (er, 128) is lane-dense (unmasked full-width stores).
    norm2 = pl.pallas_call(
        _norm_kernel,
        out_shape=jax.ShapeDtypeStruct((e_pad // _LANE, _LANE), jnp.float32),
        grid=(n_edge_tiles, n_node_tiles),
        in_specs=[
            pl.BlockSpec((er, _LANE), lambda et, nt: (et, 0)),   # row
            pl.BlockSpec((er, _LANE), lambda et, nt: (et, 0)),   # col
            pl.BlockSpec((er, _LANE), lambda et, nt: (et, 0)),   # w
            pl.BlockSpec((1, tile_n), lambda et, nt: (0, nt)),   # dis
        ],
        out_specs=pl.BlockSpec((er, _LANE), lambda et, nt: (et, 0)),
        scratch_shapes=[pltpu.VMEM((er, _LANE), jnp.float32),
                        pltpu.VMEM((er, _LANE), jnp.float32)],
        compiler_params=compiler_params,
    )(row2, col2, w2, dis)

    return norm2.reshape(e_pad)[:E]


@partial(jax.jit, static_argnames=("num_nodes", "improved", "add_self_loops",
                                   "tile_e", "tile_n"))
def _gcn_norm_weights(edge_index, edge_weight, *, num_nodes, improved,
                      add_self_loops, tile_e, tile_n):
    e0 = edge_index.shape[1]
    ew = edge_weight
    if ew is None:
        ew = jnp.ones((e0,), dtype=jnp.float32)
    fill_value = 2.0 if improved else 1.0
    if add_self_loops:
        loops = jnp.arange(num_nodes, dtype=edge_index.dtype)
        edge_index = jnp.concatenate(
            [edge_index, jnp.stack([loops, loops])], axis=1)
        ew = jnp.concatenate(
            [ew.astype(jnp.float32),
             jnp.full((num_nodes,), fill_value, jnp.float32)])
    row = edge_index[0].astype(jnp.int32)
    col = edge_index[1].astype(jnp.int32)
    norm_w = gcn_norm_pallas(row, col, ew.astype(jnp.float32), num_nodes,
                             tile_e=tile_e, tile_n=tile_n)
    return edge_index, norm_w


def gcn_norm_forward(x, edge_index, edge_weight=None, num_nodes=None,
                     improved=False, add_self_loops=True, normalize=True,
                     tile_e=1024, tile_n=512):
    """Mirrors GCNNorm.forward (uncached path). edge_index: (2, E0) int."""
    if not normalize:
        return x, edge_index, edge_weight
    if num_nodes is None:
        # PyG computes torch.max(edge_index) + 1; doing that here forces a
        # device->host sync -- prefer passing num_nodes explicitly.
        num_nodes = int(jnp.max(edge_index)) + 1
    edge_index, norm_w = _gcn_norm_weights(
        edge_index, edge_weight, num_nodes=int(num_nodes), improved=improved,
        add_self_loops=add_self_loops, tile_e=tile_e, tile_n=tile_n)
    return x, edge_index, norm_w


# ------------------------- demo / check -------------------------

if __name__ == "__main__":
    key = jax.random.PRNGKey(0)
    k1, k2, k3 = jax.random.split(key, 3)

    N = 256          # nodes
    F = 32           # node feature dim
    E0 = 1500        # edges before self-loops

    row = jax.random.randint(k1, (E0,), 0, N, dtype=jnp.int32)
    col = jax.random.randint(k2, (E0,), 0, N, dtype=jnp.int32)
    # remove accidental self-loops (add_remaining_self_loops then = plain append)
    col = jnp.where(row == col, (col + 1) % N, col)
    edge_index = jnp.stack([row, col]).astype(jnp.int32)
    x = jax.random.normal(k3, (N, F), dtype=jnp.float32)

    # tile_n=128 / tile_e=1024 so the small demo still exercises multi-tile
    # grids on both the node axis (kernel 2) and the edge axis (kernel 1),
    # plus the zero-weight edge padding path (E = 1756 -> padded to 2048).
    x_out, ei_out, ew_out = gcn_norm_forward(
        x, edge_index, edge_weight=None, num_nodes=N, tile_e=1024, tile_n=128)
    jax.block_until_ready((x_out, ei_out, ew_out))

    # pure-JAX reference
    r = ei_out[0]
    c = ei_out[1]
    w_full = jnp.ones((E0 + N,), jnp.float32)
    deg = jnp.zeros((N,), jnp.float32).at[c].add(w_full)
    dis = jnp.where(deg > 0, deg ** -0.5, 0.0)
    ref = dis[r] * w_full * dis[c]

    assert x_out.shape == (N, F) and jnp.allclose(x_out, x)
    assert ei_out.shape == (2, E0 + N)
    assert ew_out.shape == (E0 + N,)
    assert jnp.allclose(ew_out, ref, atol=1e-5, rtol=1e-4), "mismatch vs reference"

    print("KERNEL_OK")
</pallas_src>

<mosaic_0001>
module attributes {stable_mosaic.version = 11 : i64} {
  func.func @_deg_kernel(%arg0: i32, %arg1: i32, %arg2: memref<8x128xi32, #tpu.memory_space<vmem>>, %arg3: memref<8x128xf32, #tpu.memory_space<vmem>>, %arg4: memref<1x128xf32, #tpu.memory_space<vmem>>) attributes {dimension_semantics = [#tpu.dimension_semantics<parallel>, #tpu.dimension_semantics<arbitrary>], iteration_bounds = array<i64: 2, 2>, scalar_prefetch = 0 : i64, scratch_operands = 0 : i64, tpu.core_type = #tpu.core_type<tc>, window_params = [{transform_indices = @transform_0, window_bounds = array<i64: 8, 128>}, {transform_indices = @transform_1, window_bounds = array<i64: 8, 128>}, {transform_indices = @transform_2, window_bounds = array<i64: 1, 128>}]} {
    %c0_i32 = arith.constant 0 : i32
    %0 = arith.cmpi eq, %arg1, %c0_i32 : i32
    %1 = arith.extui %0 : i1 to i32
    %c0_i32_0 = arith.constant 0 : i32
    %2 = arith.cmpi ne, %1, %c0_i32_0 : i32
    scf.if %2 {
      %cst_11 = arith.constant 0.000000e+00 : f32
      %26 = vector.broadcast %cst_11 : f32 to vector<1x128xf32>
      %c0_12 = arith.constant 0 : index
      %c0_13 = arith.constant 0 : index
      %27 = vector.load %arg4[%c0_12, %c0_13] : memref<1x128xf32, #tpu.memory_space<vmem>>, vector<1x128xf32>
      tpu.vector_store %arg4[%c0_12, %c0_13], %26 {strides = array<i32>} : memref<1x128xf32, #tpu.memory_space<vmem>>, vector<1x128xf32>,
    } else {
    }
    %c0 = arith.constant 0 : index
    %c0_1 = arith.constant 0 : index
    %3 = vector.load %arg2[%c0, %c0_1] : memref<8x128xi32, #tpu.memory_space<vmem>>, vector<8x128xi32>
    %c0_2 = arith.constant 0 : index
    %c0_3 = arith.constant 0 : index
    %4 = vector.load %arg3[%c0_2, %c0_3] : memref<8x128xf32, #tpu.memory_space<vmem>>, vector<8x128xf32>
    %c128_i32 = arith.constant 128 : i32
    %5 = arith.muli %arg0, %c128_i32 : i32
    %6 = tpu.iota {dimensions = array<i32: 2>} : vector<8x128x128xi32>
    %7 = vector.broadcast %5 : i32 to vector<8x128x128xi32>
    %8 = arith.addi %7, %6 : vector<8x128x128xi32>
    %9 = vector.shape_cast %3 : vector<8x128xi32> to vector<8x128x1xi32>
    %10 = vector.broadcast %9 : vector<8x128x1xi32> to vector<8x128x128xi32>
    %11 = arith.cmpi eq, %10, %8 : vector<8x128x128xi32>
    %12 = vector.shape_cast %4 : vector<8x128xf32> to vector<8x128x1xf32>
    %cst = arith.constant 0.000000e+00 : f32
    %13 = vector.shape_cast %12 : vector<8x128x1xf32> to vector<8x128x1xf32>
    %14 = vector.broadcast %13 : vector<8x128x1xf32> to vector<8x128x128xf32>
    %15 = vector.broadcast %cst : f32 to vector<8x128x128xf32>
    %16 = arith.select %11, %14, %15 : vector<8x128x128xi1>, vector<8x128x128xf32>
    %cst_4 = arith.constant dense<0.000000e+00> : vector<128x128xf32>
    %17 = vector.multi_reduction <add>, %16, %cst_4 [0] : vector<8x128x128xf32> to vector<128x128xf32>
    %c0_5 = arith.constant 0 : index
    %c0_6 = arith.constant 0 : index
    %18 = vector.load %arg4[%c0_5, %c0_6] : memref<1x128xf32, #tpu.memory_space<vmem>>, vector<1x128xf32>
    %cst_7 = arith.constant dense<0.000000e+00> : vector<128xf32>
    %19 = vector.multi_reduction <add>, %17, %cst_7 [0] : vector<128x128xf32> to vector<128xf32>
    %20 = vector.shape_cast %19 : vector<128xf32> to vector<1x128xf32>
    %21 = arith.addf %18, %20 : vector<1x128xf32>
    %c0_8 = arith.constant 0 : index
    %c0_9 = arith.constant 0 : index
    %22 = vector.load %arg4[%c0_8, %c0_9] : memref<1x128xf32, #tpu.memory_space<vmem>>, vector<1x128xf32>
    tpu.vector_store %arg4[%c0_8, %c0_9], %21 {strides = array<i32>} : memref<1x128xf32, #tpu.memory_space<vmem>>, vector<1x128xf32>,
    %c1_i32 = arith.constant 1 : i32
    %23 = arith.cmpi eq, %arg1, %c1_i32 : i32
    %24 = arith.extui %23 : i1 to i32
    %c0_i32_10 = arith.constant 0 : i32
    %25 = arith.cmpi ne, %24, %c0_i32_10 : i32
    scf.if %25 {
      %c0_11 = arith.constant 0 : index
      %c0_12 = arith.constant 0 : index
      %26 = vector.load %arg4[%c0_11, %c0_12] : memref<1x128xf32, #tpu.memory_space<vmem>>, vector<1x128xf32>
      %cst_13 = arith.constant 0.000000e+00 : f32
      %27 = vector.broadcast %cst_13 : f32 to vector<1x128xf32>
      %28 = arith.cmpf ogt, %26, %27 : vector<1x128xf32>
      %29 = math.rsqrt %26 : vector<1x128xf32>
      %cst_14 = arith.constant 0.000000e+00 : f32
      %30 = vector.broadcast %cst_14 : f32 to vector<1x128xf32>
      %31 = arith.select %28, %29, %30 : vector<1x128xi1>, vector<1x128xf32>
      %c0_15 = arith.constant 0 : index
      %c0_16 = arith.constant 0 : index
      %32 = vector.load %arg4[%c0_15, %c0_16] : memref<1x128xf32, #tpu.memory_space<vmem>>, vector<1x128xf32>
      tpu.vector_store %arg4[%c0_15, %c0_16], %31 {strides = array<i32>} : memref<1x128xf32, #tpu.memory_space<vmem>>, vector<1x128xf32>,
    } else {
    }
    return
  }
  func.func @transform_0(%arg0: i32, %arg1: i32) -> (i32, i32) {
    %c0_i32 = arith.constant 0 : i32
    %c0_i32_0 = arith.constant 0 : i32
    return %arg1, %c0_i32 : i32, i32
  }
  func.func @transform_1(%arg0: i32, %arg1: i32) -> (i32, i32) {
    %c0_i32 = arith.constant 0 : i32
    %c0_i32_0 = arith.constant 0 : i32
    return %arg1, %c0_i32 : i32, i32
  }
  func.func @transform_2(%arg0: i32, %arg1: i32) -> (i32, i32) {
    %c0_i32 = arith.constant 0 : i32
    %c0_i32_0 = arith.constant 0 : i32
    return %c0_i32, %arg0 : i32, i32
  }
}

module attributes {stable_mosaic.version = 11 : i64} {
  func.func @_norm_kernel(%arg0: i32, %arg1: i32, %arg2: memref<8x128xi32, #tpu.memory_space<vmem>>, %arg3: memref<8x128xi32, #tpu.memory_space<vmem>>, %arg4: memref<8x128xf32, #tpu.memory_space<vmem>>, %arg5: memref<1x128xf32, #tpu.memory_space<vmem>>, %arg6: memref<8x128xf32, #tpu.memory_space<vmem>>, %arg7: memref<8x128xf32, #tpu.memory_space<vmem>>, %arg8: memref<8x128xf32, #tpu.memory_space<vmem>>) attributes {dimension_semantics = [#tpu.dimension_semantics<parallel>, #tpu.dimension_semantics<arbitrary>], iteration_bounds = array<i64: 2, 2>, scalar_prefetch = 0 : i64, scratch_operands = 2 : i64, tpu.core_type = #tpu.core_type<tc>, window_params = [{transform_indices = @transform_0, window_bounds = array<i64: 8, 128>}, {transform_indices = @transform_1, window_bounds = array<i64: 8, 128>}, {transform_indices = @transform_2, window_bounds = array<i64: 8, 128>}, {transform_indices = @transform_3, window_bounds = array<i64: 1, 128>}, {transform_indices = @transform_4, window_bounds = array<i64: 8, 128>}]} {
    %c0_i32 = arith.constant 0 : i32
    %0 = arith.cmpi eq, %arg1, %c0_i32 : i32
    %1 = arith.extui %0 : i1 to i32
    %c0_i32_0 = arith.constant 0 : i32
    %2 = arith.cmpi ne, %1, %c0_i32_0 : i32
    scf.if %2 {
      %cst_18 = arith.constant 0.000000e+00 : f32
      %36 = vector.broadcast %cst_18 : f32 to vector<8x128xf32>
      %c0_19 = arith.constant 0 : index
      %c0_20 = arith.constant 0 : index
      %37 = vector.load %arg7[%c0_19, %c0_20] : memref<8x128xf32, #tpu.memory_space<vmem>>, vector<8x128xf32>
      tpu.vector_store %arg7[%c0_19, %c0_20], %36 {strides = array<i32>} : memref<8x128xf32, #tpu.memory_space<vmem>>, vector<8x128xf32>,
      %cst_21 = arith.constant 0.000000e+00 : f32
      %38 = vector.broadcast %cst_21 : f32 to vector<8x128xf32>
      %c0_22 = arith.constant 0 : index
      %c0_23 = arith.constant 0 : index
      %39 = vector.load %arg8[%c0_22, %c0_23] : memref<8x128xf32, #tpu.memory_space<vmem>>, vector<8x128xf32>
      tpu.vector_store %arg8[%c0_22, %c0_23], %38 {strides = array<i32>} : memref<8x128xf32, #tpu.memory_space<vmem>>, vector<8x128xf32>,
    } else {
    }
    %c0 = arith.constant 0 : index
    %c0_1 = arith.constant 0 : index
    %3 = vector.load %arg2[%c0, %c0_1] : memref<8x128xi32, #tpu.memory_space<vmem>>, vector<8x128xi32>
    %c0_2 = arith.constant 0 : index
    %c0_3 = arith.constant 0 : index
    %4 = vector.load %arg3[%c0_2, %c0_3] : memref<8x128xi32, #tpu.memory_space<vmem>>, vector<8x128xi32>
    %c0_4 = arith.constant 0 : index
    %c0_5 = arith.constant 0 : index
    %5 = vector.load %arg5[%c0_4, %c0_5] : memref<1x128xf32, #tpu.memory_space<vmem>>, vector<1x128xf32>
    %c128_i32 = arith.constant 128 : i32
    %6 = arith.muli %arg1, %c128_i32 : i32
    %7 = tpu.iota {dimensions = array<i32: 2>} : vector<8x128x128xi32>
    %8 = vector.broadcast %6 : i32 to vector<8x128x128xi32>
    %9 = arith.addi %8, %7 : vector<8x128x128xi32>
    %10 = vector.shape_cast %5 : vector<1x128xf32> to vector<1x1x128xf32>
    %c0_6 = arith.constant 0 : index
    %c0_7 = arith.constant 0 : index
    %11 = vector.load %arg7[%c0_6, %c0_7] : memref<8x128xf32, #tpu.memory_space<vmem>>, vector<8x128xf32>
    %12 = vector.shape_cast %3 : vector<8x128xi32> to vector<8x128x1xi32>
    %13 = vector.broadcast %12 : vector<8x128x1xi32> to vector<8x128x128xi32>
    %14 = arith.cmpi eq, %13, %9 : vector<8x128x128xi32>
    %cst = arith.constant 0.000000e+00 : f32
    %15 = vector.shape_cast %10 : vector<1x1x128xf32> to vector<1x1x128xf32>
    %16 = vector.broadcast %15 : vector<1x1x128xf32> to vector<8x128x128xf32>
    %17 = vector.broadcast %cst : f32 to vector<8x128x128xf32>
    %18 = arith.select %14, %16, %17 : vector<8x128x128xi1>, vector<8x128x128xf32>
    %cst_8 = arith.constant dense<0.000000e+00> : vector<8x128xf32>
    %19 = vector.multi_reduction <add>, %18, %cst_8 [2] : vector<8x128x128xf32> to vector<8x128xf32>
    %20 = arith.addf %11, %19 : vector<8x128xf32>
    %c0_9 = arith.constant 0 : index
    %c0_10 = arith.constant 0 : index
    %21 = vector.load %arg7[%c0_9, %c0_10] : memref<8x128xf32, #tpu.memory_space<vmem>>, vector<8x128xf32>
    tpu.vector_store %arg7[%c0_9, %c0_10], %20 {strides = array<i32>} : memref<8x128xf32, #tpu.memory_space<vmem>>, vector<8x128xf32>,
    %c0_11 = arith.constant 0 : index
    %c0_12 = arith.constant 0 : index
    %22 = vector.load %arg8[%c0_11, %c0_12] : memref<8x128xf32, #tpu.memory_space<vmem>>, vector<8x128xf32>
    %23 = vector.shape_cast %4 : vector<8x128xi32> to vector<8x128x1xi32>
    %24 = vector.broadcast %23 : vector<8x128x1xi32> to vector<8x128x128xi32>
    %25 = arith.cmpi eq, %24, %9 : vector<8x128x128xi32>
    %cst_13 = arith.constant 0.000000e+00 : f32
    %26 = vector.shape_cast %10 : vector<1x1x128xf32> to vector<1x1x128xf32>
    %27 = vector.broadcast %26 : vector<1x1x128xf32> to vector<8x128x128xf32>
    %28 = vector.broadcast %cst_13 : f32 to vector<8x128x128xf32>
    %29 = arith.select %25, %27, %28 : vector<8x128x128xi1>, vector<8x128x128xf32>
    %cst_14 = arith.constant dense<0.000000e+00> : vector<8x128xf32>
    %30 = vector.multi_reduction <add>, %29, %cst_14 [2] : vector<8x128x128xf32> to vector<8x128xf32>
    %31 = arith.addf %22, %30 : vector<8x128xf32>
    %c0_15 = arith.constant 0 : index
    %c0_16 = arith.constant 0 : index
    %32 = vector.load %arg8[%c0_15, %c0_16] : memref<8x128xf32, #tpu.memory_space<vmem>>, vector<8x128xf32>
    tpu.vector_store %arg8[%c0_15, %c0_16], %31 {strides = array<i32>} : memref<8x128xf32, #tpu.memory_space<vmem>>, vector<8x128xf32>,
    %c1_i32 = arith.constant 1 : i32
    %33 = arith.cmpi eq, %arg1, %c1_i32 : i32
    %34 = arith.extui %33 : i1 to i32
    %c0_i32_17 = arith.constant 0 : i32
    %35 = arith.cmpi ne, %34, %c0_i32_17 : i32
    scf.if %35 {
      %c0_18 = arith.constant 0 : index
      %c0_19 = arith.constant 0 : index
      %36 = vector.load %arg7[%c0_18, %c0_19] : memref<8x128xf32, #tpu.memory_space<vmem>>, vector<8x128xf32>
      %c0_20 = arith.constant 0 : index
      %c0_21 = arith.constant 0 : index
      %37 = vector.load %arg4[%c0_20, %c0_21] : memref<8x128xf32, #tpu.memory_space<vmem>>, vector<8x128xf32>
      %38 = arith.mulf %36, %37 : vector<8x128xf32>
      %c0_22 = arith.constant 0 : index
      %c0_23 = arith.constant 0 : index
      %39 = vector.load %arg8[%c0_22, %c0_23] : memref<8x128xf32, #tpu.memory_space<vmem>>, vector<8x128xf32>
      %40 = arith.mulf %38, %39 : vector<8x128xf32>
      %c0_24 = arith.constant 0 : index
      %c0_25 = arith.constant 0 : index
      %41 = vector.load %arg6[%c0_24, %c0_25] : memref<8x128xf32, #tpu.memory_space<vmem>>, vector<8x128xf32>
      tpu.vector_store %arg6[%c0_24, %c0_25], %40 {strides = array<i32>} : memref<8x128xf32, #tpu.memory_space<vmem>>, vector<8x128xf32>,
    } else {
    }
    return
  }
  func.func @transform_0(%arg0: i32, %arg1: i32) -> (i32, i32) {
    %c0_i32 = arith.constant 0 : i32
    %c0_i32_0 = arith.constant 0 : i32
    return %arg0, %c0_i32 : i32, i32
  }
  func.func @transform_1(%arg0: i32, %arg1: i32) -> (i32, i32) {
    %c0_i32 = arith.constant 0 : i32
    %c0_i32_0 = arith.constant 0 : i32
    return %arg0, %c0_i32 : i32, i32
  }
  func.func @transform_2(%arg0: i32, %arg1: i32) -> (i32, i32) {
    %c0_i32 = arith.constant 0 : i32
    %c0_i32_0 = arith.constant 0 : i32
    return %arg0, %c0_i32 : i32, i32
  }
  func.func @transform_3(%arg0: i32, %arg1: i32) -> (i32, i32) {
    %c0_i32 = arith.constant 0 : i32
    %c0_i32_0 = arith.constant 0 : i32
    return %c0_i32, %arg1 : i32, i32
  }
  func.func @transform_4(%arg0: i32, %arg1: i32) -> (i32, i32) {
    %c0_i32 = arith.constant 0 : i32
    %c0_i32_0 = arith.constant 0 : i32
    return %arg0, %c0_i32 : i32, i32
  }
}

</mosaic_0001>

<bundles_post_ra>
// kernel: _gcn_norm_weights.2
= control target key start
LH: loop header
LB: loop body
LE: loop exit
PB: predicated region body
PF: predicated region fallthrough
CT: control target
= control target key end

     0   :  { %s1832_s9 = smov 0   ;;  %s1834_s10 = smov 0   ;;  %s2791_s0 = inlined_call_operand.vmem [shape: s32[16,128], index: 0, kind: input, shape index: {}]   ;;  %s2792_s1 = inlined_call_operand.vmem [shape: f32[16,128], index: 1, kind: input, shape index: {}]   ;;  %s2793_s2 = inlined_call_operand.vmem [shape: f32[1,256], index: 2, kind: output, shape index: {}]  }
   0x1   :  { %s1836_s11 = smov 0   ;;  %s1838_s12 = smov 0  }
   0x2   :  { %s1840_s13 = smov 0  }
   0x3 LB: > { %s21_s14 = sadd.s32 1, %s1806_s11  ;;  %s24_s15 = sadd.s32 1, %s1810_s12  ;;  %s1814_s13 = sphi %s1840_s13, %s12_s13   ;;  %s1810_s12 = sphi %s1838_s12, %s3029_s12   ;;  %s1806_s11 = sphi %s1836_s11, %s3028_s11   ;;  %s1802_s10 = sphi %s1834_s10, %s3027_s10   ;;  %s1798_s9 = sphi %s1832_s9, %s3026_s9  }
   0x4   : > { %p22_p0 = scmp.ge.s32.totalorder %s21_s14, 2  ;;  %p1725_p1 = scmp.ge.s32.totalorder %s1814_s13, 1 }
   0x5   : > { %p132_p2 = scmp.lt.s32.totalorder %s1814_s13, 5 }
   0x6   : > { %s3031_s14 = smov (%p22_p0, %s21_s14), 0  ;;  %s3033_s15 = smov (!%p22_p0, %s24_s15), %s1810_s12 }
   0x7   : > { %p133_p3 = pnand %p1725_p1, %p132_p2  ;;  %p26_p4 = scmp.ge.s32.totalorder %s3033_s15, 2 }
   0x9   : > { %s3035_s15 = smov (%p26_p4, %s3033_s15), 0  ;;  %136 = sbr.rel (%p133_p3) target bundleno = 700 (0x2bc), region = 28 }
  0x10   : > { %p155_p5 = scmp.lt.s32.totalorder %s1798_s9, 1  ;;  %p163_p6 = scmp.lt.s32.totalorder %s1802_s10, 1 }
  0x11   : > { %p1728_p7 = scmp.ne.s32.totalorder %s1798_s9, 0 }
  0x12   : > { %s156_s16 = scalar_select %p155_p5, %s1798_s9, 1 }
  0x13   : > { %s164_s17 = scalar_select %p163_p6, %s1802_s10, 1 }
  0x14   : > { %s1726_s18 = sshll.u32 %s156_s16, 3  ;;  %169 = sbr.rel (%p1728_p7) target bundleno = 27 (0x1b), region = 32  ;;  %v1816_v0 = vmov (!%p1728_p7), 0.0  }
  0x15   : > { %s158_s21 = scalar_lea.vmem %s2791_s0, %s1726_s18  ;;  %s1876_s24 = scalar_lea.vmem %s2792_s1, %s1726_s18 }
  0x16   : > { %s1881_s27 = scalar_lea.vmem %s2793_s2, %s164_s17 }
  0x17   : > { %170 = vst [vmem:[%s1881_s27] sm:$0x1] (!%p1728_p7), %v1816_v0 }
  0x1b PF: > { %v2794_v1 = vlaneseq  ;;  %v1888_v3 = vld [vmem:[%s158_s21] sm:$0xff]  ;;  %s1729_s28 = sshll.u32 %s1802_s10, 7  ;;  %p1730_p8 = scmp.ne.s32.totalorder %s1798_s9, 1 }
  0x1d   : > { %v1886_v2 = vshrl.u32 %v2794_v1, 7 }
  0x1f   : > { %v2801_v4 = vsub.s32 0, %v1886_v2  ;;  %v2800_v6 = vsub.s32 1, %v1886_v2  ;;  %v2799_v8 = vsub.s32 2, %v1886_v2  ;;  %v2798_v10 = vsub.s32 3, %v1886_v2 }
  0x20   : > { %v2797_v16 = vsub.s32 4, %v1886_v2  ;;  %v2796_v34 = vsub.s32 5, %v1886_v2  ;;  %v2795_v52 = vsub.s32 6, %v1886_v2 }
  0x21   : > { %v181_v5 = vrot.slane %v1888_v3, %v2801_v4  ;;  %v248_v7 = vrot.slane %v1888_v3, %v2800_v6  ;;  %v315_v9 = vrot.slane %v1888_v3, %v2799_v8  ;;  %v382_v11 = vrot.slane %v1888_v3, %v2798_v10 }
  0x22   : > { %v449_v19 = vrot.slane %v1888_v3, %v2797_v16  ;;  %v516_v37 = vrot.slane %v1888_v3, %v2796_v34  ;;  %v583_v55 = vrot.slane %v1888_v3, %v2795_v52 }
  0x23   : > { %191 = vbcast.lane.b32.xlu1 %v181_v5, 272  ;;  %183 = vbcast.lane.b32.xlu0 %v181_v5, 256 }
  0x27   : > { %195 = vbcast.lane.b32.xlu1 %v181_v5, 280  ;;  %187 = vbcast.lane.b32.xlu0 %v181_v5, 264 }
  0x2b   : > { %203 = vbcast.lane.b32.xlu1 %v181_v5, 296  ;;  %199 = vbcast.lane.b32.xlu0 %v181_v5, 288 }
  0x2f   : > { %211 = vbcast.lane.b32.xlu1 %v181_v5, 312  ;;  %207 = vbcast.lane.b32.xlu0 %v181_v5, 304 }
  0x33   : > { %219 = vbcast.lane.b32.xlu1 %v181_v5, 328  ;;  %215 = vbcast.lane.b32.xlu0 %v181_v5, 320 }
  0x37   : > { %227 = vbcast.lane.b32.xlu1 %v181_v5, 344  ;;  %223 = vbcast.lane.b32.xlu0 %v181_v5, 336 }
  0x3b   : > { %235 = vbcast.lane.b32.xlu1 %v181_v5, 360  ;;  %231 = vbcast.lane.b32.xlu0 %v181_v5, 352 }
  0x3f   : > { %243 = vbcast.lane.b32.xlu1 %v181_v5, 376  ;;  %239 = vbcast.lane.b32.xlu0 %v181_v5, 368 }
  0x43   : > { %254 = vbcast.lane.b32.xlu1 %v248_v7, 264  ;;  %250 = vbcast.lane.b32.xlu0 %v248_v7, 256 }
  0x47   : > { %262 = vbcast.lane.b32.xlu1 %v248_v7, 280  ;;  %258 = vbcast.lane.b32.xlu0 %v248_v7, 272 }
  0x4b   : > { %270 = vbcast.lane.b32.xlu1 %v248_v7, 296  ;;  %266 = vbcast.lane.b32.xlu0 %v248_v7, 288 }
  0x4f   : > { %278 = vbcast.lane.b32.xlu1 %v248_v7, 312  ;;  %274 = vbcast.lane.b32.xlu0 %v248_v7, 304 }
  0x53   : > { %286 = vbcast.lane.b32.xlu1 %v248_v7, 328  ;;  %282 = vbcast.lane.b32.xlu0 %v248_v7, 320 }
  0x57   : > { %294 = vbcast.lane.b32.xlu1 %v248_v7, 344  ;;  %290 = vbcast.lane.b32.xlu0 %v248_v7, 336 }
  0x5b   : > { %302 = vbcast.lane.b32.xlu1 %v248_v7, 360  ;;  %298 = vbcast.lane.b32.xlu0 %v248_v7, 352 }
  0x5f   : > { %310 = vbcast.lane.b32.xlu1 %v248_v7, 376  ;;  %306 = vbcast.lane.b32.xlu0 %v248_v7, 368 }
  0x63   : > { %321 = vbcast.lane.b32.xlu1 %v315_v9, 264  ;;  %317 = vbcast.lane.b32.xlu0 %v315_v9, 256 }
  0x67   : > { %329 = vbcast.lane.b32.xlu1 %v315_v9, 280  ;;  %325 = vbcast.lane.b32.xlu0 %v315_v9, 272 }
  0x6b   : > { %337 = vbcast.lane.b32.xlu1 %v315_v9, 296  ;;  %333 = vbcast.lane.b32.xlu0 %v315_v9, 288 }
  0x6f   : > { %345 = vbcast.lane.b32.xlu1 %v315_v9, 312  ;;  %341 = vbcast.lane.b32.xlu0 %v315_v9, 304 }
  0x73   : > { %353 = vbcast.lane.b32.xlu1 %v315_v9, 328  ;;  %349 = vbcast.lane.b32.xlu0 %v315_v9, 320 }
  0x77   : > { %361 = vbcast.lane.b32.xlu1 %v315_v9, 344  ;;  %357 = vbcast.lane.b32.xlu0 %v315_v9, 336 }
  0x7b   : > { %369 = vbcast.lane.b32.xlu1 %v315_v9, 360  ;;  %365 = vbcast.lane.b32.xlu0 %v315_v9, 352 }
  0x7f   : > { %377 = vbcast.lane.b32.xlu1 %v315_v9, 376  ;;  %373 = vbcast.lane.b32.xlu0 %v315_v9, 368 }
  0x83   : > { %388 = vbcast.lane.b32.xlu1 %v382_v11, 264  ;;  %384 = vbcast.lane.b32.xlu0 %v382_v11, 256 }
  0x87   : > { %396 = vbcast.lane.b32.xlu1 %v382_v11, 280  ;;  %392 = vbcast.lane.b32.xlu0 %v382_v11, 272 }
  0x8b   : > { %404 = vbcast.lane.b32.xlu1 %v382_v11, 296  ;;  %400 = vbcast.lane.b32.xlu0 %v382_v11, 288 }
  0x8f   : > { %412 = vbcast.lane.b32.xlu1 %v382_v11, 312  ;;  %408 = vbcast.lane.b32.xlu0 %v382_v11, 304 }
  0x93   : > { %420 = vbcast.lane.b32.xlu1 %v382_v11, 328  ;;  %416 = vbcast.lane.b32.xlu0 %v382_v11, 320 }
  0x95   : > { %v1906_v12 = vpop.permute.xlu1 %191  ;;  %v1908_v13 = vpop.permute.xlu0 %183 }
  0x97   : > { %428 = vbcast.lane.b32.xlu1 %v382_v11, 344  ;;  %424 = vbcast.lane.b32.xlu0 %v382_v11, 336 }
  0x99   : > { %v1910_v14 = vpop.permute.xlu1 %195  ;;  %v1912_v15 = vpop.permute.xlu0 %187 }
  0x9b   : > { %436 = vbcast.lane.b32.xlu1 %v382_v11, 360  ;;  %432 = vbcast.lane.b32.xlu0 %v382_v11, 352 }
  0x9d   : > { %v1915_v17 = vpop.permute.xlu1 %203  ;;  %v1917_v18 = vpop.permute.xlu0 %199 }
  0x9f   : > { %444 = vbcast.lane.b32.xlu1 %v382_v11, 376  ;;  %440 = vbcast.lane.b32.xlu0 %v382_v11, 368 }
  0xa1   : > { %v1922_v20 = vpop.permute.xlu1 %211  ;;  %v1924_v21 = vpop.permute.xlu0 %207 }
  0xa3   : > { %455 = vbcast.lane.b32.xlu1 %v449_v19, 264  ;;  %451 = vbcast.lane.b32.xlu0 %v449_v19, 256 }
  0xa5   : > { %v1926_v22 = vpop.permute.xlu1 %219  ;;  %v1928_v23 = vpop.permute.xlu0 %215 }
  0xa7   : > { %463 = vbcast.lane.b32.xlu1 %v449_v19, 280  ;;  %459 = vbcast.lane.b32.xlu0 %v449_v19, 272 }
  0xa9   : > { %v1930_v24 = vpop.permute.xlu1 %227  ;;  %v1932_v25 = vpop.permute.xlu0 %223 }
  0xaa   : > { %2807 = vst [vmem:[#allocation2_spill] sm:$0xff] %v1932_v25 }
  0xab   : > { %471 = vbcast.lane.b32.xlu1 %v449_v19, 296  ;;  %467 = vbcast.lane.b32.xlu0 %v449_v19, 288 }
  0xad   : > { %v1934_v26 = vpop.permute.xlu1 %235  ;;  %v1936_v27 = vpop.permute.xlu0 %231 }
  0xae   : > { %2808 = vst [vmem:[#allocation3_spill] sm:$0xff] %v1934_v26  ;;  %2809 = vst [vmem:[#allocation4_spill] sm:$0xff] %v1936_v27 }
  0xaf   : > { %479 = vbcast.lane.b32.xlu1 %v449_v19, 312  ;;  %475 = vbcast.lane.b32.xlu0 %v449_v19, 304 }
  0xb1   : > { %v1938_v28 = vpop.permute.xlu1 %243  ;;  %v1940_v29 = vpop.permute.xlu0 %239 }
  0xb3   : > { %487 = vbcast.lane.b32.xlu1 %v449_v19, 328  ;;  %483 = vbcast.lane.b32.xlu0 %v449_v19, 320 }
  0xb5   : > { %v1942_v30 = vpop.permute.xlu1 %254  ;;  %v1944_v31 = vpop.permute.xlu0 %250 }
  0xb7   : > { %495 = vbcast.lane.b32.xlu1 %v449_v19, 344  ;;  %491 = vbcast.lane.b32.xlu0 %v449_v19, 336 }
  0xb9   : > { %v1946_v32 = vpop.permute.xlu1 %262  ;;  %v1948_v33 = vpop.permute.xlu0 %258 }
  0xbb   : > { %503 = vbcast.lane.b32.xlu1 %v449_v19, 360  ;;  %499 = vbcast.lane.b32.xlu0 %v449_v19, 352 }
  0xbd   : > { %v1951_v35 = vpop.permute.xlu1 %270  ;;  %v1953_v36 = vpop.permute.xlu0 %266 }
  0xbf   : > { %511 = vbcast.lane.b32.xlu1 %v449_v19, 376  ;;  %507 = vbcast.lane.b32.xlu0 %v449_v19, 368 }
  0xc1   : > { %v1958_v38 = vpop.permute.xlu1 %278  ;;  %v1960_v39 = vpop.permute.xlu0 %274 }
  0xc3   : > { %522 = vbcast.lane.b32.xlu1 %v516_v37, 264  ;;  %518 = vbcast.lane.b32.xlu0 %v516_v37, 256 }
  0xc5   : > { %v1962_v40 = vpop.permute.xlu1 %286  ;;  %v1964_v41 = vpop.permute.xlu0 %282 }
  0xc7   : > { %530 = vbcast.lane.b32.xlu1 %v516_v37, 280  ;;  %526 = vbcast.lane.b32.xlu0 %v516_v37, 272 }
  0xc9   : > { %v1966_v42 = vpop.permute.xlu1 %294  ;;  %v1968_v43 = vpop.permute.xlu0 %290 }
  0xca   : > { %2810 = vst [vmem:[#allocation5_spill] sm:$0xff] %v1966_v42  ;;  %2811 = vst [vmem:[#allocation6_spill] sm:$0xff] %v1968_v43 }
  0xcb   : > { %538 = vbcast.lane.b32.xlu1 %v516_v37, 296  ;;  %534 = vbcast.lane.b32.xlu0 %v516_v37, 288 }
  0xcd   : > { %v1970_v44 = vpop.permute.xlu1 %302  ;;  %v1972_v45 = vpop.permute.xlu0 %298 }
  0xce   : > { %2812 = vst [vmem:[#allocation7_spill] sm:$0xff] %v1970_v44  ;;  %2813 = vst [vmem:[#allocation8_spill] sm:$0xff] %v1972_v45  ;;  %v2916_v44 = vsub.s32 7, %v1886_v2 }
  0xcf   : > { %546 = vbcast.lane.b32.xlu1 %v516_v37, 312  ;;  %542 = vbcast.lane.b32.xlu0 %v516_v37, 304 }
  0xd1   : > { %v1974_v46 = vpop.permute.xlu1 %310  ;;  %v1976_v47 = vpop.permute.xlu0 %306 }
  0xd3   : > { %554 = vbcast.lane.b32.xlu1 %v516_v37, 328  ;;  %550 = vbcast.lane.b32.xlu0 %v516_v37, 320 }
  0xd5   : > { %v1978_v48 = vpop.permute.xlu1 %321  ;;  %v1980_v49 = vpop.permute.xlu0 %317 }
  0xd7   : > { %562 = vbcast.lane.b32.xlu1 %v516_v37, 344  ;;  %558 = vbcast.lane.b32.xlu0 %v516_v37, 336 }
  0xd9   : > { %v1982_v50 = vpop.permute.xlu1 %329  ;;  %v1984_v51 = vpop.permute.xlu0 %325 }
  0xdb   : > { %570 = vbcast.lane.b32.xlu1 %v516_v37, 360  ;;  %566 = vbcast.lane.b32.xlu0 %v516_v37, 352 }
  0xdd   : > { %v1987_v53 = vpop.permute.xlu1 %337  ;;  %v1989_v54 = vpop.permute.xlu0 %333 }
  0xdf   : > { %578 = vbcast.lane.b32.xlu1 %v516_v37, 376  ;;  %574 = vbcast.lane.b32.xlu0 %v516_v37, 368  ;;  %v2802_v37 = vsub.s32 7, %v1886_v2 }
  0xe1   : > { %v1994_v56 = vpop.permute.xlu1 %345  ;;  %v1996_v57 = vpop.permute.xlu0 %341  ;;  %v650_v34 = vrot.slane %v1888_v3, %v2802_v37 }
  0xe3   : > { %589 = vbcast.lane.b32.xlu1 %v583_v55, 264  ;;  %585 = vbcast.lane.b32.xlu0 %v583_v55, 256 }
  0xe5   : > { %v1998_v58 = vpop.permute.xlu1 %353  ;;  %v2000_v59 = vpop.permute.xlu0 %349 }
  0xe6   : > { %2814 = vst [vmem:[#allocation9_spill] sm:$0xff] %v1998_v58  ;;  %2815 = vst [vmem:[#allocation10_spill] sm:$0xff] %v2000_v59 }
  0xe7   : > { %597 = vbcast.lane.b32.xlu1 %v583_v55, 280  ;;  %593 = vbcast.lane.b32.xlu0 %v583_v55, 272 }
  0xe9   : > { %v2002_v60 = vpop.permute.xlu1 %361  ;;  %v2004_v61 = vpop.permute.xlu0 %357 }
  0xea   : > { %2816 = vst [vmem:[#allocation11_spill] sm:$0xff] %v2002_v60  ;;  %2817 = vst [vmem:[#allocation12_spill] sm:$0xff] %v2004_v61 }
  0xeb   : > { %605 = vbcast.lane.b32.xlu1 %v583_v55, 296  ;;  %601 = vbcast.lane.b32.xlu0 %v583_v55, 288 }
  0xed   : > { %v2006_v62 = vpop.permute.xlu1 %369  ;;  %v2008_v63 = vpop.permute.xlu0 %365 }
  0xee   : > { %2818 = vst [vmem:[#allocation13_spill] sm:$0xff] %v2006_v62  ;;  %2819 = vst [vmem:[#allocation14_spill] sm:$0xff] %v2008_v63  ;;  %v2914_v62 = vsub.s32 5, %v1886_v2 }
  0xef   : > { %613 = vbcast.lane.b32.xlu1 %v583_v55, 312  ;;  %609 = vbcast.lane.b32.xlu0 %v583_v55, 304 }
  0xf1   : > { %v2010_v0 = vpop.permute.xlu1 %377  ;;  %v2012_v5 = vpop.permute.xlu0 %373 }
  0xf2   : > { %2820 = vst [vmem:[#allocation15_spill] sm:$0xff] %v2010_v0  ;;  %2821 = vst [vmem:[#allocation16_spill] sm:$0xff] %v2012_v5 }
  0xf3   : > { %621 = vbcast.lane.b32.xlu1 %v583_v55, 328  ;;  %617 = vbcast.lane.b32.xlu0 %v583_v55, 320 }
  0xf5   : > { %v2014_v7 = vpop.permute.xlu1 %388  ;;  %v2016_v9 = vpop.permute.xlu0 %384 }
  0xf6   : > { %2822 = vst [vmem:[#allocation17_spill] sm:$0xff] %v2014_v7  ;;  %2823 = vst [vmem:[#allocation18_spill] sm:$0xff] %v2016_v9 }
  0xf7   : > { %629 = vbcast.lane.b32.xlu1 %v583_v55, 344  ;;  %625 = vbcast.lane.b32.xlu0 %v583_v55, 336 }
  0xf9   : > { %v2018_v11 = vpop.permute.xlu1 %396  ;;  %v2020_v19 = vpop.permute.xlu0 %392 }
  0xfa   : > { %2824 = vst [vmem:[#allocation19_spill] sm:$0xff] %v2018_v11  ;;  %2825 = vst [vmem:[#allocation20_spill] sm:$0xff] %v2020_v19 }
  0xfb   : > { %637 = vbcast.lane.b32.xlu1 %v583_v55, 360  ;;  %633 = vbcast.lane.b32.xlu0 %v583_v55, 352 }
  0xfd   : > { %v2023_v1 = vpop.permute.xlu1 %404  ;;  %v2025_v52 = vpop.permute.xlu0 %400 }
  0xfe   : > { %2826 = vst [vmem:[#allocation21_spill] sm:$0xff] %v2023_v1  ;;  %2827 = vst [vmem:[#allocation22_spill] sm:$0xff] %v2025_v52 }
  0xff   : > { %645 = vbcast.lane.b32.xlu1 %v583_v55, 376  ;;  %641 = vbcast.lane.b32.xlu0 %v583_v55, 368 }
 0x101   : > { %v2030_v16 = vpop.permute.xlu1 %412  ;;  %v2032_v10 = vpop.permute.xlu0 %408 }
 0x102   : > { %2828 = vst [vmem:[#allocation23_spill] sm:$0xff] %v2030_v16  ;;  %2829 = vst [vmem:[#allocation24_spill] sm:$0xff] %v2032_v10 }
 0x103   : > { %656 = vbcast.lane.b32.xlu1 %v650_v34, 264  ;;  %652 = vbcast.lane.b32.xlu0 %v650_v34, 256 }
 0x105   : > { %v2034_v8 = vpop.permute.xlu1 %420  ;;  %v2036_v6 = vpop.permute.xlu0 %416 }
 0x106   : > { %2830 = vst [vmem:[#allocation25_spill] sm:$0xff] %v2034_v8  ;;  %2831 = vst [vmem:[#allocation26_spill] sm:$0xff] %v2036_v6 }
 0x107   : > { %664 = vbcast.lane.b32.xlu1 %v650_v34, 280  ;;  %660 = vbcast.lane.b32.xlu0 %v650_v34, 272 }
 0x109   : > { %v2038_v4 = vpop.permute.xlu1 %428  ;;  %v2040_v52 = vpop.permute.xlu0 %424 }
 0x10a   : > { %2832 = vst [vmem:[#allocation27_spill] sm:$0xff] %v2038_v4  ;;  %2833 = vst [vmem:[#allocation28_spill] sm:$0xff] %v2040_v52 }
 0x10b   : > { %672 = vbcast.lane.b32.xlu1 %v650_v34, 296  ;;  %668 = vbcast.lane.b32.xlu0 %v650_v34, 288 }
 0x10d   : > { %v2042_v55 = vpop.permute.xlu1 %436  ;;  %v2044_v3 = vpop.permute.xlu0 %432 }
 0x10e   : > { %2834 = vst [vmem:[#allocation29_spill] sm:$0xff] %v2042_v55  ;;  %2835 = vst [vmem:[#allocation30_spill] sm:$0xff] %v2044_v3  ;;  %v2059_v3 = vld [vmem:[%s1876_s24] sm:$0xff] }
 0x10f   : > { %680 = vbcast.lane.b32.xlu1 %v650_v34, 312  ;;  %676 = vbcast.lane.b32.xlu0 %v650_v34, 304  ;;  %v2239_v27 = vrot.slane %v2059_v3, %v2914_v62 }
 0x111   : > { %v2046_v37 = vpop.permute.xlu1 %444  ;;  %v2048_v8 = vpop.permute.xlu0 %440 }
 0x112   : > { %2836 = vst [vmem:[#allocation31_spill] sm:$0xff] %v2046_v37  ;;  %2837 = vst [vmem:[#allocation32_spill] sm:$0xff] %v2048_v8 }
 0x113   : > { %688 = vbcast.lane.b32.xlu1 %v650_v34, 328  ;;  %684 = vbcast.lane.b32.xlu0 %v650_v34, 320 }
 0x115   : > { %v2050_v6 = vpop.permute.xlu1 %455  ;;  %v2052_v4 = vpop.permute.xlu0 %451 }
 0x116   : > { %2838 = vst [vmem:[#allocation33_spill] sm:$0xff] %v2050_v6  ;;  %2839 = vst [vmem:[#allocation34_spill] sm:$0xff] %v2052_v4  ;;  %v2844_v6 = vsub.s32 0, %v1886_v2 }
 0x117   : > { %696 = vbcast.lane.b32.xlu1 %v650_v34, 344  ;;  %692 = vbcast.lane.b32.xlu0 %v650_v34, 336 }
 0x118   : > { %v845_v4 = vrot.slane %v2059_v3, %v2844_v6 }
 0x119   : > { %v2054_v52 = vpop.permute.xlu1 %463  ;;  %v2056_v55 = vpop.permute.xlu0 %459 }
 0x11a   : > { %2840 = vst [vmem:[#allocation35_spill] sm:$0xff] %v2054_v52  ;;  %2841 = vst [vmem:[#allocation36_spill] sm:$0xff] %v2056_v55 }
 0x11b   : > { %704 = vbcast.lane.b32.xlu1 %v650_v34, 360  ;;  %700 = vbcast.lane.b32.xlu0 %v650_v34, 352 }
 0x11d   : > { %v2061_v10 = vpop.permute.xlu1 %471  ;;  %v2063_v37 = vpop.permute.xlu0 %467 }
 0x11e   : > { %2842 = vst [vmem:[#allocation37_spill] sm:$0xff] %v2061_v10  ;;  %2843 = vst [vmem:[#allocation38_spill] sm:$0xff] %v2063_v37 }
 0x11f   : > { %712 = vbcast.lane.b32.xlu1 %v650_v34, 376  ;;  %708 = vbcast.lane.b32.xlu0 %v650_v34, 368 }
 0x121   : > { %v2068_v8 = vpop.permute.xlu1 %479  ;;  %v2070_v16 = vpop.permute.xlu0 %475 }
 0x122   : > { %2845 = vst [vmem:[#allocation39_spill] sm:$0xff] %v2068_v8  ;;  %2846 = vst [vmem:[#allocation40_spill] sm:$0xff] %v2070_v16 }
 0x123   : > { %851 = vbcast.lane.b32.xlu1 %v845_v4, 264  ;;  %847 = vbcast.lane.b32.xlu0 %v845_v4, 256 }
 0x125   : > { %v2072_v55 = vpop.permute.xlu1 %487  ;;  %v2074_v52 = vpop.permute.xlu0 %483 }
 0x126   : > { %2847 = vst [vmem:[#allocation41_spill] sm:$0xff] %v2072_v55  ;;  %2848 = vst [vmem:[#allocation42_spill] sm:$0xff] %v2074_v52 }
 0x127   : > { %859 = vbcast.lane.b32.xlu1 %v845_v4, 280  ;;  %855 = vbcast.lane.b32.xlu0 %v845_v4, 272 }
 0x129   : > { %v2076_v10 = vpop.permute.xlu1 %495  ;;  %v2078_v37 = vpop.permute.xlu0 %491 }
 0x12a   : > { %2849 = vst [vmem:[#allocation43_spill] sm:$0xff] %v2076_v10  ;;  %2850 = vst [vmem:[#allocation44_spill] sm:$0xff] %v2078_v37 }
 0x12b   : > { %867 = vbcast.lane.b32.xlu1 %v845_v4, 296  ;;  %863 = vbcast.lane.b32.xlu0 %v845_v4, 288 }
 0x12d   : > { %v2080_v34 = vpop.permute.xlu1 %503  ;;  %v2082_v6 = vpop.permute.xlu0 %499 }
 0x12e   : > { %2851 = vst [vmem:[#allocation45_spill] sm:$0xff] %v2080_v34  ;;  %2852 = vst [vmem:[#allocation46_spill] sm:$0xff] %v2082_v6 }
 0x12f   : > { %875 = vbcast.lane.b32.xlu1 %v845_v4, 312  ;;  %871 = vbcast.lane.b32.xlu0 %v845_v4, 304 }
 0x131   : > { %v2084_v16 = vpop.permute.xlu1 %511  ;;  %v2086_v8 = vpop.permute.xlu0 %507 }
 0x132   : > { %2853 = vst [vmem:[#allocation47_spill] sm:$0xff] %v2084_v16  ;;  %2854 = vst [vmem:[#allocation48_spill] sm:$0xff] %v2086_v8  ;;  %v2861_v16 = vsub.s32 1, %v1886_v2 }
 0x133   : > { %883 = vbcast.lane.b32.xlu1 %v845_v4, 328  ;;  %879 = vbcast.lane.b32.xlu0 %v845_v4, 320 }
 0x134   : > { %v912_v8 = vrot.slane %v2059_v3, %v2861_v16 }
 0x135   : > { %v2088_v52 = vpop.permute.xlu1 %522  ;;  %v2090_v55 = vpop.permute.xlu0 %518 }
 0x136   : > { %2855 = vst [vmem:[#allocation49_spill] sm:$0xff] %v2088_v52  ;;  %2856 = vst [vmem:[#allocation50_spill] sm:$0xff] %v2090_v55 }
 0x137   : > { %891 = vbcast.lane.b32.xlu1 %v845_v4, 344  ;;  %887 = vbcast.lane.b32.xlu0 %v845_v4, 336 }
 0x139   : > { %v2092_v10 = vpop.permute.xlu1 %530  ;;  %v2094_v37 = vpop.permute.xlu0 %526 }
 0x13a   : > { %2857 = vst [vmem:[#allocation51_spill] sm:$0xff] %v2092_v10  ;;  %2858 = vst [vmem:[#allocation52_spill] sm:$0xff] %v2094_v37 }
 0x13b   : > { %899 = vbcast.lane.b32.xlu1 %v845_v4, 360  ;;  %895 = vbcast.lane.b32.xlu0 %v845_v4, 352 }
 0x13d   : > { %v2096_v34 = vpop.permute.xlu1 %538  ;;  %v2098_v6 = vpop.permute.xlu0 %534 }
 0x13e   : > { %2859 = vst [vmem:[#allocation53_spill] sm:$0xff] %v2096_v34  ;;  %2860 = vst [vmem:[#allocation54_spill] sm:$0xff] %v2098_v6 }
 0x13f   : > { %907 = vbcast.lane.b32.xlu1 %v845_v4, 376  ;;  %903 = vbcast.lane.b32.xlu0 %v845_v4, 368 }
 0x141   : > { %v2103_v52 = vpop.permute.xlu1 %546  ;;  %v2105_v55 = vpop.permute.xlu0 %542 }
 0x142   : > { %2862 = vst [vmem:[#allocation55_spill] sm:$0xff] %v2103_v52  ;;  %2863 = vst [vmem:[#allocation56_spill] sm:$0xff] %v2105_v55 }
 0x143   : > { %918 = vbcast.lane.b32.xlu1 %v912_v8, 264  ;;  %914 = vbcast.lane.b32.xlu0 %v912_v8, 256 }
 0x145   : > { %v2107_v10 = vpop.permute.xlu1 %554  ;;  %v2109_v37 = vpop.permute.xlu0 %550 }
 0x146   : > { %2864 = vst [vmem:[#allocation57_spill] sm:$0xff] %v2107_v10  ;;  %2865 = vst [vmem:[#allocation58_spill] sm:$0xff] %v2109_v37 }
 0x147   : > { %926 = vbcast.lane.b32.xlu1 %v912_v8, 280  ;;  %922 = vbcast.lane.b32.xlu0 %v912_v8, 272 }
 0x149   : > { %v2111_v34 = vpop.permute.xlu1 %562  ;;  %v2113_v6 = vpop.permute.xlu0 %558 }
 0x14a   : > { %2866 = vst [vmem:[#allocation59_spill] sm:$0xff] %v2111_v34  ;;  %2867 = vst [vmem:[#allocation60_spill] sm:$0xff] %v2113_v6 }
 0x14b   : > { %934 = vbcast.lane.b32.xlu1 %v912_v8, 296  ;;  %930 = vbcast.lane.b32.xlu0 %v912_v8, 288 }
 0x14d   : > { %v2115_v4 = vpop.permute.xlu1 %570  ;;  %v2117_v16 = vpop.permute.xlu0 %566 }
 0x14e   : > { %2868 = vst [vmem:[#allocation61_spill] sm:$0xff] %v2115_v4  ;;  %2869 = vst [vmem:[#allocation62_spill] sm:$0xff] %v2117_v16 }
 0x14f   : > { %942 = vbcast.lane.b32.xlu1 %v912_v8, 312  ;;  %938 = vbcast.lane.b32.xlu0 %v912_v8, 304 }
 0x151   : > { %v2119_v52 = vpop.permute.xlu1 %578  ;;  %v2121_v55 = vpop.permute.xlu0 %574 }
 0x152   : > { %2870 = vst [vmem:[#allocation63_spill] sm:$0xff] %v2119_v52  ;;  %2871 = vst [vmem:[#allocation64_spill] sm:$0xff] %v2121_v55  ;;  %v2878_v52 = vsub.s32 2, %v1886_v2 }
 0x153   : > { %950 = vbcast.lane.b32.xlu1 %v912_v8, 328  ;;  %946 = vbcast.lane.b32.xlu0 %v912_v8, 320 }
 0x154   : > { %v979_v55 = vrot.slane %v2059_v3, %v2878_v52 }
 0x155   : > { %v2123_v10 = vpop.permute.xlu1 %589  ;;  %v2125_v37 = vpop.permute.xlu0 %585 }
 0x156   : > { %2872 = vst [vmem:[#allocation65_spill] sm:$0xff] %v2123_v10  ;;  %2873 = vst [vmem:[#allocation66_spill] sm:$0xff] %v2125_v37 }
 0x157   : > { %958 = vbcast.lane.b32.xlu1 %v912_v8, 344  ;;  %954 = vbcast.lane.b32.xlu0 %v912_v8, 336 }
 0x159   : > { %v2127_v34 = vpop.permute.xlu1 %597  ;;  %v2129_v6 = vpop.permute.xlu0 %593 }
 0x15a   : > { %2874 = vst [vmem:[#allocation67_spill] sm:$0xff] %v2127_v34  ;;  %2875 = vst [vmem:[#allocation68_spill] sm:$0xff] %v2129_v6 }
 0x15b   : > { %966 = vbcast.lane.b32.xlu1 %v912_v8, 360  ;;  %962 = vbcast.lane.b32.xlu0 %v912_v8, 352 }
 0x15d   : > { %v2131_v4 = vpop.permute.xlu1 %605  ;;  %v2133_v16 = vpop.permute.xlu0 %601 }
 0x15e   : > { %2876 = vst [vmem:[#allocation69_spill] sm:$0xff] %v2131_v4  ;;  %2877 = vst [vmem:[#allocation70_spill] sm:$0xff] %v2133_v16 }
 0x15f   : > { %974 = vbcast.lane.b32.xlu1 %v912_v8, 376  ;;  %970 = vbcast.lane.b32.xlu0 %v912_v8, 368 }
 0x161   : > { %v2138_v10 = vpop.permute.xlu1 %613  ;;  %v2140_v37 = vpop.permute.xlu0 %609 }
 0x162   : > { %2879 = vst [vmem:[#allocation71_spill] sm:$0xff] %v2138_v10  ;;  %2880 = vst [vmem:[#allocation72_spill] sm:$0xff] %v2140_v37 }
 0x163   : > { %985 = vbcast.lane.b32.xlu1 %v979_v55, 264  ;;  %981 = vbcast.lane.b32.xlu0 %v979_v55, 256 }
 0x165   : > { %v2142_v34 = vpop.permute.xlu1 %621  ;;  %v2144_v6 = vpop.permute.xlu0 %617 }
 0x166   : > { %2881 = vst [vmem:[#allocation73_spill] sm:$0xff] %v2142_v34  ;;  %2882 = vst [vmem:[#allocation74_spill] sm:$0xff] %v2144_v6 }
 0x167   : > { %993 = vbcast.lane.b32.xlu1 %v979_v55, 280  ;;  %989 = vbcast.lane.b32.xlu0 %v979_v55, 272 }
 0x169   : > { %v2146_v4 = vpop.permute.xlu1 %629  ;;  %v2148_v16 = vpop.permute.xlu0 %625 }
 0x16a   : > { %2883 = vst [vmem:[#allocation75_spill] sm:$0xff] %v2146_v4  ;;  %2884 = vst [vmem:[#allocation76_spill] sm:$0xff] %v2148_v16 }
 0x16b   : > { %1001 = vbcast.lane.b32.xlu1 %v979_v55, 296  ;;  %997 = vbcast.lane.b32.xlu0 %v979_v55, 288 }
 0x16d   : > { %v2150_v8 = vpop.permute.xlu1 %637  ;;  %v2152_v52 = vpop.permute.xlu0 %633 }
 0x16e   : > { %2885 = vst [vmem:[#allocation77_spill] sm:$0xff] %v2150_v8  ;;  %2886 = vst [vmem:[#allocation78_spill] sm:$0xff] %v2152_v52 }
 0x16f   : > { %1009 = vbcast.lane.b32.xlu1 %v979_v55, 312  ;;  %1005 = vbcast.lane.b32.xlu0 %v979_v55, 304 }
 0x171   : > { %v2154_v10 = vpop.permute.xlu1 %645  ;;  %v2156_v37 = vpop.permute.xlu0 %641 }
 0x172   : > { %2887 = vst [vmem:[#allocation79_spill] sm:$0xff] %v2154_v10  ;;  %2888 = vst [vmem:[#allocation80_spill] sm:$0xff] %v2156_v37  ;;  %v2895_v10 = vsub.s32 3, %v1886_v2 }
 0x173   : > { %1017 = vbcast.lane.b32.xlu1 %v979_v55, 328  ;;  %1013 = vbcast.lane.b32.xlu0 %v979_v55, 320 }
 0x174   : > { %v1046_v37 = vrot.slane %v2059_v3, %v2895_v10 }
 0x175   : > { %v2158_v34 = vpop.permute.xlu1 %656  ;;  %v2160_v6 = vpop.permute.xlu0 %652 }
 0x176   : > { %2889 = vst [vmem:[#allocation81_spill] sm:$0xff] %v2158_v34  ;;  %2890 = vst [vmem:[#allocation82_spill] sm:$0xff] %v2160_v6 }
 0x177   : > { %1025 = vbcast.lane.b32.xlu1 %v979_v55, 344  ;;  %1021 = vbcast.lane.b32.xlu0 %v979_v55, 336 }
 0x179   : > { %v2162_v4 = vpop.permute.xlu1 %664  ;;  %v2164_v16 = vpop.permute.xlu0 %660 }
 0x17a   : > { %2891 = vst [vmem:[#allocation83_spill] sm:$0xff] %v2162_v4  ;;  %2892 = vst [vmem:[#allocation84_spill] sm:$0xff] %v2164_v16 }
 0x17b   : > { %1033 = vbcast.lane.b32.xlu1 %v979_v55, 360  ;;  %1029 = vbcast.lane.b32.xlu0 %v979_v55, 352 }
 0x17d   : > { %v2166_v8 = vpop.permute.xlu1 %672  ;;  %v2168_v52 = vpop.permute.xlu0 %668 }
 0x17e   : > { %2893 = vst [vmem:[#allocation85_spill] sm:$0xff] %v2166_v8  ;;  %2894 = vst [vmem:[#allocation86_spill] sm:$0xff] %v2168_v52 }
 0x17f   : > { %1041 = vbcast.lane.b32.xlu1 %v979_v55, 376  ;;  %1037 = vbcast.lane.b32.xlu0 %v979_v55, 368 }
 0x181   : > { %v2173_v34 = vpop.permute.xlu1 %680  ;;  %v2175_v6 = vpop.permute.xlu0 %676 }
 0x182   : > { %2896 = vst [vmem:[#allocation87_spill] sm:$0xff] %v2173_v34  ;;  %2897 = vst [vmem:[#allocation88_spill] sm:$0xff] %v2175_v6 }
 0x183   : > { %1052 = vbcast.lane.b32.xlu1 %v1046_v37, 264  ;;  %1048 = vbcast.lane.b32.xlu0 %v1046_v37, 256 }
 0x185   : > { %v2177_v4 = vpop.permute.xlu1 %688  ;;  %v2179_v16 = vpop.permute.xlu0 %684 }
 0x186   : > { %2898 = vst [vmem:[#allocation89_spill] sm:$0xff] %v2177_v4  ;;  %2899 = vst [vmem:[#allocation90_spill] sm:$0xff] %v2179_v16 }
 0x187   : > { %1060 = vbcast.lane.b32.xlu1 %v1046_v37, 280  ;;  %1056 = vbcast.lane.b32.xlu0 %v1046_v37, 272 }
 0x189   : > { %v2181_v8 = vpop.permute.xlu1 %696  ;;  %v2183_v52 = vpop.permute.xlu0 %692 }
 0x18a   : > { %2900 = vst [vmem:[#allocation91_spill] sm:$0xff] %v2181_v8  ;;  %2901 = vst [vmem:[#allocation92_spill] sm:$0xff] %v2183_v52 }
 0x18b   : > { %1068 = vbcast.lane.b32.xlu1 %v1046_v37, 296  ;;  %1064 = vbcast.lane.b32.xlu0 %v1046_v37, 288 }
 0x18d   : > { %v2185_v55 = vpop.permute.xlu1 %704  ;;  %v2187_v10 = vpop.permute.xlu0 %700 }
 0x18e   : > { %2902 = vst [vmem:[#allocation93_spill] sm:$0xff] %v2185_v55  ;;  %2903 = vst [vmem:[#allocation94_spill] sm:$0xff] %v2187_v10 }
 0x18f   : > { %1076 = vbcast.lane.b32.xlu1 %v1046_v37, 312  ;;  %1072 = vbcast.lane.b32.xlu0 %v1046_v37, 304 }
 0x191   : > { %v2189_v34 = vpop.permute.xlu1 %712  ;;  %v2191_v6 = vpop.permute.xlu0 %708 }
 0x192   : > { %2904 = vst [vmem:[#allocation95_spill] sm:$0xff] %v2189_v34  ;;  %2905 = vst [vmem:[#allocation96_spill] sm:$0xff] %v2191_v6  ;;  %v2906_v6 = vsub.s32 4, %v1886_v2 }
 0x193   : > { %1084 = vbcast.lane.b32.xlu1 %v1046_v37, 328  ;;  %1080 = vbcast.lane.b32.xlu0 %v1046_v37, 320 }
 0x194   : > { %v2208_v34 = vrot.slane %v2059_v3, %v2906_v6 }
 0x195   : > { %v2193_v4 = vpop.permute.xlu1 %851  ;;  %v2195_v16 = vpop.permute.xlu0 %847 }
 0x196   : > { %2907 = vst [vmem:[#allocation97_spill] sm:$0xff] %v2208_v34 }
 0x197   : > { %1092 = vbcast.lane.b32.xlu1 %v1046_v37, 344  ;;  %1088 = vbcast.lane.b32.xlu0 %v1046_v37, 336 }
 0x199   : > { %v2197_v8 = vpop.permute.xlu1 %859  ;;  %v2199_v52 = vpop.permute.xlu0 %855 }
 0x19b   : > { %1100 = vbcast.lane.b32.xlu1 %v1046_v37, 360  ;;  %1096 = vbcast.lane.b32.xlu0 %v1046_v37, 352 }
 0x19d   : > { %v2201_v55 = vpop.permute.xlu1 %867  ;;  %v2203_v10 = vpop.permute.xlu0 %863 }
 0x19f   : > { %1108 = vbcast.lane.b32.xlu1 %v1046_v37, 376  ;;  %1104 = vbcast.lane.b32.xlu0 %v1046_v37, 368 }
 0x1a1   : > { %v2210_v1 = vpop.permute.xlu1 %875  ;;  %v2212_v19 = vpop.permute.xlu0 %871 }
 0x1a3   : > { %1119 = vbcast.lane.b32.xlu1 %v2208_v34, 264  ;;  %1115 = vbcast.lane.b32.xlu0 %v2208_v34, 256 }
 0x1a5   : > { %v2216_v11 = vpop.permute.xlu1 %883  ;;  %v2218_v9 = vpop.permute.xlu0 %879 }
 0x1a6   : > { %2908 = vst [vmem:[#allocation98_spill] sm:$0xff] %v2216_v11  ;;  %2909 = vst [vmem:[#allocation99_spill] sm:$0xff] %v2218_v9  ;;  %v2917_v9 = vlaneseq }
 0x1a7   : > { %1127 = vbcast.lane.b32.xlu1 %v2208_v34, 280  ;;  %1123 = vbcast.lane.b32.xlu0 %v2208_v34, 272 }
 0x1a8   : > { %v175_v11 = vand.u32 127, %v2917_v9 }
 0x1a9   : > { %v2222_v37 = vpop.permute.xlu1 %891  ;;  %v2224_v6 = vpop.permute.xlu0 %887 }
 0x1aa   : > { %2910 = vst [vmem:[#allocation100_spill] sm:$0xff] %v2222_v37  ;;  %2911 = vst [vmem:[#allocation101_spill] sm:$0xff] %v2224_v6 }
 0x1ab   : > { %1135 = vbcast.lane.b32.xlu1 %v2208_v34, 296  ;;  %1131 = vbcast.lane.b32.xlu0 %v2208_v34, 288 }
 0x1ad   : > { %v2228_v7 = vpop.permute.xlu1 %899  ;;  %v2230_v5 = vpop.permute.xlu0 %895 }
 0x1ae   : > { %2912 = vst [vmem:[#allocation102_spill] sm:$0xff] %v2228_v7  ;;  %2913 = vst [vmem:[#allocation103_spill] sm:$0xff] %v2230_v5  ;;  %v2915_v5 = vsub.s32 6, %v1886_v2  ;;  %v176_v2 = vstv %s1729_s28 }
 0x1af   : > { %1143 = vbcast.lane.b32.xlu1 %v2208_v34, 312  ;;  %1139 = vbcast.lane.b32.xlu0 %v2208_v34, 304  ;;  %v2283_v43 = vadd.s32 %v176_v2, %v175_v11 }
 0x1b0   : > { %v2246_v7 = vrot.slane %v2059_v3, %v2915_v5  ;;  %v2263_v5 = vrot.slane %v2059_v3, %v2916_v44 }
 0x1b1   : > { %v908_v0 = vpop.permute.xlu1 %907  ;;  %v904_v63 = vpop.permute.xlu0 %903  ;;  %vm716_vm0 = vcmp.eq.s32.totalorder %v1906_v12, %v2283_v43  ;;  %vm714_vm1 = vcmp.eq.s32.totalorder %v1908_v13, %v2283_v43  ;;  %vm717_vm2 = vcmp.eq.s32.totalorder %v1910_v14, %v2283_v43  ;;  %vm715_vm3 = vcmp.eq.s32.totalorder %v1912_v15, %v2283_v43 }
 0x1b2   : > { %vm729_vm4 = vcmp.eq.s32.totalorder %v1938_v28, %v2283_v43  ;;  %vm728_vm5 = vcmp.eq.s32.totalorder %v1940_v29, %v2283_v43  ;;  %vm731_vm6 = vcmp.eq.s32.totalorder %v1942_v30, %v2283_v43  ;;  %vm730_vm7 = vcmp.eq.s32.totalorder %v1944_v31, %v2283_v43 }
 0x1b3   : > { %1151 = vbcast.lane.b32.xlu1 %v2208_v34, 328  ;;  %1147 = vbcast.lane.b32.xlu0 %v2208_v34, 320  ;;  %v1393_v9 = vsel %vm729_vm4, %v908_v0, 0.0  ;;  %v1392_v11 = vsel %vm728_vm5, %v904_v63, 0.0  ;;  %vm745_vm8 = vcmp.eq.s32.totalorder %v1974_v46, %v2283_v43  ;;  %vm744_vm9 = vcmp.eq.s32.totalorder %v1976_v47, %v2283_v43 }
 0x1b4   : > { %vm719_vm10 = vcmp.eq.s32.totalorder %v1915_v17, %v2283_v43  ;;  %vm718_vm11 = vcmp.eq.s32.totalorder %v1917_v18, %v2283_v43  ;;  %vm733_vm12 = vcmp.eq.s32.totalorder %v1946_v32, %v2283_v43  ;;  %vm732_vm13 = vcmp.eq.s32.totalorder %v1948_v33, %v2283_v43 }
 0x1b5   : > { %v919_v61 = vpop.permute.xlu1 %918  ;;  %v915_v60 = vpop.permute.xlu0 %914  ;;  %v1378_v46 = vsel %vm714_vm1, %v2195_v16, 0.0  ;;  %vm747_vm14 = vcmp.eq.s32.totalorder %v1978_v48, %v2283_v43  ;;  %vm746_vm15 = vcmp.eq.s32.totalorder %v1980_v49, %v2283_v43  ;;  %vm720_vm1 = vcmp.eq.s32.totalorder %v1924_v21, %v2283_v43 }
 0x1b6   : > { %v1395_v28 = vsel %vm731_vm6, %v919_v61, 0.0  ;;  %vm735_vm4 = vcmp.eq.s32.totalorder %v1951_v35, %v2283_v43  ;;  %vm734_vm5 = vcmp.eq.s32.totalorder %v1953_v36, %v2283_v43  ;;  %v1381_v48 = vsel %vm717_vm2, %v2197_v8, 0.0 }
 0x1b7   : > { %1186 = vbcast.lane.b32.xlu1 %v2239_v27, 264  ;;  %1182 = vbcast.lane.b32.xlu0 %v2239_v27, 256  ;;  %v1380_v49 = vsel %vm716_vm0, %v2199_v52, 0.0  ;;  %vm749_vm6 = vcmp.eq.s32.totalorder %v1982_v50, %v2283_v43  ;;  %vm723_vm2 = vcmp.eq.s32.totalorder %v1926_v22, %v2283_v43  ;;  %vm722_vm0 = vcmp.eq.s32.totalorder %v1928_v23, %v2283_v43 }
 0x1b9   : > { %v2248_v6 = vpop.permute.xlu1 %926  ;;  %v2250_v37 = vpop.permute.xlu0 %922 }
 0x1ba   : > { %v1397_v33 = vsel %vm733_vm12, %v2248_v6, 0.0  ;;  %v1396_v15 = vsel %vm732_vm13, %v2250_v37, 0.0  ;;  %vm751_vm12 = vcmp.eq.s32.totalorder %v1987_v53, %v2283_v43  ;;  %vm750_vm13 = vcmp.eq.s32.totalorder %v1989_v54, %v2283_v43 }
 0x1bb   : > { %1249 = vbcast.lane.b32.xlu1 %v2246_v7, 256  ;;  %1190 = vbcast.lane.b32.xlu0 %v2239_v27, 272  ;;  %v1520_v16 = vadd.f32 %v1396_v15, %v1380_v49  ;;  %v1384_v53 = vsel %vm720_vm1, %v2212_v19, 0.0  ;;  %v2929_v49 = vld [vmem:[#allocation3_spill] sm:$0xff] }
 0x1bd   : > { %v2254_v62 = vpop.permute.xlu1 %934  ;;  %v2256_v45 = vpop.permute.xlu0 %930 }
 0x1be   : > { %v1399_v36 = vsel %vm735_vm4, %v2254_v62, 0.0  ;;  %v1398_v14 = vsel %vm734_vm5, %v2256_v45, 0.0  ;;  %v1383_v45 = vsel %vm719_vm10, %v2201_v55, 0.0  ;;  %vm725_vm10 = vcmp.eq.s32.totalorder %v1930_v24, %v2283_v43 }
 0x1bf   : > { %1194 = vbcast.lane.b32.xlu1 %v2239_v27, 280  ;;  %1253 = vbcast.lane.b32.xlu0 %v2246_v7, 264  ;;  %v1541_v52 = vadd.f32 %v1399_v36, %v1383_v45  ;;  %vm752_vm4 = vcmp.eq.s32.totalorder %v1996_v57, %v2283_v43  ;;  %v2923_v57 = vld [vmem:[#allocation6_spill] sm:$0xff] }
 0x1c0   : > { %vm740_vm5 = vcmp.eq.s32.totalorder %v2923_v57, %v2283_v43 }
 0x1c1   : > { %v2265_v34 = vpop.permute.xlu1 %942  ;;  %v2267_v26 = vpop.permute.xlu0 %938 }
 0x1c3   : > { %1316 = vbcast.lane.b32.xlu1 %v2263_v5, 256  ;;  %1257 = vbcast.lane.b32.xlu0 %v2246_v7, 272 }
 0x1c5   : > { %v2272_v59 = vpop.permute.xlu1 %950  ;;  %v2274_v58 = vpop.permute.xlu0 %946 }
 0x1c7   : > { %1198 = vbcast.lane.b32.xlu1 %v2239_v27, 288  ;;  %1320 = vbcast.lane.b32.xlu0 %v2263_v5, 264 }
 0x1c9   : > { %v2279_v44 = vpop.permute.xlu1 %958  ;;  %v2281_v3 = vpop.permute.xlu0 %954 }
 0x1ca   : > { %2918 = vst [vmem:[#allocation104_spill] sm:$0xff] %v2281_v3 }
 0x1cb   : > { %1324 = vbcast.lane.b32.xlu1 %v2263_v5, 272  ;;  %1261 = vbcast.lane.b32.xlu0 %v2246_v7, 280 }
 0x1cd   : > { %v2287_v42 = vpop.permute.xlu1 %966  ;;  %v2289_v25 = vpop.permute.xlu0 %962 }
 0x1ce   : > { %2919 = vst [vmem:[#allocation105_spill] sm:$0xff] %v2287_v42  ;;  %2920 = vst [vmem:[#allocation106_spill] sm:$0xff] %v2289_v25  ;;  %v1394_v42 = vsel %vm730_vm7, %v915_v60, 0.0  ;;  %vm748_vm7 = vcmp.eq.s32.totalorder %v1984_v51, %v2283_v43  ;;  %v1382_v51 = vsel %vm718_vm11, %v2203_v10, 0.0  ;;  %vm739_vm11 = vcmp.eq.s32.totalorder %v1962_v40, %v2283_v43 }
 0x1cf   : > { %1265 = vbcast.lane.b32.xlu1 %v2246_v7, 288  ;;  %1202 = vbcast.lane.b32.xlu0 %v2239_v27, 296  ;;  %v1506_v60 = vadd.f32 %v1394_v42, %v1378_v46  ;;  %v1534_v62 = vadd.f32 %v1398_v14, %v1382_v51  ;;  %v2934_v14 = vld [vmem:[#allocation101_spill] sm:$0xff]  ;;  %v2935_v51 = vld [vmem:[#allocation11_spill] sm:$0xff] }
 0x1d1   : > { %v975_v2 = vpop.permute.xlu1 %974  ;;  %v971_v25 = vpop.permute.xlu0 %970 }
 0x1d2   : > { %v1409_v3 = vsel %vm745_vm8, %v975_v2, 0.0  ;;  %v1408_v29 = vsel %vm744_vm9, %v971_v25, 0.0  ;;  %v1379_v25 = vsel %vm715_vm3, %v2193_v4, 0.0  ;;  %vm721_vm3 = vcmp.eq.s32.totalorder %v1922_v20, %v2283_v43 }
 0x1d3   : > { %v2317_v30 = vadd.f32 %v1409_v3, %v1393_v9  ;;  %v2319_v31 = vadd.f32 %v1408_v29, %v1392_v11  ;;  %1206 = vbcast.lane.b32.xlu1 %v2239_v27, 304  ;;  %1328 = vbcast.lane.b32.xlu0 %v2263_v5, 280  ;;  %v1513_v47 = vadd.f32 %v1395_v28, %v1379_v25  ;;  %v2921_v28 = vld [vmem:[#allocation2_spill] sm:$0xff]  ;;  %v2925_v29 = vld [vmem:[#allocation99_spill] sm:$0xff] }
 0x1d4   : > { %v1527_v4 = vadd.f32 %v1397_v33, %v1381_v48  ;;  %vm737_vm8 = vcmp.eq.s32.totalorder %v1958_v38, %v2283_v43  ;;  %vm736_vm9 = vcmp.eq.s32.totalorder %v1960_v39, %v2283_v43  ;;  %v1386_v25 = vsel %vm722_vm0, %v2925_v29, 0.0 }
 0x1d5   : > { %v986_v61 = vpop.permute.xlu1 %985  ;;  %v982_v32 = vpop.permute.xlu0 %981  ;;  %v1401_v39 = vsel %vm737_vm8, %v2265_v34, 0.0  ;;  %v1400_v17 = vsel %vm736_vm9, %v2267_v26, 0.0  ;;  %v1385_v26 = vsel %vm721_vm3, %v2210_v1, 0.0  ;;  %vm724_vm3 = vcmp.eq.s32.totalorder %v2921_v28, %v2283_v43 }
 0x1d6   : > { %v1411_v63 = vsel %vm747_vm14, %v986_v61, 0.0  ;;  %v1410_v0 = vsel %vm746_vm15, %v982_v32, 0.0  ;;  %vm738_vm14 = vcmp.eq.s32.totalorder %v1964_v41, %v2283_v43  ;;  %v1555_v54 = vadd.f32 %v1401_v39, %v1385_v26  ;;  %v2927_v32 = vld [vmem:[#allocation10_spill] sm:$0xff]  ;;  %v2939_v26 = vld [vmem:[#allocation4_spill] sm:$0xff] }
 0x1d7   : > { %v2345_v13 = vadd.f32 %v1513_v47, %v1411_v63  ;;  %v2347_v42 = vadd.f32 %v1506_v60, %v1410_v0  ;;  %1332 = vbcast.lane.b32.xlu1 %v2263_v5, 288  ;;  %1269 = vbcast.lane.b32.xlu0 %v2246_v7, 296  ;;  %v1548_v34 = vadd.f32 %v1400_v17, %v1384_v53  ;;  %v1403_v41 = vsel %vm739_vm11, %v2272_v59, 0.0  ;;  %v2926_v60 = vld [vmem:[#allocation9_spill] sm:$0xff]  ;;  %v2928_v63 = vld [vmem:[#allocation104_spill] sm:$0xff]  ;;  %v2938_v17 = vld [vmem:[#allocation106_spill] sm:$0xff] }
 0x1d8   : > { %vm753_vm15 = vcmp.eq.s32.totalorder %v1994_v56, %v2283_v43  ;;  %v1402_v20 = vsel %vm738_vm14, %v2274_v58, 0.0  ;;  %v2922_v56 = vld [vmem:[#allocation5_spill] sm:$0xff]  ;;  %v2924_v58 = vld [vmem:[#allocation98_spill] sm:$0xff]  ;;  %v1404_v22 = vsel %vm740_vm5, %v2928_v63, 0.0  ;;  %vm757_vm9 = vcmp.eq.s32.totalorder %v2935_v51, %v2283_v43 }
 0x1d9   : > { %v994_v37 = vpop.permute.xlu1 %993  ;;  %v990_v35 = vpop.permute.xlu0 %989  ;;  %vm741_vm1 = vcmp.eq.s32.totalorder %v2922_v56, %v2283_v43  ;;  %v1387_v59 = vsel %vm723_vm2, %v2924_v58, 0.0  ;;  %v1562_v47 = vadd.f32 %v1402_v20, %v1386_v25  ;;  %vm727_vm2 = vcmp.eq.s32.totalorder %v2929_v49, %v2283_v43  ;;  %v2943_v56 = vld [vmem:[#allocation14_spill] sm:$0xff]  ;;  %v2950_v51 = vld [vmem:[#allocation21_spill] sm:$0xff] }
 0x1da   : > { %v1413_v8 = vsel %vm749_vm6, %v994_v37, 0.0  ;;  %v1412_v6 = vsel %vm748_vm7, %v990_v35, 0.0  ;;  %v1569_v46 = vadd.f32 %v1403_v41, %v1387_v59  ;;  %vm755_vm6 = vcmp.eq.s32.totalorder %v2926_v60, %v2283_v43  ;;  %v2931_v37 = vld [vmem:[#allocation7_spill] sm:$0xff]  ;;  %v2933_v35 = vld [vmem:[#allocation100_spill] sm:$0xff] }
 0x1db   : > { %v2373_v12 = vadd.f32 %v1527_v4, %v1413_v8  ;;  %v2375_v50 = vadd.f32 %v1520_v16, %v1412_v6  ;;  %1273 = vbcast.lane.b32.xlu1 %v2246_v7, 304  ;;  %1210 = vbcast.lane.b32.xlu0 %v2239_v27, 312  ;;  %vm754_vm7 = vcmp.eq.s32.totalorder %v2927_v32, %v2283_v43  ;;  %v1405_v15 = vsel %vm741_vm1, %v2279_v44, 0.0  ;;  %v2930_v16 = vld [vmem:[#allocation97_spill] sm:$0xff]  ;;  %v2932_v44 = vld [vmem:[#allocation8_spill] sm:$0xff] }
 0x1dc   : > { %vm743_vm0 = vcmp.eq.s32.totalorder %v2931_v37, %v2283_v43  ;;  %vm742_vm8 = vcmp.eq.s32.totalorder %v2932_v44, %v2283_v43  ;;  %v1389_v36 = vsel %vm725_vm10, %v2933_v35, 0.0  ;;  %v1388_v8 = vsel %vm724_vm3, %v2934_v14, 0.0  ;;  %v2945_v60 = vld [vmem:[#allocation16_spill] sm:$0xff]  ;;  %v2948_v35 = vld [vmem:[#allocation19_spill] sm:$0xff] }
 0x1dd   : > { %v1002_v3 = vpop.permute.xlu1 %1001  ;;  %v998_v38 = vpop.permute.xlu0 %997  ;;  %v1583_v6 = vadd.f32 %v1405_v15, %v1389_v36  ;;  %v1576_v45 = vadd.f32 %v1404_v22, %v1388_v8  ;;  %v1406_v24 = vsel %vm742_vm8, %v2938_v17, 0.0  ;;  %vm758_vm11 = vcmp.eq.s32.totalorder %v2943_v56, %v2283_v43  ;;  %v2946_v22 = vld [vmem:[#allocation17_spill] sm:$0xff]  ;;  %v2949_v14 = vld [vmem:[#allocation20_spill] sm:$0xff]  ;;  %v2952_v17 = vld [vmem:[#allocation23_spill] sm:$0xff] }
 0x1de   : > { %v1415_v55 = vsel %vm751_vm12, %v1002_v3, 0.0  ;;  %v1414_v9 = vsel %vm750_vm13, %v998_v38, 0.0  ;;  %v2937_v38 = vld [vmem:[#allocation105_spill] sm:$0xff]  ;;  %vm726_vm13 = vcmp.eq.s32.totalorder %v2939_v26, %v2283_v43  ;;  %vm765_vm1 = vcmp.eq.s32.totalorder %v2948_v35, %v2283_v43 }
 0x1df   : > { %v2399_v18 = vadd.f32 %v1541_v52, %v1415_v55  ;;  %v2401_v10 = vadd.f32 %v1534_v62, %v1414_v9  ;;  %1214 = vbcast.lane.b32.xlu1 %v2239_v27, 320  ;;  %1336 = vbcast.lane.b32.xlu0 %v2263_v5, 296  ;;  %v2936_v62 = vld [vmem:[#allocation12_spill] sm:$0xff]  ;;  %v1407_v39 = vsel %vm743_vm0, %v2937_v38, 0.0  ;;  %vm764_vm5 = vcmp.eq.s32.totalorder %v2949_v14, %v2283_v43  ;;  %v2963_v14 = vld [vmem:[#allocation34_spill] sm:$0xff] }
 0x1e0   : > { %vm756_vm12 = vcmp.eq.s32.totalorder %v2936_v62, %v2283_v43  ;;  %v2951_v62 = vld [vmem:[#allocation22_spill] sm:$0xff] }
 0x1e1   : > { %v1010_v11 = vpop.permute.xlu1 %1009  ;;  %v1006_v40 = vpop.permute.xlu0 %1005 }
 0x1e2   : > { %v1417_v1 = vsel %vm753_vm15, %v1010_v11, 0.0  ;;  %v1416_v2 = vsel %vm752_vm4, %v1006_v40, 0.0  ;;  %v2941_v40 = vld [vmem:[#allocation103_spill] sm:$0xff]  ;;  %vm760_vm15 = vcmp.eq.s32.totalorder %v2945_v60, %v2283_v43  ;;  %vm763_vm4 = vcmp.eq.s32.totalorder %v2946_v22, %v2283_v43 }
 0x1e3   : > { %v2425_v21 = vadd.f32 %v1555_v54, %v1417_v1  ;;  %v2427_v19 = vadd.f32 %v1548_v34, %v1416_v2  ;;  %1340 = vbcast.lane.b32.xlu1 %v2263_v5, 304  ;;  %1277 = vbcast.lane.b32.xlu0 %v2246_v7, 312  ;;  %v2940_v34 = vld [vmem:[#allocation102_spill] sm:$0xff]  ;;  %v1390_v41 = vsel %vm726_vm13, %v2941_v40, 0.0  ;;  %v2942_v2 = vld [vmem:[#allocation13_spill] sm:$0xff] }
 0x1e4   : > { %v1391_v11 = vsel %vm727_vm2, %v2940_v34, 0.0  ;;  %v1590_v1 = vadd.f32 %v1406_v24, %v1390_v41  ;;  %vm759_vm10 = vcmp.eq.s32.totalorder %v2942_v2, %v2283_v43  ;;  %vm769_vm2 = vcmp.eq.s32.totalorder %v2952_v17, %v2283_v43  ;;  %v2955_v41 = vld [vmem:[#allocation26_spill] sm:$0xff] }
 0x1e5   : > { %v1018_v61 = vpop.permute.xlu1 %1017  ;;  %v1014_v33 = vpop.permute.xlu0 %1013  ;;  %v1597_v20 = vadd.f32 %v1407_v39, %v1391_v11  ;;  %v2954_v11 = vld [vmem:[#allocation25_spill] sm:$0xff] }
 0x1e6   : > { %v1419_v0 = vsel %vm755_vm6, %v1018_v61, 0.0  ;;  %v1418_v48 = vsel %vm754_vm7, %v1014_v33, 0.0  ;;  %vm767_vm6 = vcmp.eq.s32.totalorder %v2950_v51, %v2283_v43  ;;  %vm766_vm7 = vcmp.eq.s32.totalorder %v2951_v62, %v2283_v43  ;;  %v2965_v62 = vld [vmem:[#allocation36_spill] sm:$0xff] }
 0x1e7   : > { %v2451_v23 = vadd.f32 %v1569_v46, %v1419_v0  ;;  %v2453_v4 = vadd.f32 %v1562_v47, %v1418_v48  ;;  %1218 = vbcast.lane.b32.xlu1 %v2239_v27, 328  ;;  %1155 = vbcast.lane.b32.xlu0 %v2930_v16, 336  ;;  %v2944_v46 = vld [vmem:[#allocation15_spill] sm:$0xff]  ;;  %v2947_v48 = vld [vmem:[#allocation18_spill] sm:$0xff]  ;;  %vm771_vm8 = vcmp.eq.s32.totalorder %v2954_v11, %v2283_v43  ;;  %v2969_v11 = vld [vmem:[#allocation40_spill] sm:$0xff] }
 0x1e8   : > { %vm761_vm14 = vcmp.eq.s32.totalorder %v2944_v46, %v2283_v43  ;;  %vm762_vm3 = vcmp.eq.s32.totalorder %v2947_v48, %v2283_v43 }
 0x1e9   : > { %v1026_v52 = vpop.permute.xlu1 %1025  ;;  %v1022_v3 = vpop.permute.xlu0 %1021 }
 0x1ea   : > { %v1421_v55 = vsel %vm757_vm9, %v1026_v52, 0.0  ;;  %v1420_v9 = vsel %vm756_vm12, %v1022_v3, 0.0  ;;  %vm770_vm9 = vcmp.eq.s32.totalorder %v2955_v41, %v2283_v43 }
 0x1eb   : > { %v2477_v53 = vadd.f32 %v1583_v6, %v1421_v55  ;;  %v2479_v54 = vadd.f32 %v1576_v45, %v1420_v9  ;;  %1344 = vbcast.lane.b32.xlu1 %v2263_v5, 312  ;;  %1281 = vbcast.lane.b32.xlu0 %v2246_v7, 320  ;;  %v2953_v55 = vld [vmem:[#allocation24_spill] sm:$0xff] }
 0x1ec   : > { %vm768_vm0 = vcmp.eq.s32.totalorder %v2953_v55, %v2283_v43 }
 0x1ed   : > { %v1034_v28 = vpop.permute.xlu1 %1033  ;;  %v1030_v57 = vpop.permute.xlu0 %1029 }
 0x1ee   : > { %v1423_v58 = vsel %vm759_vm10, %v1034_v28, 0.0  ;;  %v1422_v59 = vsel %vm758_vm11, %v1030_v57, 0.0  ;;  %v2956_v28 = vld [vmem:[#allocation27_spill] sm:$0xff]  ;;  %v2957_v57 = vld [vmem:[#allocation28_spill] sm:$0xff] }
 0x1ef   : > { %v2492_v29 = vadd.f32 %v1597_v20, %v1423_v58  ;;  %v2494_v25 = vadd.f32 %v1590_v1, %v1422_v59  ;;  %1222 = vbcast.lane.b32.xlu1 %v2239_v27, 336  ;;  %1159 = vbcast.lane.b32.xlu0 %v2930_v16, 344  ;;  %vm773_vm12 = vcmp.eq.s32.totalorder %v2956_v28, %v2283_v43 }
 0x1f0   : > { %vm772_vm13 = vcmp.eq.s32.totalorder %v2957_v57, %v2283_v43 }
 0x1f1   : > { %v1042_v47 = vpop.permute.xlu1 %1041  ;;  %v1038_v61 = vpop.permute.xlu0 %1037 }
 0x1f2   : > { %v1425_v32 = vsel %vm761_vm14, %v1042_v47, 0.0  ;;  %v1424_v33 = vsel %vm760_vm15, %v1038_v61, 0.0  ;;  %v2958_v47 = vld [vmem:[#allocation29_spill] sm:$0xff]  ;;  %v2959_v61 = vld [vmem:[#allocation30_spill] sm:$0xff] }
 0x1f3   : > { %v2503_v15 = vadd.f32 %v2317_v30, %v1425_v32  ;;  %v2506_v63 = vadd.f32 %v2319_v31, %v1424_v33  ;;  %1348 = vbcast.lane.b32.xlu1 %v2263_v5, 320  ;;  %1285 = vbcast.lane.b32.xlu0 %v2246_v7, 328  ;;  %vm775_vm10 = vcmp.eq.s32.totalorder %v2958_v47, %v2283_v43 }
 0x1f4   : > { %vm774_vm11 = vcmp.eq.s32.totalorder %v2959_v61, %v2283_v43 }
 0x1f5   : > { %v1053_v0 = vpop.permute.xlu1 %1052  ;;  %v1049_v49 = vpop.permute.xlu0 %1048 }
 0x1f6   : > { %v1427_v37 = vsel %vm763_vm4, %v1053_v0, 0.0  ;;  %v1426_v44 = vsel %vm762_vm3, %v1049_v49, 0.0  ;;  %v2960_v0 = vld [vmem:[#allocation31_spill] sm:$0xff]  ;;  %v2961_v49 = vld [vmem:[#allocation32_spill] sm:$0xff]  ;;  %vm778_vm3 = vcmp.eq.s32.totalorder %v2963_v14, %v2283_v43 }
 0x1f7   : > { %v2515_v30 = vadd.f32 %v2345_v13, %v1427_v37  ;;  %v2518_v31 = vadd.f32 %v2347_v42, %v1426_v44  ;;  %1226 = vbcast.lane.b32.xlu1 %v2239_v27, 344  ;;  %1163 = vbcast.lane.b32.xlu0 %v2930_v16, 352  ;;  %vm777_vm14 = vcmp.eq.s32.totalorder %v2960_v0, %v2283_v43  ;;  %v2974_v0 = vld [vmem:[#allocation66_spill] sm:$0xff] }
 0x1f8   : > { %vm776_vm15 = vcmp.eq.s32.totalorder %v2961_v49, %v2283_v43 }
 0x1f9   : > { %v1061_v36 = vpop.permute.xlu1 %1060  ;;  %v1057_v8 = vpop.permute.xlu0 %1056 }
 0x1fa   : > { %v1429_v6 = vsel %vm765_vm1, %v1061_v36, 0.0  ;;  %v1428_v45 = vsel %vm764_vm5, %v1057_v8, 0.0  ;;  %vm780_vm5 = vcmp.eq.s32.totalorder %v2965_v62, %v2283_v43 }
 0x1fb   : > { %v2527_v13 = vadd.f32 %v2373_v12, %v1429_v6  ;;  %v2530_v42 = vadd.f32 %v2375_v50, %v1428_v45  ;;  %1352 = vbcast.lane.b32.xlu1 %v2263_v5, 328  ;;  %1289 = vbcast.lane.b32.xlu0 %v2246_v7, 336 }
 0x1fd   : > { %v1069_v52 = vpop.permute.xlu1 %1068  ;;  %v1065_v3 = vpop.permute.xlu0 %1064 }
 0x1fe   : > { %v1431_v38 = vsel %vm767_vm6, %v1069_v52, 0.0  ;;  %v1430_v39 = vsel %vm766_vm7, %v1065_v3, 0.0 }
 0x1ff   : > { %v2539_v12 = vadd.f32 %v2399_v18, %v1431_v38  ;;  %v2542_v50 = vadd.f32 %v2401_v10, %v1430_v39  ;;  %1230 = vbcast.lane.b32.xlu1 %v2239_v27, 352  ;;  %1167 = vbcast.lane.b32.xlu0 %v2930_v16, 360 }
 0x201   : > { %v1077_v24 = vpop.permute.xlu1 %1076  ;;  %v1073_v9 = vpop.permute.xlu0 %1072 }
 0x202   : > { %v1433_v26 = vsel %vm769_vm2, %v1077_v24, 0.0  ;;  %v1432_v34 = vsel %vm768_vm0, %v1073_v9, 0.0  ;;  %v2967_v24 = vld [vmem:[#allocation38_spill] sm:$0xff]  ;;  %vm784_vm0 = vcmp.eq.s32.totalorder %v2969_v11, %v2283_v43 }
 0x203   : > { %v2551_v18 = vadd.f32 %v2425_v21, %v1433_v26  ;;  %v2554_v10 = vadd.f32 %v2427_v19, %v1432_v34  ;;  %1356 = vbcast.lane.b32.xlu1 %v2263_v5, 336  ;;  %1293 = vbcast.lane.b32.xlu0 %v2246_v7, 344  ;;  %vm782_vm7 = vcmp.eq.s32.totalorder %v2967_v24, %v2283_v43  ;;  %v2981_v24 = vld [vmem:[#allocation81_spill] sm:$0xff] }
 0x205   : > { %v1085_v40 = vpop.permute.xlu1 %1084  ;;  %v1081_v20 = vpop.permute.xlu0 %1080 }
 0x206   : > { %v1435_v1 = vsel %vm771_vm8, %v1085_v40, 0.0  ;;  %v1434_v2 = vsel %vm770_vm9, %v1081_v20, 0.0 }
 0x207   : > { %v2563_v21 = vadd.f32 %v2451_v23, %v1435_v1  ;;  %v2566_v19 = vadd.f32 %v2453_v4, %v1434_v2  ;;  %1234 = vbcast.lane.b32.xlu1 %v2239_v27, 360  ;;  %1171 = vbcast.lane.b32.xlu0 %v2930_v16, 368  ;;  %v2971_v2 = vld [vmem:[#allocation42_spill] sm:$0xff] }
 0x208   : > { %vm786_vm9 = vcmp.eq.s32.totalorder %v2971_v2, %v2283_v43 }
 0x209   : > { %v1093_v56 = vpop.permute.xlu1 %1092  ;;  %v1089_v58 = vpop.permute.xlu0 %1088 }
 0x20a   : > { %v1437_v59 = vsel %vm773_vm12, %v1093_v56, 0.0  ;;  %v1436_v46 = vsel %vm772_vm13, %v1089_v58, 0.0 }
 0x20b   : > { %v2575_v23 = vadd.f32 %v2477_v53, %v1437_v59  ;;  %v2578_v4 = vadd.f32 %v2479_v54, %v1436_v46  ;;  %1360 = vbcast.lane.b32.xlu1 %v2263_v5, 344  ;;  %1297 = vbcast.lane.b32.xlu0 %v2246_v7, 352  ;;  %v2973_v46 = vld [vmem:[#allocation50_spill] sm:$0xff] }
 0x20c   : > { %vm794_vm13 = vcmp.eq.s32.totalorder %v2973_v46, %v2283_v43 }
 0x20d   : > { %v1101_v60 = vpop.permute.xlu1 %1100  ;;  %v1097_v32 = vpop.permute.xlu0 %1096 }
 0x20e   : > { %v1439_v33 = vsel %vm775_vm10, %v1101_v60, 0.0  ;;  %v1438_v22 = vsel %vm774_vm11, %v1097_v32, 0.0  ;;  %vm810_vm10 = vcmp.eq.s32.totalorder %v2974_v0, %v2283_v43 }
 0x20f   : > { %v2587_v53 = vadd.f32 %v2492_v29, %v1439_v33  ;;  %v2590_v54 = vadd.f32 %v2494_v25, %v1438_v22  ;;  %1238 = vbcast.lane.b32.xlu1 %v2239_v27, 368  ;;  %1175 = vbcast.lane.b32.xlu0 %v2930_v16, 376  ;;  %v2962_v16 = vld [vmem:[#allocation33_spill] sm:$0xff] }
 0x210   : > { %vm779_vm4 = vcmp.eq.s32.totalorder %v2962_v16, %v2283_v43 }
 0x211   : > { %v1109_v48 = vpop.permute.xlu1 %1108  ;;  %v1105_v37 = vpop.permute.xlu0 %1104 }
 0x212   : > { %v1441_v44 = vsel %vm777_vm14, %v1109_v48, 0.0  ;;  %v1440_v35 = vsel %vm776_vm15, %v1105_v37, 0.0 }
 0x213   : > { %v2599_v29 = vadd.f32 %v2503_v15, %v1441_v44  ;;  %v2602_v25 = vadd.f32 %v2506_v63, %v1440_v35  ;;  %1364 = vbcast.lane.b32.xlu1 %v2263_v5, 352  ;;  %1301 = vbcast.lane.b32.xlu0 %v2246_v7, 360  ;;  %v2964_v63 = vld [vmem:[#allocation35_spill] sm:$0xff] }
 0x214   : > { %vm781_vm1 = vcmp.eq.s32.totalorder %v2964_v63, %v2283_v43  ;;  %v2976_v35 = vld [vmem:[#allocation51_spill] sm:$0xff]  ;;  %v2978_v63 = vld [vmem:[#allocation82_spill] sm:$0xff] }
 0x215   : > { %v1120_v36 = vpop.permute.xlu1 %1119  ;;  %v1116_v8 = vpop.permute.xlu0 %1115  ;;  %vm797_vm14 = vcmp.eq.s32.totalorder %v2976_v35, %v2283_v43  ;;  %v2988_v35 = vld [vmem:[#allocation86_spill] sm:$0xff] }
 0x216   : > { %v1443_v6 = vsel %vm779_vm4, %v1120_v36, 0.0  ;;  %v1442_v45 = vsel %vm778_vm3, %v1116_v8, 0.0  ;;  %v2977_v36 = vld [vmem:[#allocation65_spill] sm:$0xff]  ;;  %vm826_vm4 = vcmp.eq.s32.totalorder %v2978_v63, %v2283_v43 }
 0x217   : > { %v1516_v15 = vadd.f32 %v2515_v30, %v1443_v6  ;;  %v1509_v51 = vadd.f32 %v2518_v31, %v1442_v45  ;;  %1305 = vbcast.lane.b32.xlu1 %v2246_v7, 368  ;;  %1242 = vbcast.lane.b32.xlu0 %v2239_v27, 376  ;;  %v2966_v27 = vld [vmem:[#allocation37_spill] sm:$0xff]  ;;  %vm811_vm15 = vcmp.eq.s32.totalorder %v2977_v36, %v2283_v43 }
 0x218   : > { %vm783_vm6 = vcmp.eq.s32.totalorder %v2966_v27, %v2283_v43 }
 0x219   : > { %v1128_v52 = vpop.permute.xlu1 %1127  ;;  %v1124_v3 = vpop.permute.xlu0 %1123 }
 0x21a   : > { %v1445_v38 = vsel %vm781_vm1, %v1128_v52, 0.0  ;;  %v1444_v39 = vsel %vm780_vm5, %v1124_v3, 0.0  ;;  %v2979_v52 = vld [vmem:[#allocation68_spill] sm:$0xff]  ;;  %vm827_vm5 = vcmp.eq.s32.totalorder %v2981_v24, %v2283_v43 }
 0x21b   : > { %v1530_v17 = vadd.f32 %v2527_v13, %v1445_v38  ;;  %v1523_v30 = vadd.f32 %v2530_v42, %v1444_v39  ;;  %1309 = vbcast.lane.b32.xlu1 %v2246_v7, 376  ;;  %1368 = vbcast.lane.b32.xlu0 %v2263_v5, 360  ;;  %v2968_v7 = vld [vmem:[#allocation39_spill] sm:$0xff]  ;;  %vm812_vm3 = vcmp.eq.s32.totalorder %v2979_v52, %v2283_v43 }
 0x21c   : > { %vm785_vm2 = vcmp.eq.s32.totalorder %v2968_v7, %v2283_v43 }
 0x21d   : > { %v1136_v31 = vpop.permute.xlu1 %1135  ;;  %v1132_v55 = vpop.permute.xlu0 %1131 }
 0x21e   : > { %v1447_v9 = vsel %vm783_vm6, %v1136_v31, 0.0  ;;  %v1446_v26 = vsel %vm782_vm7, %v1132_v55, 0.0  ;;  %v2980_v31 = vld [vmem:[#allocation54_spill] sm:$0xff] }
 0x21f   : > { %v2627_v34 = vadd.f32 %v2539_v12, %v1447_v9  ;;  %v1537_v13 = vadd.f32 %v2542_v50, %v1446_v26  ;;  %1376 = vbcast.lane.b32.xlu1 %v2263_v5, 376  ;;  %1372 = vbcast.lane.b32.xlu0 %v2263_v5, 368  ;;  %v2970_v50 = vld [vmem:[#allocation41_spill] sm:$0xff]  ;;  %vm798_vm1 = vcmp.eq.s32.totalorder %v2980_v31, %v2283_v43 }
 0x220   : > { %vm787_vm8 = vcmp.eq.s32.totalorder %v2970_v50, %v2283_v43 }
 0x221   : > { %v1144_v42 = vpop.permute.xlu1 %1143  ;;  %v1140_v40 = vpop.permute.xlu0 %1139 }
 0x222   : > { %v1449_v41 = vsel %vm785_vm2, %v1144_v42, 0.0  ;;  %v1448_v20 = vsel %vm784_vm0, %v1140_v40, 0.0  ;;  %v2982_v40 = vld [vmem:[#allocation84_spill] sm:$0xff] }
 0x223   : > { %v2637_v1 = vadd.f32 %v2551_v18, %v1449_v41  ;;  %v2640_v12 = vadd.f32 %v2554_v10, %v1448_v20  ;;  %v2972_v18 = vld [vmem:[#allocation49_spill] sm:$0xff]  ;;  %vm828_vm6 = vcmp.eq.s32.totalorder %v2982_v40, %v2283_v43  ;;  %v2983_v41 = vld [vmem:[#allocation67_spill] sm:$0xff] }
 0x224   : > { %vm795_vm12 = vcmp.eq.s32.totalorder %v2972_v18, %v2283_v43  ;;  %vm813_vm7 = vcmp.eq.s32.totalorder %v2983_v41, %v2283_v43  ;;  %v2984_v18 = vld [vmem:[#allocation70_spill] sm:$0xff] }
 0x225   : > { %v1152_v5 = vpop.permute.xlu1 %1151  ;;  %v1148_v28 = vpop.permute.xlu0 %1147  ;;  %vm814_vm2 = vcmp.eq.s32.totalorder %v2984_v18, %v2283_v43 }
 0x226   : > { %v1451_v56 = vsel %vm787_vm8, %v1152_v5, 0.0  ;;  %v1450_v57 = vsel %vm786_vm9, %v1148_v28, 0.0 }
 0x227   : > { %v2647_v58 = vadd.f32 %v2563_v21, %v1451_v56  ;;  %v2650_v59 = vadd.f32 %v2566_v19, %v1450_v57  ;;  %v2975_v21 = vld [vmem:[#allocation52_spill] sm:$0xff] }
 0x228   : > { %vm796_vm11 = vcmp.eq.s32.totalorder %v2975_v21, %v2283_v43 }
 0x229   : > { %v1187_v10 = vpop.permute.xlu1 %1186  ;;  %v1183_v47 = vpop.permute.xlu0 %1182 }
 0x22a   : > { %v1459_v60 = vsel %vm795_vm12, %v1187_v10, 0.0  ;;  %v1458_v61 = vsel %vm794_vm13, %v1183_v47, 0.0  ;;  %vm830_vm12 = vcmp.eq.s32.totalorder %v2988_v35, %v2283_v43 }
 0x22b   : > { %v1517_v32 = vadd.f32 %v1516_v15, %v1459_v60  ;;  %v1510_v33 = vadd.f32 %v1509_v51, %v1458_v61 }
 0x22d   : > { %v1250_v22 = vpop.permute.xlu1 %1249  ;;  %v1191_v19 = vpop.permute.xlu0 %1190 }
 0x22e   : > { %v1474_v48 = vsel %vm810_vm10, %v1250_v22, 0.0  ;;  %v1460_v49 = vsel %vm796_vm11, %v1191_v19, 0.0  ;;  %v2987_v22 = vld [vmem:[#allocation83_spill] sm:$0xff] }
 0x22f   : > { %v1511_v37 = vadd.f32 %v1510_v33, %v1474_v48  ;;  %v1524_v44 = vadd.f32 %v1523_v30, %v1460_v49  ;;  %v2986_v33 = vld [vmem:[#allocation56_spill] sm:$0xff]  ;;  %vm829_vm9 = vcmp.eq.s32.totalorder %v2987_v22, %v2283_v43 }
 0x230   : > { %vm800_vm8 = vcmp.eq.s32.totalorder %v2986_v33, %v2283_v43 }
 0x231   : > { %v1195_v16 = vpop.permute.xlu1 %1194  ;;  %v1254_v14 = vpop.permute.xlu0 %1253 }
 0x232   : > { %v1461_v8 = vsel %vm797_vm14, %v1195_v16, 0.0  ;;  %v1475_v6 = vsel %vm811_vm15, %v1254_v14, 0.0 }
 0x233   : > { %v1531_v45 = vadd.f32 %v1530_v17, %v1461_v8  ;;  %v1518_v15 = vadd.f32 %v1517_v32, %v1475_v6 }
 0x235   : > { %v1317_v51 = vpop.permute.xlu1 %1316  ;;  %v1258_v62 = vpop.permute.xlu0 %1257 }
 0x236   : > { %v1490_v3 = vsel %vm826_vm4, %v1317_v51, 0.0  ;;  %v1476_v38 = vsel %vm812_vm3, %v1258_v62, 0.0  ;;  %v2990_v51 = vld [vmem:[#allocation72_spill] sm:$0xff] }
 0x237   : > { %v1512_v39 = vadd.f32 %v1511_v37, %v1490_v3  ;;  %v1525_v30 = vadd.f32 %v1524_v44, %v1476_v38  ;;  %vm816_vm10 = vcmp.eq.s32.totalorder %v2990_v51, %v2283_v43 }
 0x239   : > { %v1199_v27 = vpop.permute.xlu1 %1198  ;;  %v1321_v17 = vpop.permute.xlu0 %1320 }
 0x23a   : > { %v1462_v55 = vsel %vm798_vm1, %v1199_v27, 0.0  ;;  %v1491_v9 = vsel %vm827_vm5, %v1321_v17, 0.0  ;;  %v2993_v27 = vld [vmem:[#allocation85_spill] sm:$0xff] }
 0x23b   : > { %v1538_v26 = vadd.f32 %v1537_v13, %v1462_v55  ;;  %v1519_v7 = vadd.f32 %v1518_v15, %v1491_v9  ;;  %v2985_v13 = vld [vmem:[#allocation53_spill] sm:$0xff]  ;;  %vm831_vm15 = vcmp.eq.s32.totalorder %v2993_v27, %v2283_v43 }
 0x23c   : > { %vm799_vm0 = vcmp.eq.s32.totalorder %v2985_v13, %v2283_v43 }
 0x23d   : > { %v1619_v42 = vadd.f32 %v1519_v7, %v1512_v39  ;;  %v1325_v11 = vpop.permute.xlu1 %1324  ;;  %v1262_v20 = vpop.permute.xlu0 %1261 }
 0x23e   : > { %v1492_v50 = vsel %vm828_vm6, %v1325_v11, 0.0  ;;  %v1477_v5 = vsel %vm813_vm7, %v1262_v20, 0.0 }
 0x23f   : > { %v1526_v2 = vadd.f32 %v1525_v30, %v1492_v50  ;;  %v1532_v28 = vadd.f32 %v1531_v45, %v1477_v5  ;;  %v2992_v30 = vld [vmem:[#allocation58_spill] sm:$0xff] }
 0x240   : > { %vm802_vm14 = vcmp.eq.s32.totalorder %v2992_v30, %v2283_v43  ;;  %v3006_v30 = vld [vmem:[#allocation89_spill] sm:$0xff] }
 0x241   : > { %v1620_v56 = vadd.f32 %v1619_v42, %v1526_v2  ;;  %v1266_v57 = vpop.permute.xlu1 %1265  ;;  %v1203_v10 = vpop.permute.xlu0 %1202  ;;  %v2994_v42 = vld [vmem:[#allocation88_spill] sm:$0xff]  ;;  %v2996_v2 = vld [vmem:[#allocation57_spill] sm:$0xff] }
 0x242   : > { %v1478_v46 = vsel %vm814_vm2, %v1266_v57, 0.0  ;;  %v1463_v47 = vsel %vm799_vm0, %v1203_v10, 0.0  ;;  %vm832_vm4 = vcmp.eq.s32.totalorder %v2994_v42, %v2283_v43  ;;  %vm803_vm1 = vcmp.eq.s32.totalorder %v2996_v2, %v2283_v43  ;;  %v3010_v2 = vld [vmem:[#allocation92_spill] sm:$0xff] }
 0x243   : > { %v1539_v60 = vadd.f32 %v1538_v26, %v1478_v46  ;;  %v1545_v61 = vadd.f32 %v2627_v34, %v1463_v47  ;;  %v2989_v34 = vld [vmem:[#allocation69_spill] sm:$0xff]  ;;  %v2998_v46 = vld [vmem:[#allocation87_spill] sm:$0xff] }
 0x244   : > { %vm815_vm13 = vcmp.eq.s32.totalorder %v2989_v34, %v2283_v43  ;;  %vm833_vm6 = vcmp.eq.s32.totalorder %v2998_v46, %v2283_v43  ;;  %v3012_v46 = vld [vmem:[#allocation61_spill] sm:$0xff] }
 0x245   : > { %v1207_v32 = vpop.permute.xlu1 %1206  ;;  %v1329_v0 = vpop.permute.xlu0 %1328 }
 0x246   : > { %v1464_v21 = vsel %vm800_vm8, %v1207_v32, 0.0  ;;  %v1493_v19 = vsel %vm829_vm9, %v1329_v0, 0.0 }
 0x247   : > { %v1552_v48 = vadd.f32 %v2640_v12, %v1464_v21  ;;  %v1533_v49 = vadd.f32 %v1532_v28, %v1493_v19  ;;  %v2991_v12 = vld [vmem:[#allocation55_spill] sm:$0xff] }
 0x248   : > { %vm801_vm11 = vcmp.eq.s32.totalorder %v2991_v12, %v2283_v43  ;;  %v3004_v12 = vld [vmem:[#allocation59_spill] sm:$0xff] }
 0x249   : > { %v1621_v37 = vadd.f32 %v1620_v56, %v1533_v49  ;;  %v1333_v44 = vpop.permute.xlu1 %1332  ;;  %v1270_v16 = vpop.permute.xlu0 %1269 }
 0x24a   : > { %v1494_v36 = vsel %vm830_vm12, %v1333_v44, 0.0  ;;  %v1479_v14 = vsel %vm815_vm13, %v1270_v16, 0.0  ;;  %v3002_v16 = vld [vmem:[#allocation90_spill] sm:$0xff]  ;;  %vm805_vm12 = vcmp.eq.s32.totalorder %v3004_v12, %v2283_v43 }
 0x24b   : > { %v1540_v8 = vadd.f32 %v1539_v60, %v1494_v36  ;;  %v1546_v6 = vadd.f32 %v1545_v61, %v1479_v14  ;;  %v2999_v60 = vld [vmem:[#allocation74_spill] sm:$0xff]  ;;  %vm834_vm8 = vcmp.eq.s32.totalorder %v3002_v16, %v2283_v43  ;;  %v3003_v36 = vld [vmem:[#allocation73_spill] sm:$0xff]  ;;  %v3017_v16 = vld [vmem:[#allocation47_spill] sm:$0xff] }
 0x24c   : > { %vm818_vm7 = vcmp.eq.s32.totalorder %v2999_v60, %v2283_v43  ;;  %vm819_vm9 = vcmp.eq.s32.totalorder %v3003_v36, %v2283_v43  ;;  %v3013_v60 = vld [vmem:[#allocation48_spill] sm:$0xff] }
 0x24d   : > { %v1622_v45 = vadd.f32 %v1621_v37, %v1540_v8  ;;  %v1274_v15 = vpop.permute.xlu1 %1273  ;;  %v1211_v63 = vpop.permute.xlu0 %1210 }
 0x24e   : > { %v1480_v52 = vsel %vm816_vm10, %v1274_v15, 0.0  ;;  %v1465_v62 = vsel %vm801_vm11, %v1211_v63, 0.0  ;;  %vm835_vm10 = vcmp.eq.s32.totalorder %v3006_v30, %v2283_v43  ;;  %v3021_v30 = vld [vmem:[#allocation63_spill] sm:$0xff] }
 0x24f   : > { %v1553_v3 = vadd.f32 %v1552_v48, %v1480_v52  ;;  %v1559_v38 = vadd.f32 %v2637_v1, %v1465_v62  ;;  %v2995_v1 = vld [vmem:[#allocation71_spill] sm:$0xff]  ;;  %v3000_v48 = vld [vmem:[#allocation60_spill] sm:$0xff]  ;;  %v3005_v52 = vld [vmem:[#allocation46_spill] sm:$0xff] }
 0x250   : > { %vm817_vm3 = vcmp.eq.s32.totalorder %v2995_v1, %v2283_v43  ;;  %vm804_vm2 = vcmp.eq.s32.totalorder %v3000_v48, %v2283_v43  ;;  %vm790_vm13 = vcmp.eq.s32.totalorder %v3005_v52, %v2283_v43  ;;  %v3008_v1 = vld [vmem:[#allocation62_spill] sm:$0xff] }
 0x251   : > { %v1215_v39 = vpop.permute.xlu1 %1214  ;;  %v1337_v31 = vpop.permute.xlu0 %1336 }
 0x252   : > { %v1466_v24 = vsel %vm802_vm14, %v1215_v39, 0.0  ;;  %v1495_v17 = vsel %vm831_vm15, %v1337_v31, 0.0  ;;  %v3007_v31 = vld [vmem:[#allocation76_spill] sm:$0xff]  ;;  %vm806_vm14 = vcmp.eq.s32.totalorder %v3008_v1, %v2283_v43 }
 0x253   : > { %v1566_v55 = vadd.f32 %v2650_v59, %v1466_v24  ;;  %v1547_v9 = vadd.f32 %v1546_v6, %v1495_v17  ;;  %v2997_v59 = vld [vmem:[#allocation44_spill] sm:$0xff]  ;;  %vm820_vm11 = vcmp.eq.s32.totalorder %v3007_v31, %v2283_v43 }
 0x254   : > { %vm788_vm5 = vcmp.eq.s32.totalorder %v2997_v59, %v2283_v43 }
 0x255   : > { %v1623_v26 = vadd.f32 %v1622_v45, %v1547_v9  ;;  %v1341_v7 = vpop.permute.xlu1 %1340  ;;  %v1278_v11 = vpop.permute.xlu0 %1277 }
 0x256   : > { %v1496_v40 = vsel %vm832_vm4, %v1341_v7, 0.0  ;;  %v1481_v41 = vsel %vm817_vm3, %v1278_v11, 0.0  ;;  %v3009_v11 = vld [vmem:[#allocation45_spill] sm:$0xff]  ;;  %vm836_vm4 = vcmp.eq.s32.totalorder %v3010_v2, %v2283_v43 }
 0x257   : > { %v1554_v20 = vadd.f32 %v1553_v3, %v1496_v40  ;;  %v1560_v50 = vadd.f32 %v1559_v38, %v1481_v41  ;;  %vm791_vm15 = vcmp.eq.s32.totalorder %v3009_v11, %v2283_v43 }
 0x259   : > { %v1624_v5 = vadd.f32 %v1623_v26, %v1554_v20  ;;  %v1219_v28 = vpop.permute.xlu1 %1218  ;;  %v1156_v56 = vpop.permute.xlu0 %1155 }
 0x25a   : > { %v1467_v57 = vsel %vm803_vm1, %v1219_v28, 0.0  ;;  %v1452_v18 = vsel %vm788_vm5, %v1156_v56, 0.0  ;;  %v3011_v28 = vld [vmem:[#allocation75_spill] sm:$0xff]  ;;  %vm807_vm1 = vcmp.eq.s32.totalorder %v3012_v46, %v2283_v43  ;;  %vm792_vm5 = vcmp.eq.s32.totalorder %v3013_v60, %v2283_v43 }
 0x25b   : > { %v1573_v13 = vadd.f32 %v2647_v58, %v1467_v57  ;;  %v1579_v10 = vadd.f32 %v2578_v4, %v1452_v18  ;;  %v3001_v58 = vld [vmem:[#allocation43_spill] sm:$0xff]  ;;  %vm821_vm3 = vcmp.eq.s32.totalorder %v3011_v28, %v2283_v43 }
 0x25c   : > { %vm789_vm0 = vcmp.eq.s32.totalorder %v3001_v58, %v2283_v43 }
 0x25d   : > { %v1345_v47 = vpop.permute.xlu1 %1344  ;;  %v1282_v61 = vpop.permute.xlu0 %1281 }
 0x25e   : > { %v1497_v32 = vsel %vm833_vm6, %v1345_v47, 0.0  ;;  %v1482_v33 = vsel %vm818_vm7, %v1282_v61, 0.0 }
 0x25f   : > { %v1561_v22 = vadd.f32 %v1560_v50, %v1497_v32  ;;  %v1567_v0 = vadd.f32 %v1566_v55, %v1482_v33 }
 0x261   : > { %v1625_v21 = vadd.f32 %v1624_v5, %v1561_v22  ;;  %v1223_v19 = vpop.permute.xlu1 %1222  ;;  %v1160_v4 = vpop.permute.xlu0 %1159 }
 0x262   : > { %v1468_v49 = vsel %vm804_vm2, %v1223_v19, 0.0  ;;  %v1453_v37 = vsel %vm789_vm0, %v1160_v4, 0.0  ;;  %v3015_v19 = vld [vmem:[#allocation78_spill] sm:$0xff]  ;;  %vm793_vm0 = vcmp.eq.s32.totalorder %v3017_v16, %v2283_v43 }
 0x263   : > { %v1580_v44 = vadd.f32 %v1579_v10, %v1468_v49  ;;  %v1586_v35 = vadd.f32 %v2575_v23, %v1453_v37  ;;  %vm822_vm7 = vcmp.eq.s32.totalorder %v3015_v19, %v2283_v43 }
 0x265   : > { %v1349_v34 = vpop.permute.xlu1 %1348  ;;  %v1286_v14 = vpop.permute.xlu0 %1285 }
 0x266   : > { %v1498_v8 = vsel %vm834_vm8, %v1349_v34, 0.0  ;;  %v1483_v6 = vsel %vm819_vm9, %v1286_v14, 0.0  ;;  %v3016_v34 = vld [vmem:[#allocation64_spill] sm:$0xff] }
 0x267   : > { %v1568_v45 = vadd.f32 %v1567_v0, %v1498_v8  ;;  %v1574_v15 = vadd.f32 %v1573_v13, %v1483_v6  ;;  %v3014_v0 = vld [vmem:[#allocation91_spill] sm:$0xff]  ;;  %vm808_vm2 = vcmp.eq.s32.totalorder %v3016_v34, %v2283_v43 }
 0x268   : > { %vm837_vm6 = vcmp.eq.s32.totalorder %v3014_v0, %v2283_v43 }
 0x269   : > { %v1626_v51 = vadd.f32 %v1625_v21, %v1568_v45  ;;  %v1227_v63 = vpop.permute.xlu1 %1226  ;;  %v1164_v23 = vpop.permute.xlu0 %1163 }
 0x26a   : > { %v1469_v62 = vsel %vm805_vm12, %v1227_v63, 0.0  ;;  %v1454_v3 = vsel %vm790_vm13, %v1164_v23, 0.0  ;;  %vm809_vm13 = vcmp.eq.s32.totalorder %v3021_v30, %v2283_v43 }
 0x26b   : > { %v1587_v38 = vadd.f32 %v1586_v35, %v1469_v62  ;;  %v1593_v39 = vadd.f32 %v2590_v54, %v1454_v3 }
 0x26d   : > { %v1353_v27 = vpop.permute.xlu1 %1352  ;;  %v1290_v24 = vpop.permute.xlu0 %1289 }
 0x26e   : > { %v1499_v17 = vsel %vm835_vm10, %v1353_v27, 0.0  ;;  %v1484_v55 = vsel %vm820_vm11, %v1290_v24, 0.0 }
 0x26f   : > { %v1575_v9 = vadd.f32 %v1574_v15, %v1499_v17  ;;  %v1581_v26 = vadd.f32 %v1580_v44, %v1484_v55  ;;  %v3018_v15 = vld [vmem:[#allocation94_spill] sm:$0xff]  ;;  %v3022_v55 = vld [vmem:[#allocation79_spill] sm:$0xff] }
 0x270   : > { %vm838_vm8 = vcmp.eq.s32.totalorder %v3018_v15, %v2283_v43  ;;  %vm825_vm10 = vcmp.eq.s32.totalorder %v3022_v55, %v2283_v43 }
 0x271   : > { %v1627_v7 = vadd.f32 %v1626_v51, %v1575_v9  ;;  %v1231_v42 = vpop.permute.xlu1 %1230  ;;  %v1168_v54 = vpop.permute.xlu0 %1167  ;;  %v3019_v51 = vld [vmem:[#allocation77_spill] sm:$0xff] }
 0x272   : > { %v1470_v40 = vsel %vm806_vm14, %v1231_v42, 0.0  ;;  %v1455_v41 = vsel %vm791_vm15, %v1168_v54, 0.0  ;;  %vm823_vm9 = vcmp.eq.s32.totalorder %v3019_v51, %v2283_v43 }
 0x273   : > { %v1594_v20 = vadd.f32 %v1593_v39, %v1470_v40  ;;  %v1600_v50 = vadd.f32 %v2587_v53, %v1455_v41  ;;  %v3020_v39 = vld [vmem:[#allocation80_spill] sm:$0xff]  ;;  %v3024_v41 = vld [vmem:[#allocation95_spill] sm:$0xff] }
 0x274   : > { %vm824_vm12 = vcmp.eq.s32.totalorder %v3020_v39, %v2283_v43  ;;  %vm841_vm14 = vcmp.eq.s32.totalorder %v3024_v41, %v2283_v43 }
 0x275   : > { %v1357_v5 = vpop.permute.xlu1 %1356  ;;  %v1294_v59 = vpop.permute.xlu0 %1293 }
 0x276   : > { %v1500_v56 = vsel %vm836_vm4, %v1357_v5, 0.0  ;;  %v1485_v57 = vsel %vm821_vm3, %v1294_v59, 0.0 }
 0x277   : > { %v1582_v18 = vadd.f32 %v1581_v26, %v1500_v56  ;;  %v1588_v13 = vadd.f32 %v1587_v38, %v1485_v57  ;;  %v3023_v26 = vld [vmem:[#allocation93_spill] sm:$0xff] }
 0x278   : > { %vm839_vm11 = vcmp.eq.s32.totalorder %v3023_v26, %v2283_v43 }
 0x279   : > { %v1628_v10 = vadd.f32 %v1627_v7, %v1582_v18  ;;  %v1235_v47 = vpop.permute.xlu1 %1234  ;;  %v1172_v53 = vpop.permute.xlu0 %1171 }
 0x27a   : > { %v1471_v61 = vsel %vm807_vm1, %v1235_v47, 0.0  ;;  %v1456_v32 = vsel %vm792_vm5, %v1172_v53, 0.0  ;;  %v1618_v53 = vld [vmem:[%s1881_s27] sm:$0x1] }
 0x27b   : > { %v1601_v33 = vadd.f32 %v1600_v50, %v1471_v61  ;;  %v1607_v22 = vadd.f32 %v2602_v25, %v1456_v32  ;;  %v3025_v50 = vld [vmem:[#allocation96_spill] sm:$0xff] }
 0x27c   : > { %vm840_vm15 = vcmp.eq.s32.totalorder %v3025_v50, %v2283_v43 }
 0x27d   : > { %v1361_v21 = vpop.permute.xlu1 %1360  ;;  %v1298_v48 = vpop.permute.xlu0 %1297 }
 0x27e   : > { %v1501_v58 = vsel %vm837_vm6, %v1361_v21, 0.0  ;;  %v1486_v4 = vsel %vm822_vm7, %v1298_v48, 0.0 }
 0x27f   : > { %v1589_v49 = vadd.f32 %v1588_v13, %v1501_v58  ;;  %v1595_v37 = vadd.f32 %v1594_v20, %v1486_v4 }
 0x281   : > { %v1629_v44 = vadd.f32 %v1628_v10, %v1589_v49  ;;  %v1239_v35 = vpop.permute.xlu1 %1238  ;;  %v1176_v25 = vpop.permute.xlu0 %1175 }
 0x282   : > { %v1472_v36 = vsel %vm808_vm2, %v1239_v35, 0.0  ;;  %v1457_v14 = vsel %vm793_vm0, %v1176_v25, 0.0 }
 0x283   : > { %v1608_v8 = vadd.f32 %v1607_v22, %v1472_v36  ;;  %v1614_v6 = vadd.f32 %v2599_v29, %v1457_v14 }
 0x285   : > { %v1365_v45 = vpop.permute.xlu1 %1364  ;;  %v1302_v12 = vpop.permute.xlu0 %1301 }
 0x286   : > { %v1502_v63 = vsel %vm838_vm8, %v1365_v45, 0.0  ;;  %v1487_v52 = vsel %vm823_vm9, %v1302_v12, 0.0 }
 0x287   : > { %v1596_v23 = vadd.f32 %v1595_v37, %v1502_v63  ;;  %v1602_v62 = vadd.f32 %v1601_v33, %v1487_v52 }
 0x289   : > { %v1630_v3 = vadd.f32 %v1629_v44, %v1596_v23  ;;  %v1306_v38 = vpop.permute.xlu1 %1305  ;;  %v1243_v29 = vpop.permute.xlu0 %1242 }
 0x28a   : > { %v1488_v27 = vsel %vm824_vm12, %v1306_v38, 0.0  ;;  %v1473_v31 = vsel %vm809_vm13, %v1243_v29, 0.0 }
 0x28b   : > { %v1609_v24 = vadd.f32 %v1608_v8, %v1488_v27  ;;  %v1615_v17 = vadd.f32 %v1614_v6, %v1473_v31 }
 0x28d   : > { %v1310_v9 = vpop.permute.xlu1 %1309  ;;  %v1369_v7 = vpop.permute.xlu0 %1368 }
 0x28e   : > { %v1489_v42 = vsel %vm825_vm10, %v1310_v9, 0.0  ;;  %v1503_v1 = vsel %vm839_vm11, %v1369_v7, 0.0 }
 0x28f   : > { %v1616_v11 = vadd.f32 %v1615_v17, %v1489_v42  ;;  %v1603_v54 = vadd.f32 %v1602_v62, %v1503_v1 }
 0x291   : > { %v1631_v40 = vadd.f32 %v1630_v3, %v1603_v54  ;;  %v1377_v20 = vpop.permute.xlu1 %1376  ;;  %v1373_v5 = vpop.permute.xlu0 %1372 }
 0x292   : > { %v1505_v2 = vsel %vm841_vm14, %v1377_v20, 0.0  ;;  %v1504_v28 = vsel %vm840_vm15, %v1373_v5, 0.0 }
 0x293   : > { %v1617_v59 = vadd.f32 %v1616_v11, %v1505_v2  ;;  %v1610_v56 = vadd.f32 %v1609_v24, %v1504_v28 }
 0x295   : > { %v1632_v57 = vadd.f32 %v1631_v40, %v1610_v56 }
 0x297   : > { %v1633_v18 = vadd.f32 %v1632_v57, %v1617_v59 }
 0x299   : > { %v1634_v13 = vrot.slane %v1633_v18, 4 }
 0x29b   : > { %v1635_v10 = vadd.f32 %v1634_v13, %v1633_v18 }
 0x29d   : > { %v1636_v46 = vrot.slane %v1635_v10, 2 }
 0x29f   : > { %v1637_v47 = vadd.f32 %v1636_v46, %v1635_v10 }
 0x2a1   : > { %v1638_v60 = vrot.slane %v1637_v47, 1  ;;  %1645 = sbr.rel (%p1730_p8) target bundleno = 700 (0x2bc), region = 36 }
 0x2a3   : > { %v1639_v61 = vadd.f32 %v1638_v60, %v1637_v47 }
 0x2a5   : > { %v1640_v32 = vadd.f32 %v1639_v61, %v1618_v53 }
 0x2a7   : > { %1641 = vst [vmem:[%s1881_s27] sm:$0x1] %v1640_v32 }
 0x2ae   : > { %v1646_v43 = vld [vmem:[%s1881_s27] sm:$0x1] }
 0x2af   : > { %1774 = vrsqrt.f32 %v1646_v43  ;;  %vm1647_vm4 = vcmp.gt.f32.partialorder %v1646_v43, 0.0 }
 0x2b9   : > { %v1775_v33 = vpop.eup %1774 }
 0x2ba   : > { %v1649_v22 = vsel %vm1647_vm4, %v1775_v33, 0.0 }
 0x2bb   : > { %1650 = vst [vmem:[%s1881_s27] sm:$0x1] %v1649_v22 }
 0x2bc PF: > { %s12_s13 = sadd.s32 1, %s1814_s13   ;;  %s3026_s9 = smov %s1806_s11 }
 0x2bd   : > { %p9_p9 = scmp.ge.s32.totalorder %s12_s13, 6   ;;  %s3027_s10 = smov %s1810_s12 }
 0x2be   : > { %s3028_s11 = smov %s3031_s14  ;;  %s3029_s12 = smov %s3035_s15 }
 0x2bf   :  { %11 = sbr.rel (!%p9_p9) target bundleno = 3 (0x3), region = 69 }

// kernel: _gcn_norm_weights.3
= control target key start
LH: loop header
LB: loop body
LE: loop exit
PB: predicated region body
PF: predicated region fallthrough
CT: control target
= control target key end

     0   :  { %9 = vsyncpa [#allocation5], 0  ;;  %s6675_s0 = inlined_call_operand.vmem [shape: s32[16,128], index: 0, kind: input, shape index: {}]   ;;  %s6676_s1 = inlined_call_operand.vmem [shape: s32[16,128], index: 1, kind: input, shape index: {}]   ;;  %s6677_s2 = inlined_call_operand.vmem [shape: f32[16,128], index: 2, kind: input, shape index: {}]   ;;  %s6678_s3 = inlined_call_operand.vmem [shape: f32[1,256], index: 3, kind: input, shape index: {}]   ;;  %s6679_s4 = inlined_call_operand.hbm [shape: f32[16,128], index: 4, kind: output, shape index: {}]  }
   0x1   :  { %11 = vsyncpa [#allocation5 + $0x1], 0  ;;  %s4290_s15 = smov 0   ;;  %s4292_s16 = smov 0  }
   0x2   :  { %s4294_s17 = smov 0   ;;  %s4296_s18 = smov 0  }
   0x3   :  { %s4298_s19 = smov 0   ;;  %s4300_s20 = smov 0  }
   0x4   :  { %s4302_s21 = smov 0   ;;  %s4304_s22 = smov 0  }
   0x5 LB: > { %6745 = sst [smem:[#allocation7_spill]] %s4257_s21  ;;  %s4075_s23 = sadd.s32 4294967295, %s4261_s22   ;;  %s4261_s22 = sphi %s4304_s22, %s17_s22   ;;  %s4257_s21 = sphi %s4302_s21, %s7017_s21   ;;  %s4253_s20 = sphi %s4300_s20, %s7022_s20   ;;  %s4249_s19 = sphi %s4298_s19, %s7015_s19   ;;  %s4245_s18 = sphi %s4296_s18, %s7021_s18   ;;  %s4241_s17 = sphi %s4294_s17, %s7020_s17   ;;  %s4237_s16 = sphi %s4292_s16, %s7019_s16   ;;  %s4233_s15 = sphi %s4290_s15, %s7018_s15  }
   0x6   : > { %s4076_s24 = sadd.s32 4294967294, %s4261_s22   ;;  %s26_s25 = sadd.s32 1, %s4253_s20 }
   0x7   : > { %p27_p0 = scmp.ge.s32.totalorder %s26_s25, 2  ;;  %s29_s26 = sadd.s32 1, %s4257_s21 }
   0x8   : > { %p150_p1 = scmp.ne.s32.totalorder %s4241_s17, %s4237_s16  ;;  %p151_p2 = scmp.eq.s32.totalorder %s4075_s23, 3 }
   0x9   : > { %s7024_s25 = smov (%p27_p0, %s26_s25), 0  ;;  %s7026_s26 = smov (!%p27_p0, %s29_s26), %s4257_s21 }
   0xa   : > { %6746 = sst [smem:[#allocation8_spill]] %s7024_s25  ;;  %p4339_p3 = por %p151_p2, %p150_p1 }
   0xb   : > { %p156_p4 = scmp.ne.s32.totalorder %s4237_s16, %s4233_s15  ;;  %p31_p5 = scmp.ge.s32.totalorder %s7026_s26, 2 }
   0xc   : > { %p157_p6 = scmp.eq.s32.totalorder %s4076_s24, 3  ;;  %p4079_p7 = scmp.ge.s32.totalorder %s4261_s22, 1 }
   0xd   : > { %p202_p8 = scmp.lt.s32.totalorder %s4261_s22, 5  ;;  %s7028_s26 = smov (%p31_p5, %s7026_s26), 0 }
   0xe   : > { %6748 = sst [smem:[#allocation9_spill]] %s7028_s26  ;;  %p4349_p9 = por %p157_p6, %p156_p4 }
   0xf   : > { %p203_p10 = pnand %p4079_p7, %p202_p8  ;;  %s137_s29 = ssub.s32 %s4257_s21, %s7028_s26 }
  0x10   : > { %s140_s30 = sadd.s32 1, %s4241_s17  ;;  %p138_p11 = scmp.eq.s32.totalorder %s137_s29, 0 }
  0x11   : > { %206 = sbr.rel (%p203_p10) target bundleno = 1328 (0x530), region = 36 }
  0x12   : > { %s4357_s5 = scalar_select %p138_p11, %s4241_s17, %s140_s30  }
  0x18   : > { %s6680_s6 = sand.u32 1, %s4237_s16   ;;  %p238_p12 = scmp.lt.s32.totalorder %s4249_s19, 1 }
  0x19   : > { %s4363_s7 = sshll.u32 %s6680_s6, 3  ;;  %p250_p13 = scmp.lt.s32.totalorder %s4245_s18, 1 }
  0x1a   : > { %s239_s8 = scalar_select %p238_p12, %s4249_s19, 1 }
  0x1b   : > { %s251_s9 = scalar_select %p250_p13, %s4245_s18, 1 }
  0x1c   : > { %s4368_s10 = sshll.u32 %s239_s8, 3  ;;  %s237_s21 = scalar_lea.vmem [#allocation4], %s4363_s7 }
  0x1d   : > { %s241_s13 = scalar_lea.vmem %s6675_s0, %s4368_s10  ;;  %s245_s24 = scalar_lea.vmem %s6676_s1, %s4368_s10 }
  0x1e   : > { %s249_s6 = scalar_lea.vmem %s6677_s2, %s4368_s10  ;;  %s4385_s8 = scalar_lea.vmem %s6678_s3, %s251_s9 }
  0x1f   : > { %p4084_p0 = scmp.ne.s32.totalorder %s4245_s18, 0 }
  0x20   : > { %v4263_v0 = vmov (!%p4084_p0), 0.0  }
  0x21   : > { %256 = sbr.rel (%p4084_p0) target bundleno = 40 (0x28), region = 40  ;;  %257 = vst [vmem:[#allocation2] sm:$0xff] (!%p4084_p0), %v4263_v0  ;;  %258 = vst [vmem:[#allocation3] sm:$0xff] (!%p4084_p0), %v4263_v0 }
  0x28 PF: > { %v6690_v1 = vlaneseq  ;;  %v4392_v3 = vld [vmem:[%s241_s13] sm:$0xff]  ;;  %s4085_s25 = sshll.u32 %s4245_s18, 7  ;;  %p4087_p1 = scmp.ne.s32.totalorder %s4245_s18, 1 }
  0x2a   : > { %v4390_v2 = vshrl.u32 %v6690_v1, 7 }
  0x2c   : > { %6750 = vst [vmem:[#allocation10_spill] sm:$0xff] %v4390_v2  ;;  %v6689_v4 = vsub.s32 0, %v4390_v2  ;;  %v6688_v6 = vsub.s32 1, %v4390_v2  ;;  %v6687_v8 = vsub.s32 2, %v4390_v2  ;;  %v6686_v10 = vsub.s32 3, %v4390_v2 }
  0x2d   : > { %v6685_v16 = vsub.s32 4, %v4390_v2  ;;  %v6684_v34 = vsub.s32 5, %v4390_v2  ;;  %v6683_v52 = vsub.s32 6, %v4390_v2 }
  0x2e   : > { %v271_v5 = vrot.slane %v4392_v3, %v6689_v4  ;;  %v338_v7 = vrot.slane %v4392_v3, %v6688_v6  ;;  %v405_v9 = vrot.slane %v4392_v3, %v6687_v8  ;;  %v472_v11 = vrot.slane %v4392_v3, %v6686_v10 }
  0x2f   : > { %v539_v19 = vrot.slane %v4392_v3, %v6685_v16  ;;  %v606_v37 = vrot.slane %v4392_v3, %v6684_v34  ;;  %v673_v55 = vrot.slane %v4392_v3, %v6683_v52 }
  0x30   : > { %281 = vbcast.lane.b32.xlu1 %v271_v5, 272  ;;  %273 = vbcast.lane.b32.xlu0 %v271_v5, 256 }
  0x34   : > { %285 = vbcast.lane.b32.xlu1 %v271_v5, 280  ;;  %277 = vbcast.lane.b32.xlu0 %v271_v5, 264 }
  0x38   : > { %293 = vbcast.lane.b32.xlu1 %v271_v5, 296  ;;  %289 = vbcast.lane.b32.xlu0 %v271_v5, 288 }
  0x3c   : > { %301 = vbcast.lane.b32.xlu1 %v271_v5, 312  ;;  %297 = vbcast.lane.b32.xlu0 %v271_v5, 304 }
  0x40   : > { %309 = vbcast.lane.b32.xlu1 %v271_v5, 328  ;;  %305 = vbcast.lane.b32.xlu0 %v271_v5, 320 }
  0x44   : > { %317 = vbcast.lane.b32.xlu1 %v271_v5, 344  ;;  %313 = vbcast.lane.b32.xlu0 %v271_v5, 336 }
  0x48   : > { %325 = vbcast.lane.b32.xlu1 %v271_v5, 360  ;;  %321 = vbcast.lane.b32.xlu0 %v271_v5, 352 }
  0x4c   : > { %333 = vbcast.lane.b32.xlu1 %v271_v5, 376  ;;  %329 = vbcast.lane.b32.xlu0 %v271_v5, 368 }
  0x50   : > { %344 = vbcast.lane.b32.xlu1 %v338_v7, 264  ;;  %340 = vbcast.lane.b32.xlu0 %v338_v7, 256 }
  0x54   : > { %352 = vbcast.lane.b32.xlu1 %v338_v7, 280  ;;  %348 = vbcast.lane.b32.xlu0 %v338_v7, 272 }
  0x58   : > { %360 = vbcast.lane.b32.xlu1 %v338_v7, 296  ;;  %356 = vbcast.lane.b32.xlu0 %v338_v7, 288 }
  0x5c   : > { %368 = vbcast.lane.b32.xlu1 %v338_v7, 312  ;;  %364 = vbcast.lane.b32.xlu0 %v338_v7, 304 }
  0x60   : > { %376 = vbcast.lane.b32.xlu1 %v338_v7, 328  ;;  %372 = vbcast.lane.b32.xlu0 %v338_v7, 320 }
  0x64   : > { %384 = vbcast.lane.b32.xlu1 %v338_v7, 344  ;;  %380 = vbcast.lane.b32.xlu0 %v338_v7, 336 }
  0x68   : > { %392 = vbcast.lane.b32.xlu1 %v338_v7, 360  ;;  %388 = vbcast.lane.b32.xlu0 %v338_v7, 352 }
  0x6c   : > { %400 = vbcast.lane.b32.xlu1 %v338_v7, 376  ;;  %396 = vbcast.lane.b32.xlu0 %v338_v7, 368 }
  0x70   : > { %411 = vbcast.lane.b32.xlu1 %v405_v9, 264  ;;  %407 = vbcast.lane.b32.xlu0 %v405_v9, 256 }
  0x74   : > { %419 = vbcast.lane.b32.xlu1 %v405_v9, 280  ;;  %415 = vbcast.lane.b32.xlu0 %v405_v9, 272 }
  0x78   : > { %427 = vbcast.lane.b32.xlu1 %v405_v9, 296  ;;  %423 = vbcast.lane.b32.xlu0 %v405_v9, 288 }
  0x7c   : > { %435 = vbcast.lane.b32.xlu1 %v405_v9, 312  ;;  %431 = vbcast.lane.b32.xlu0 %v405_v9, 304 }
  0x80   : > { %443 = vbcast.lane.b32.xlu1 %v405_v9, 328  ;;  %439 = vbcast.lane.b32.xlu0 %v405_v9, 320 }
  0x84   : > { %451 = vbcast.lane.b32.xlu1 %v405_v9, 344  ;;  %447 = vbcast.lane.b32.xlu0 %v405_v9, 336 }
  0x88   : > { %459 = vbcast.lane.b32.xlu1 %v405_v9, 360  ;;  %455 = vbcast.lane.b32.xlu0 %v405_v9, 352 }
  0x8c   : > { %467 = vbcast.lane.b32.xlu1 %v405_v9, 376  ;;  %463 = vbcast.lane.b32.xlu0 %v405_v9, 368 }
  0x90   : > { %478 = vbcast.lane.b32.xlu1 %v472_v11, 264  ;;  %474 = vbcast.lane.b32.xlu0 %v472_v11, 256 }
  0x94   : > { %486 = vbcast.lane.b32.xlu1 %v472_v11, 280  ;;  %482 = vbcast.lane.b32.xlu0 %v472_v11, 272 }
  0x98   : > { %494 = vbcast.lane.b32.xlu1 %v472_v11, 296  ;;  %490 = vbcast.lane.b32.xlu0 %v472_v11, 288 }
  0x9c   : > { %502 = vbcast.lane.b32.xlu1 %v472_v11, 312  ;;  %498 = vbcast.lane.b32.xlu0 %v472_v11, 304 }
  0xa0   : > { %510 = vbcast.lane.b32.xlu1 %v472_v11, 328  ;;  %506 = vbcast.lane.b32.xlu0 %v472_v11, 320 }
  0xa2   : > { %v4410_v12 = vpop.permute.xlu0 %273  ;;  %v4412_v13 = vpop.permute.xlu1 %281 }
  0xa4   : > { %518 = vbcast.lane.b32.xlu1 %v472_v11, 344  ;;  %514 = vbcast.lane.b32.xlu0 %v472_v11, 336 }
  0xa6   : > { %v4414_v14 = vpop.permute.xlu0 %277  ;;  %v4416_v15 = vpop.permute.xlu1 %285 }
  0xa8   : > { %526 = vbcast.lane.b32.xlu1 %v472_v11, 360  ;;  %522 = vbcast.lane.b32.xlu0 %v472_v11, 352 }
  0xaa   : > { %v4419_v17 = vpop.permute.xlu0 %289  ;;  %v4421_v18 = vpop.permute.xlu1 %293 }
  0xac   : > { %534 = vbcast.lane.b32.xlu1 %v472_v11, 376  ;;  %530 = vbcast.lane.b32.xlu0 %v472_v11, 368 }
  0xae   : > { %v4426_v20 = vpop.permute.xlu0 %297  ;;  %v4428_v21 = vpop.permute.xlu1 %301 }
  0xb0   : > { %545 = vbcast.lane.b32.xlu1 %v539_v19, 264  ;;  %541 = vbcast.lane.b32.xlu0 %v539_v19, 256 }
  0xb2   : > { %v4430_v22 = vpop.permute.xlu0 %305  ;;  %v4432_v23 = vpop.permute.xlu1 %309 }
  0xb4   : > { %553 = vbcast.lane.b32.xlu1 %v539_v19, 280  ;;  %549 = vbcast.lane.b32.xlu0 %v539_v19, 272 }
  0xb6   : > { %v4434_v24 = vpop.permute.xlu0 %313  ;;  %v4436_v25 = vpop.permute.xlu1 %317 }
  0xb8   : > { %561 = vbcast.lane.b32.xlu1 %v539_v19, 296  ;;  %557 = vbcast.lane.b32.xlu0 %v539_v19, 288 }
  0xba   : > { %v4438_v26 = vpop.permute.xlu0 %321  ;;  %v4440_v27 = vpop.permute.xlu1 %325 }
  0xbc   : > { %569 = vbcast.lane.b32.xlu1 %v539_v19, 312  ;;  %565 = vbcast.lane.b32.xlu0 %v539_v19, 304 }
  0xbe   : > { %v4442_v28 = vpop.permute.xlu0 %329  ;;  %v4444_v29 = vpop.permute.xlu1 %333 }
  0xc0   : > { %577 = vbcast.lane.b32.xlu1 %v539_v19, 328  ;;  %573 = vbcast.lane.b32.xlu0 %v539_v19, 320 }
  0xc2   : > { %v4446_v30 = vpop.permute.xlu0 %340  ;;  %v4448_v31 = vpop.permute.xlu1 %344 }
  0xc4   : > { %585 = vbcast.lane.b32.xlu1 %v539_v19, 344  ;;  %581 = vbcast.lane.b32.xlu0 %v539_v19, 336 }
  0xc6   : > { %v4450_v32 = vpop.permute.xlu0 %348  ;;  %v4452_v33 = vpop.permute.xlu1 %352 }
  0xc8   : > { %593 = vbcast.lane.b32.xlu1 %v539_v19, 360  ;;  %589 = vbcast.lane.b32.xlu0 %v539_v19, 352 }
  0xca   : > { %v4455_v35 = vpop.permute.xlu0 %356  ;;  %v4457_v36 = vpop.permute.xlu1 %360 }
  0xcc   : > { %601 = vbcast.lane.b32.xlu1 %v539_v19, 376  ;;  %597 = vbcast.lane.b32.xlu0 %v539_v19, 368 }
  0xce   : > { %v4462_v38 = vpop.permute.xlu0 %364  ;;  %v4464_v39 = vpop.permute.xlu1 %368 }
  0xd0   : > { %612 = vbcast.lane.b32.xlu1 %v606_v37, 264  ;;  %608 = vbcast.lane.b32.xlu0 %v606_v37, 256 }
  0xd2   : > { %v4466_v40 = vpop.permute.xlu0 %372  ;;  %v4468_v41 = vpop.permute.xlu1 %376 }
  0xd4   : > { %620 = vbcast.lane.b32.xlu1 %v606_v37, 280  ;;  %616 = vbcast.lane.b32.xlu0 %v606_v37, 272 }
  0xd6   : > { %v4470_v42 = vpop.permute.xlu0 %380  ;;  %v4472_v43 = vpop.permute.xlu1 %384 }
  0xd8   : > { %628 = vbcast.lane.b32.xlu1 %v606_v37, 296  ;;  %624 = vbcast.lane.b32.xlu0 %v606_v37, 288 }
  0xda   : > { %v4474_v44 = vpop.permute.xlu0 %388  ;;  %v4476_v45 = vpop.permute.xlu1 %392 }
  0xdc   : > { %636 = vbcast.lane.b32.xlu1 %v606_v37, 312  ;;  %632 = vbcast.lane.b32.xlu0 %v606_v37, 304 }
  0xde   : > { %v4478_v46 = vpop.permute.xlu0 %396  ;;  %v4480_v47 = vpop.permute.xlu1 %400 }
  0xe0   : > { %644 = vbcast.lane.b32.xlu1 %v606_v37, 328  ;;  %640 = vbcast.lane.b32.xlu0 %v606_v37, 320 }
  0xe2   : > { %v4482_v48 = vpop.permute.xlu0 %407  ;;  %v4484_v49 = vpop.permute.xlu1 %411 }
  0xe4   : > { %652 = vbcast.lane.b32.xlu1 %v606_v37, 344  ;;  %648 = vbcast.lane.b32.xlu0 %v606_v37, 336 }
  0xe6   : > { %v4486_v50 = vpop.permute.xlu0 %415  ;;  %v4488_v51 = vpop.permute.xlu1 %419 }
  0xe8   : > { %660 = vbcast.lane.b32.xlu1 %v606_v37, 360  ;;  %656 = vbcast.lane.b32.xlu0 %v606_v37, 352 }
  0xea   : > { %v4491_v53 = vpop.permute.xlu0 %423  ;;  %v4493_v54 = vpop.permute.xlu1 %427 }
  0xec   : > { %668 = vbcast.lane.b32.xlu1 %v606_v37, 376  ;;  %664 = vbcast.lane.b32.xlu0 %v606_v37, 368  ;;  %v6691_v37 = vsub.s32 7, %v4390_v2 }
  0xee   : > { %v4498_v56 = vpop.permute.xlu0 %431  ;;  %v4500_v57 = vpop.permute.xlu1 %435  ;;  %v740_v16 = vrot.slane %v4392_v3, %v6691_v37 }
  0xf0   : > { %679 = vbcast.lane.b32.xlu1 %v673_v55, 264  ;;  %675 = vbcast.lane.b32.xlu0 %v673_v55, 256 }
  0xf2   : > { %v4502_v58 = vpop.permute.xlu0 %439  ;;  %v4504_v59 = vpop.permute.xlu1 %443 }
  0xf4   : > { %687 = vbcast.lane.b32.xlu1 %v673_v55, 280  ;;  %683 = vbcast.lane.b32.xlu0 %v673_v55, 272 }
  0xf6   : > { %v4506_v60 = vpop.permute.xlu0 %447  ;;  %v4508_v61 = vpop.permute.xlu1 %451 }
  0xf8   : > { %695 = vbcast.lane.b32.xlu1 %v673_v55, 296  ;;  %691 = vbcast.lane.b32.xlu0 %v673_v55, 288 }
  0xfa   : > { %v4510_v62 = vpop.permute.xlu0 %455  ;;  %v4512_v63 = vpop.permute.xlu1 %459 }
  0xfc   : > { %703 = vbcast.lane.b32.xlu1 %v673_v55, 312  ;;  %699 = vbcast.lane.b32.xlu0 %v673_v55, 304 }
  0xfe   : > { %v4514_v0 = vpop.permute.xlu0 %463  ;;  %v4516_v5 = vpop.permute.xlu1 %467 }
 0x100   : > { %711 = vbcast.lane.b32.xlu1 %v673_v55, 328  ;;  %707 = vbcast.lane.b32.xlu0 %v673_v55, 320 }
 0x102   : > { %v4518_v7 = vpop.permute.xlu0 %474  ;;  %v4520_v9 = vpop.permute.xlu1 %478 }
 0x104   : > { %719 = vbcast.lane.b32.xlu1 %v673_v55, 344  ;;  %715 = vbcast.lane.b32.xlu0 %v673_v55, 336 }
 0x106   : > { %v4522_v11 = vpop.permute.xlu0 %482  ;;  %v4524_v19 = vpop.permute.xlu1 %486 }
 0x108   : > { %727 = vbcast.lane.b32.xlu1 %v673_v55, 360  ;;  %723 = vbcast.lane.b32.xlu0 %v673_v55, 352 }
 0x10a   : > { %v4527_v52 = vpop.permute.xlu0 %490  ;;  %v4529_v34 = vpop.permute.xlu1 %494 }
 0x10b   : > { %6751 = vst [vmem:[#allocation11_spill] sm:$0xff] %v4529_v34 }
 0x10c   : > { %735 = vbcast.lane.b32.xlu1 %v673_v55, 376  ;;  %731 = vbcast.lane.b32.xlu0 %v673_v55, 368 }
 0x10e   : > { %v4534_v10 = vpop.permute.xlu0 %498  ;;  %v4536_v8 = vpop.permute.xlu1 %502 }
 0x10f   : > { %6752 = vst [vmem:[#allocation12_spill] sm:$0xff] %v4534_v10  ;;  %6753 = vst [vmem:[#allocation13_spill] sm:$0xff] %v4536_v8  ;;  %v265_v10 = vstv %s4085_s25 }
 0x110   : > { %746 = vbcast.lane.b32.xlu1 %v740_v16, 264  ;;  %742 = vbcast.lane.b32.xlu0 %v740_v16, 256 }
 0x112   : > { %v4538_v6 = vpop.permute.xlu0 %506  ;;  %v4540_v4 = vpop.permute.xlu1 %510 }
 0x113   : > { %6754 = vst [vmem:[#allocation14_spill] sm:$0xff] %v4538_v6  ;;  %6755 = vst [vmem:[#allocation15_spill] sm:$0xff] %v4540_v4 }
 0x114   : > { %754 = vbcast.lane.b32.xlu1 %v740_v16, 280  ;;  %750 = vbcast.lane.b32.xlu0 %v740_v16, 272 }
 0x116   : > { %v4542_v1 = vpop.permute.xlu0 %514  ;;  %v4544_v34 = vpop.permute.xlu1 %518 }
 0x117   : > { %6756 = vst [vmem:[#allocation16_spill] sm:$0xff] %v4542_v1  ;;  %6757 = vst [vmem:[#allocation17_spill] sm:$0xff] %v4544_v34 }
 0x118   : > { %762 = vbcast.lane.b32.xlu1 %v740_v16, 296  ;;  %758 = vbcast.lane.b32.xlu0 %v740_v16, 288 }
 0x11a   : > { %v4546_v55 = vpop.permute.xlu0 %522  ;;  %v4548_v3 = vpop.permute.xlu1 %526 }
 0x11b   : > { %6758 = vst [vmem:[#allocation18_spill] sm:$0xff] %v4546_v55  ;;  %6759 = vst [vmem:[#allocation19_spill] sm:$0xff] %v4548_v3 }
 0x11c   : > { %770 = vbcast.lane.b32.xlu1 %v740_v16, 312  ;;  %766 = vbcast.lane.b32.xlu0 %v740_v16, 304 }
 0x11e   : > { %v4550_v37 = vpop.permute.xlu0 %530  ;;  %v4552_v2 = vpop.permute.xlu1 %534 }
 0x11f   : > { %6760 = vst [vmem:[#allocation20_spill] sm:$0xff] %v4550_v37  ;;  %6761 = vst [vmem:[#allocation21_spill] sm:$0xff] %v4552_v2 }
 0x120   : > { %778 = vbcast.lane.b32.xlu1 %v740_v16, 328  ;;  %774 = vbcast.lane.b32.xlu0 %v740_v16, 320 }
 0x122   : > { %v4554_v4 = vpop.permute.xlu0 %541  ;;  %v4556_v6 = vpop.permute.xlu1 %545 }
 0x123   : > { %6762 = vst [vmem:[#allocation22_spill] sm:$0xff] %v4554_v4  ;;  %6763 = vst [vmem:[#allocation23_spill] sm:$0xff] %v4556_v6 }
 0x124   : > { %786 = vbcast.lane.b32.xlu1 %v740_v16, 344  ;;  %782 = vbcast.lane.b32.xlu0 %v740_v16, 336 }
 0x126   : > { %v4558_v34 = vpop.permute.xlu0 %549  ;;  %v4560_v55 = vpop.permute.xlu1 %553 }
 0x127   : > { %6764 = vst [vmem:[#allocation24_spill] sm:$0xff] %v4558_v34  ;;  %6765 = vst [vmem:[#allocation25_spill] sm:$0xff] %v4560_v55 }
 0x128   : > { %794 = vbcast.lane.b32.xlu1 %v740_v16, 360  ;;  %790 = vbcast.lane.b32.xlu0 %v740_v16, 352 }
 0x12a   : > { %v4562_v3 = vpop.permute.xlu0 %557  ;;  %v4564_v37 = vpop.permute.xlu1 %561 }
 0x12b   : > { %6766 = vst [vmem:[#allocation26_spill] sm:$0xff] %v4562_v3  ;;  %6767 = vst [vmem:[#allocation27_spill] sm:$0xff] %v4564_v37  ;;  %v6773_v3 = vlaneseq }
 0x12c   : > { %802 = vbcast.lane.b32.xlu1 %v740_v16, 376  ;;  %798 = vbcast.lane.b32.xlu0 %v740_v16, 368 }
 0x12d   : > { %v4582_v37 = vand.u32 127, %v6773_v3 }
 0x12e   : > { %v4566_v2 = vpop.permute.xlu0 %565  ;;  %v4568_v4 = vpop.permute.xlu1 %569 }
 0x12f   : > { %6768 = vst [vmem:[#allocation28_spill] sm:$0xff] %v4566_v2  ;;  %6769 = vst [vmem:[#allocation29_spill] sm:$0xff] %v4568_v4  ;;  %v4585_v16 = vadd.s32 %v265_v10, %v4582_v37 }
 0x131   : > { %6774 = vst [vmem:[#allocation33_spill] sm:$0xff] %v4585_v16  ;;  %vm804_vm0 = vcmp.eq.s32.totalorder %v4410_v12, %v4585_v16  ;;  %vm806_vm1 = vcmp.eq.s32.totalorder %v4412_v13, %v4585_v16  ;;  %vm805_vm2 = vcmp.eq.s32.totalorder %v4414_v14, %v4585_v16  ;;  %vm807_vm3 = vcmp.eq.s32.totalorder %v4416_v15, %v4585_v16 }
 0x132   : > { %v4570_v6 = vpop.permute.xlu0 %573  ;;  %v4572_v1 = vpop.permute.xlu1 %577  ;;  %vm808_vm4 = vcmp.eq.s32.totalorder %v4419_v17, %v4585_v16  ;;  %vm809_vm5 = vcmp.eq.s32.totalorder %v4421_v18, %v4585_v16  ;;  %vm810_vm6 = vcmp.eq.s32.totalorder %v4426_v20, %v4585_v16  ;;  %vm811_vm7 = vcmp.eq.s32.totalorder %v4428_v21, %v4585_v16 }
 0x133   : > { %6770 = vst [vmem:[#allocation30_spill] sm:$0xff] %v4572_v1  ;;  %vm812_vm8 = vcmp.eq.s32.totalorder %v4430_v22, %v4585_v16  ;;  %vm813_vm9 = vcmp.eq.s32.totalorder %v4432_v23, %v4585_v16  ;;  %vm814_vm10 = vcmp.eq.s32.totalorder %v4434_v24, %v4585_v16  ;;  %vm815_vm11 = vcmp.eq.s32.totalorder %v4436_v25, %v4585_v16 }
 0x134   : > { %vm816_vm12 = vcmp.eq.s32.totalorder %v4438_v26, %v4585_v16  ;;  %vm817_vm13 = vcmp.eq.s32.totalorder %v4440_v27, %v4585_v16  ;;  %vm818_vm14 = vcmp.eq.s32.totalorder %v4442_v28, %v4585_v16  ;;  %vm819_vm15 = vcmp.eq.s32.totalorder %v4444_v29, %v4585_v16 }
 0x136   : > { %v4574_v34 = vpop.permute.xlu0 %581  ;;  %v4577_v55 = vpop.permute.xlu1 %585 }
 0x137   : > { %6771 = vst [vmem:[#allocation31_spill] sm:$0xff] %v4574_v34  ;;  %6772 = vst [vmem:[#allocation32_spill] sm:$0xff] %v4577_v55  ;;  %v4594_v34 = vld [vmem:[%s4385_s8] ss:$0 sm:$0xff] }
 0x138   : > { %v938_v3 = vsel %vm804_vm0, %v4594_v34, 0.0  ;;  %v940_v10 = vsel %vm806_vm1, %v4594_v34, 0.0  ;;  %v941_v13 = vsel %vm807_vm3, %v4594_v34, 0.0  ;;  %v942_v14 = vsel %vm808_vm4, %v4594_v34, 0.0 }
 0x139   : > { %v943_v17 = vsel %vm809_vm5, %v4594_v34, 0.0  ;;  %v945_v18 = vsel %vm811_vm7, %v4594_v34, 0.0  ;;  %v948_v22 = vsel %vm814_vm10, %v4594_v34, 0.0  ;;  %v949_v24 = vsel %vm815_vm11, %v4594_v34, 0.0 }
 0x13a   : > { %v4579_v8 = vpop.permute.xlu0 %589  ;;  %v4587_v2 = vpop.permute.xlu1 %593  ;;  %v951_v25 = vsel %vm817_vm13, %v4594_v34, 0.0  ;;  %vm820_vm0 = vcmp.eq.s32.totalorder %v4446_v30, %v4585_v16  ;;  %vm821_vm1 = vcmp.eq.s32.totalorder %v4448_v31, %v4585_v16  ;;  %vm823_vm3 = vcmp.eq.s32.totalorder %v4452_v33, %v4585_v16 }
 0x13b   : > { %v954_v28 = vsel %vm820_vm0, %v4594_v34, 0.0  ;;  %v955_v30 = vsel %vm821_vm1, %v4594_v34, 0.0  ;;  %vm824_vm4 = vcmp.eq.s32.totalorder %v4455_v35, %v4585_v16  ;;  %v957_v31 = vsel %vm823_vm3, %v4594_v34, 0.0 }
 0x13c   : > { %vm825_vm5 = vcmp.eq.s32.totalorder %v4457_v36, %v4585_v16  ;;  %vm827_vm7 = vcmp.eq.s32.totalorder %v4464_v39, %v4585_v16  ;;  %vm830_vm10 = vcmp.eq.s32.totalorder %v4470_v42, %v4585_v16  ;;  %vm831_vm11 = vcmp.eq.s32.totalorder %v4472_v43, %v4585_v16 }
 0x13d   : > { %vm833_vm13 = vcmp.eq.s32.totalorder %v4476_v45, %v4585_v16  ;;  %vm836_vm0 = vcmp.eq.s32.totalorder %v4482_v48, %v4585_v16  ;;  %vm837_vm1 = vcmp.eq.s32.totalorder %v4484_v49, %v4585_v16  ;;  %vm839_vm3 = vcmp.eq.s32.totalorder %v4488_v51, %v4585_v16 }
 0x13e   : > { %v4589_v4 = vpop.permute.xlu0 %597  ;;  %v4596_v1 = vpop.permute.xlu1 %601 }
 0x13f   : > { %6775 = vst [vmem:[#allocation34_spill] sm:$0xff] %v4596_v1  ;;  %v939_v1 = vsel %vm805_vm2, %v4594_v34, 0.0  ;;  %vm822_vm2 = vcmp.eq.s32.totalorder %v4450_v32, %v4585_v16 }
 0x142   : > { %v4598_v55 = vpop.permute.xlu0 %608  ;;  %v4608_v12 = vpop.permute.xlu1 %612 }
 0x143   : > { %6776 = vst [vmem:[#allocation35_spill] sm:$0xff] %v4598_v55 }
 0x146   : > { %v4613_v55 = vpop.permute.xlu0 %616  ;;  %v4621_v15 = vpop.permute.xlu1 %620 }
 0x14a   : > { %v4634_v20 = vpop.permute.xlu1 %628 }
 0x14b   : > { %1066 = vadd.xlane.f32.xlu0 %v938_v3  ;;  %v4623_v3 = vpop.permute.xlu0 %624 }
 0x14e   : > { %v4647_v23 = vpop.permute.xlu1 %636 }
 0x14f   : > { %1070 = vadd.xlane.f32.xlu0 %v940_v10  ;;  %v946_v10 = vsel %vm812_vm8, %v4594_v34, 0.0  ;;  %v4639_v21 = vpop.permute.xlu0 %632  ;;  %vm828_vm8 = vcmp.eq.s32.totalorder %v4466_v40, %v4585_v16 }
 0x150   : > { %1068 = vadd.xlane.f32.xlu1 %v939_v1  ;;  %v944_v1 = vsel %vm810_vm6, %v4594_v34, 0.0  ;;  %vm826_vm6 = vcmp.eq.s32.totalorder %v4462_v38, %v4585_v16  ;;  %v961_v38 = vsel %vm827_vm7, %v4594_v34, 0.0  ;;  %vm843_vm7 = vcmp.eq.s32.totalorder %v4500_v57, %v4585_v16 }
 0x151   : > { %v960_v35 = vsel %vm826_vm6, %v4594_v34, 0.0  ;;  %vm842_vm6 = vcmp.eq.s32.totalorder %v4498_v56, %v4585_v16 }
 0x152   : > { %v4660_v26 = vpop.permute.xlu1 %644 }
 0x153   : > { %1072 = vadd.xlane.f32.xlu0 %v941_v13  ;;  %v947_v13 = vsel %vm813_vm9, %v4594_v34, 0.0  ;;  %vm829_vm9 = vcmp.eq.s32.totalorder %v4468_v41, %v4585_v16 }
 0x154   : > { %1074 = vadd.xlane.f32.xlu1 %v942_v14  ;;  %v4649_v14 = vpop.permute.xlu0 %640  ;;  %v963_v39 = vsel %vm829_vm9, %v4594_v34, 0.0  ;;  %vm845_vm9 = vcmp.eq.s32.totalorder %v4504_v59, %v4585_v16 }
 0x156   : > { %v4673_v29 = vpop.permute.xlu1 %652 }
 0x157   : > { %1076 = vadd.xlane.f32.xlu0 %v943_v17  ;;  %v950_v17 = vsel %vm816_vm12, %v4594_v34, 0.0  ;;  %vm832_vm12 = vcmp.eq.s32.totalorder %v4474_v44, %v4585_v16  ;;  %v967_v44 = vsel %vm833_vm13, %v4594_v34, 0.0  ;;  %vm849_vm13 = vcmp.eq.s32.totalorder %v4512_v63, %v4585_v16 }
 0x158   : > { %1078 = vadd.xlane.f32.xlu1 %v944_v1  ;;  %v952_v1 = vsel %vm818_vm14, %v4594_v34, 0.0  ;;  %v4665_v27 = vpop.permute.xlu0 %648  ;;  %v966_v42 = vsel %vm832_vm12, %v4594_v34, 0.0  ;;  %vm834_vm14 = vcmp.eq.s32.totalorder %v4478_v46, %v4585_v16  ;;  %vm848_vm12 = vcmp.eq.s32.totalorder %v4510_v62, %v4585_v16 }
 0x15a   : > { %v4686_v32 = vpop.permute.xlu1 %660 }
 0x15b   : > { %1080 = vadd.xlane.f32.xlu0 %v945_v18  ;;  %v953_v18 = vsel %vm819_vm15, %v4594_v34, 0.0  ;;  %vm835_vm15 = vcmp.eq.s32.totalorder %v4480_v47, %v4585_v16 }
 0x15c   : > { %1082 = vadd.xlane.f32.xlu1 %v946_v10  ;;  %v4675_v10 = vpop.permute.xlu0 %656  ;;  %v969_v45 = vsel %vm835_vm15, %v4594_v34, 0.0  ;;  %vm851_vm15 = vcmp.eq.s32.totalorder %v4516_v5, %v4585_v16 }
 0x15e   : > { %v4699_v36 = vpop.permute.xlu1 %668 }
 0x15f   : > { %1084 = vadd.xlane.f32.xlu0 %v947_v13  ;;  %v956_v13 = vsel %vm822_vm2, %v4594_v34, 0.0  ;;  %vm838_vm2 = vcmp.eq.s32.totalorder %v4486_v50, %v4585_v16  ;;  %v973_v50 = vsel %vm839_vm3, %v4594_v34, 0.0  ;;  %vm855_vm3 = vcmp.eq.s32.totalorder %v4524_v19, %v4585_v16  ;;  %v6778_v19 = vld [vmem:[#allocation12_spill] sm:$0xff] }
 0x160   : > { %1086 = vadd.xlane.f32.xlu1 %v948_v22  ;;  %v958_v22 = vsel %vm824_vm4, %v4594_v34, 0.0  ;;  %v4691_v33 = vpop.permute.xlu0 %664  ;;  %v972_v48 = vsel %vm838_vm2, %v4594_v34, 0.0  ;;  %vm840_vm4 = vcmp.eq.s32.totalorder %v4491_v53, %v4585_v16  ;;  %vm854_vm2 = vcmp.eq.s32.totalorder %v4522_v11, %v4585_v16  ;;  %v6777_v11 = vld [vmem:[#allocation11_spill] sm:$0xff] }
 0x162   : > { %v4712_v40 = vpop.permute.xlu1 %679 }
 0x163   : > { %1088 = vadd.xlane.f32.xlu0 %v949_v24  ;;  %v959_v24 = vsel %vm825_vm5, %v4594_v34, 0.0  ;;  %vm841_vm5 = vcmp.eq.s32.totalorder %v4493_v54, %v4585_v16 }
 0x164   : > { %1090 = vadd.xlane.f32.xlu1 %v950_v17  ;;  %v4701_v17 = vpop.permute.xlu0 %675  ;;  %v975_v51 = vsel %vm841_vm5, %v4594_v34, 0.0  ;;  %vm857_vm5 = vcmp.eq.s32.totalorder %v6777_v11, %v4585_v16 }
 0x166   : > { %v4725_v43 = vpop.permute.xlu1 %687 }
 0x167   : > { %1092 = vadd.xlane.f32.xlu0 %v951_v25  ;;  %v962_v25 = vsel %vm828_vm8, %v4594_v34, 0.0  ;;  %vm844_vm8 = vcmp.eq.s32.totalorder %v4502_v58, %v4585_v16  ;;  %v979_v58 = vsel %vm845_vm9, %v4594_v34, 0.0 }
 0x168   : > { %1094 = vadd.xlane.f32.xlu1 %v952_v1  ;;  %v964_v1 = vsel %vm830_vm10, %v4594_v34, 0.0  ;;  %v4717_v41 = vpop.permute.xlu0 %683  ;;  %v978_v56 = vsel %vm844_vm8, %v4594_v34, 0.0  ;;  %vm846_vm10 = vcmp.eq.s32.totalorder %v4506_v60, %v4585_v16 }
 0x16a   : > { %v4738_v46 = vpop.permute.xlu1 %695 }
 0x16b   : > { %1096 = vadd.xlane.f32.xlu0 %v953_v18  ;;  %v965_v18 = vsel %vm831_vm11, %v4594_v34, 0.0  ;;  %vm847_vm11 = vcmp.eq.s32.totalorder %v4508_v61, %v4585_v16 }
 0x16c   : > { %1098 = vadd.xlane.f32.xlu1 %v954_v28  ;;  %v4727_v28 = vpop.permute.xlu0 %691  ;;  %v981_v59 = vsel %vm847_vm11, %v4594_v34, 0.0 }
 0x16e   : > { %v4751_v49 = vpop.permute.xlu1 %703 }
 0x16f   : > { %1100 = vadd.xlane.f32.xlu0 %v955_v30  ;;  %v968_v30 = vsel %vm834_vm14, %v4594_v34, 0.0  ;;  %vm850_vm14 = vcmp.eq.s32.totalorder %v4514_v0, %v4585_v16  ;;  %v985_v0 = vsel %vm851_vm15, %v4594_v34, 0.0 }
 0x170   : > { %1102 = vadd.xlane.f32.xlu1 %v956_v13  ;;  %v970_v13 = vsel %vm836_vm0, %v4594_v34, 0.0  ;;  %v4743_v47 = vpop.permute.xlu0 %699  ;;  %v984_v62 = vsel %vm850_vm14, %v4594_v34, 0.0  ;;  %vm852_vm0 = vcmp.eq.s32.totalorder %v4518_v7, %v4585_v16 }
 0x172   : > { %v4764_v53 = vpop.permute.xlu1 %711 }
 0x173   : > { %1104 = vadd.xlane.f32.xlu0 %v957_v31  ;;  %v971_v31 = vsel %vm837_vm1, %v4594_v34, 0.0  ;;  %vm853_vm1 = vcmp.eq.s32.totalorder %v4520_v9, %v4585_v16 }
 0x174   : > { %1106 = vadd.xlane.f32.xlu1 %v958_v22  ;;  %v4753_v22 = vpop.permute.xlu0 %707  ;;  %v987_v5 = vsel %vm853_vm1, %v4594_v34, 0.0 }
 0x176   : > { %v4777_v57 = vpop.permute.xlu1 %719 }
 0x177   : > { %1108 = vadd.xlane.f32.xlu0 %v959_v24  ;;  %v974_v24 = vsel %vm840_vm4, %v4594_v34, 0.0  ;;  %vm856_vm4 = vcmp.eq.s32.totalorder %v4527_v52, %v4585_v16  ;;  %v991_v52 = vsel %vm857_vm5, %v4594_v34, 0.0 }
 0x178   : > { %1110 = vadd.xlane.f32.xlu1 %v960_v35  ;;  %v976_v35 = vsel %vm842_vm6, %v4594_v34, 0.0  ;;  %v4769_v54 = vpop.permute.xlu0 %715  ;;  %vm858_vm6 = vcmp.eq.s32.totalorder %v6778_v19, %v4585_v16 }
 0x17a   : > { %v4790_v60 = vpop.permute.xlu1 %727 }
 0x17b   : > { %1112 = vadd.xlane.f32.xlu0 %v961_v38  ;;  %v977_v38 = vsel %vm843_vm7, %v4594_v34, 0.0 }
 0x17c   : > { %1114 = vadd.xlane.f32.xlu1 %v962_v25  ;;  %v4779_v25 = vpop.permute.xlu0 %723 }
 0x17e   : > { %v4803_v63 = vpop.permute.xlu1 %735 }
 0x17f   : > { %1116 = vadd.xlane.f32.xlu0 %v963_v39  ;;  %v980_v39 = vsel %vm846_vm10, %v4594_v34, 0.0 }
 0x180   : > { %1118 = vadd.xlane.f32.xlu1 %v964_v1  ;;  %v982_v1 = vsel %vm848_vm12, %v4594_v34, 0.0  ;;  %v4795_v61 = vpop.permute.xlu0 %731 }
 0x182   : > { %v4816_v7 = vpop.permute.xlu1 %746 }
 0x183   : > { %1120 = vadd.xlane.f32.xlu0 %v965_v18  ;;  %v983_v18 = vsel %vm849_vm13, %v4594_v34, 0.0 }
 0x184   : > { %1122 = vadd.xlane.f32.xlu1 %v966_v42  ;;  %v4805_v42 = vpop.permute.xlu0 %742 }
 0x187   : > { %1124 = vadd.xlane.f32.xlu0 %v967_v44  ;;  %v986_v44 = vsel %vm852_vm0, %v4594_v34, 0.0 }
 0x188   : > { %1126 = vadd.xlane.f32.xlu1 %v968_v30  ;;  %v988_v30 = vsel %vm854_vm2, %v4594_v34, 0.0  ;;  %v4821_v9 = vpop.permute.xlu0 %750 }
 0x18b   : > { %1128 = vadd.xlane.f32.xlu0 %v969_v45  ;;  %v989_v45 = vsel %vm855_vm3, %v4594_v34, 0.0 }
 0x18c   : > { %1130 = vadd.xlane.f32.xlu1 %v970_v13  ;;  %v990_v13 = vsel %vm856_vm4, %v4594_v34, 0.0 }
 0x18f   : > { %1132 = vadd.xlane.f32.xlu0 %v971_v31  ;;  %v4829_v31 = vpop.permute.xlu1 %754 }
 0x190   : > { %1134 = vadd.xlane.f32.xlu1 %v972_v48  ;;  %v4831_v48 = vpop.permute.xlu0 %758 }
 0x193   : > { %1136 = vadd.xlane.f32.xlu0 %v973_v50  ;;  %v6779_v50 = vld [vmem:[#allocation13_spill] sm:$0xff] }
 0x194   : > { %1138 = vadd.xlane.f32.xlu1 %v974_v24  ;;  %vm859_vm7 = vcmp.eq.s32.totalorder %v6779_v50, %v4585_v16  ;;  %v992_v24 = vsel %vm858_vm6, %v4594_v34, 0.0 }
 0x197   : > { %1140 = vadd.xlane.f32.xlu0 %v975_v51  ;;  %v6780_v51 = vld [vmem:[#allocation14_spill] sm:$0xff] }
 0x198   : > { %1142 = vadd.xlane.f32.xlu1 %v976_v35  ;;  %vm860_vm8 = vcmp.eq.s32.totalorder %v6780_v51, %v4585_v16  ;;  %v993_v35 = vsel %vm859_vm7, %v4594_v34, 0.0  ;;  %v6793_v51 = vld [vmem:[#allocation22_spill] sm:$0xff] }
 0x199   : > { %vm868_vm0 = vcmp.eq.s32.totalorder %v6793_v51, %v4585_v16  ;;  %v6803_v51 = vld [vmem:[#allocation28_spill] sm:$0xff] }
 0x19a   : > { %vm874_vm6 = vcmp.eq.s32.totalorder %v6803_v51, %v4585_v16 }
 0x19b   : > { %1144 = vadd.xlane.f32.xlu0 %v977_v38  ;;  %v6781_v38 = vld [vmem:[#allocation15_spill] sm:$0xff] }
 0x19c   : > { %1146 = vadd.xlane.f32.xlu1 %v978_v56  ;;  %vm861_vm9 = vcmp.eq.s32.totalorder %v6781_v38, %v4585_v16  ;;  %v4842_v56 = vpop.permute.xlu1 %762 }
 0x19d   : > { %6782 = vst [vmem:[#allocation11_spill] sm:$0xff] %v4842_v56 }
 0x19f   : > { %1148 = vadd.xlane.f32.xlu0 %v979_v58  ;;  %v994_v58 = vsel %vm860_vm8, %v4594_v34, 0.0  ;;  %vm876_vm8 = vcmp.eq.s32.totalorder %v4570_v6, %v4585_v16  ;;  %v1475_v6 = vadd.s32 4294967264, %v4582_v37 }
 0x1a0   : > { %1150 = vadd.xlane.f32.xlu1 %v980_v39  ;;  %v6783_v39 = vld [vmem:[#allocation16_spill] sm:$0xff] }
 0x1a1   : > { %vm862_vm10 = vcmp.eq.s32.totalorder %v6783_v39, %v4585_v16  ;;  %v1002_v39 = vsel %vm868_vm0, %v4594_v34, 0.0  ;;  %vm1480_vm0 = vcmask 326912  }
 0x1a3   : > { %1152 = vadd.xlane.f32.xlu0 %v981_v59  ;;  %v4847_v59 = vpop.permute.xlu0 %766 }
 0x1a4   : > { %1154 = vadd.xlane.f32.xlu1 %v982_v1  ;;  %6784 = vst [vmem:[#allocation12_spill] sm:$0xff] %v4847_v59  ;;  %v995_v1 = vsel %vm861_vm9, %v4594_v34, 0.0 }
 0x1a7   : > { %1156 = vadd.xlane.f32.xlu0 %v983_v18  ;;  %v6785_v18 = vld [vmem:[#allocation17_spill] sm:$0xff] }
 0x1a8   : > { %1158 = vadd.xlane.f32.xlu1 %v984_v62  ;;  %vm863_vm11 = vcmp.eq.s32.totalorder %v6785_v18, %v4585_v16  ;;  %v996_v62 = vsel %vm862_vm10, %v4594_v34, 0.0 }
 0x1ab   : > { %1160 = vadd.xlane.f32.xlu0 %v985_v0  ;;  %v6786_v0 = vld [vmem:[#allocation18_spill] sm:$0xff] }
 0x1ac   : > { %1162 = vadd.xlane.f32.xlu1 %v986_v44  ;;  %vm864_vm12 = vcmp.eq.s32.totalorder %v6786_v0, %v4585_v16  ;;  %v4855_v44 = vpop.permute.xlu1 %770 }
 0x1ad   : > { %6787 = vst [vmem:[#allocation13_spill] sm:$0xff] %v4855_v44  ;;  %v998_v11 = vsel %vm864_vm12, %v4594_v34, 0.0  ;;  %vm1466_vm12 = vcmask 195712  }
 0x1af   : > { %1164 = vadd.xlane.f32.xlu0 %v987_v5  ;;  %v4857_v5 = vpop.permute.xlu0 %774 }
 0x1b0   : > { %1166 = vadd.xlane.f32.xlu1 %v988_v30  ;;  %6788 = vst [vmem:[#allocation14_spill] sm:$0xff] %v4857_v5  ;;  %v997_v30 = vsel %vm863_vm11, %v4594_v34, 0.0  ;;  %v4868_v50 = vpop.permute.xlu1 %778  ;;  %vm1459_vm11 = vcmask 130112  }
 0x1b1   : > { %6792 = vst [vmem:[#allocation15_spill] sm:$0xff] %v4868_v50  ;;  %v6815_v50 = vld [vmem:[#allocation32_spill] sm:$0xff] }
 0x1b3   : > { %1168 = vadd.xlane.f32.xlu0 %v989_v45  ;;  %v6789_v45 = vld [vmem:[#allocation19_spill] sm:$0xff] }
 0x1b4   : > { %1170 = vadd.xlane.f32.xlu1 %v990_v13  ;;  %vm865_vm13 = vcmp.eq.s32.totalorder %v6789_v45, %v4585_v16  ;;  %v6790_v13 = vld [vmem:[#allocation20_spill] sm:$0xff]  ;;  %v4881_v18 = vpop.permute.xlu1 %786 }
 0x1b5   : > { %vm866_vm14 = vcmp.eq.s32.totalorder %v6790_v13, %v4585_v16  ;;  %v999_v19 = vsel %vm865_vm13, %v4594_v34, 0.0  ;;  %6797 = vst [vmem:[#allocation17_spill] sm:$0xff] %v4881_v18  ;;  %vm879_vm13 = vcmp.eq.s32.totalorder %v6815_v50, %v4585_v16 }
 0x1b7   : > { %1172 = vadd.xlane.f32.xlu0 %v991_v52  ;;  %v6791_v52 = vld [vmem:[#allocation21_spill] sm:$0xff] }
 0x1b8   : > { %1174 = vadd.xlane.f32.xlu1 %v992_v24  ;;  %vm867_vm15 = vcmp.eq.s32.totalorder %v6791_v52, %v4585_v16  ;;  %v1000_v24 = vsel %vm866_vm14, %v4594_v34, 0.0  ;;  %v4894_v52 = vpop.permute.xlu1 %794  ;;  %vm880_vm14 = vcmp.eq.s32.totalorder %v4579_v8, %v4585_v16 }
 0x1b9   : > { %v1001_v38 = vsel %vm867_vm15, %v4594_v34, 0.0  ;;  %6802 = vst [vmem:[#allocation19_spill] sm:$0xff] %v4894_v52  ;;  %vm1473_vm15 = vcmask 261312  }
 0x1bb   : > { %1176 = vadd.xlane.f32.xlu0 %v993_v35  ;;  %v4873_v35 = vpop.permute.xlu0 %782 }
 0x1bc   : > { %1178 = vadd.xlane.f32.xlu1 %v994_v58  ;;  %6794 = vst [vmem:[#allocation16_spill] sm:$0xff] %v4873_v35  ;;  %v6795_v58 = vld [vmem:[#allocation23_spill] sm:$0xff] }
 0x1bd   : > { %vm869_vm1 = vcmp.eq.s32.totalorder %v6795_v58, %v4585_v16 }
 0x1be   : > { %v1003_v0 = vsel %vm869_vm1, %v4594_v34, 0.0  ;;  %vm881_vm1 = vcmp.eq.s32.totalorder %v4587_v2, %v4585_v16 }
 0x1bf   : > { %1180 = vadd.xlane.f32.xlu0 %v995_v1  ;;  %v6796_v1 = vld [vmem:[#allocation24_spill] sm:$0xff] }
 0x1c0   : > { %1182 = vadd.xlane.f32.xlu1 %v996_v62  ;;  %vm870_vm2 = vcmp.eq.s32.totalorder %v6796_v1, %v4585_v16  ;;  %v4883_v62 = vpop.permute.xlu0 %790  ;;  %v6805_v1 = vld [vmem:[#allocation29_spill] sm:$0xff] }
 0x1c1   : > { %6798 = vst [vmem:[#allocation18_spill] sm:$0xff] %v4883_v62  ;;  %v1004_v45 = vsel %vm870_vm2, %v4594_v34, 0.0  ;;  %vm875_vm7 = vcmp.eq.s32.totalorder %v6805_v1, %v4585_v16  ;;  %vm882_vm2 = vcmp.eq.s32.totalorder %v4589_v4, %v4585_v16 }
 0x1c3   : > { %1184 = vadd.xlane.f32.xlu0 %v997_v30  ;;  %v6799_v30 = vld [vmem:[#allocation25_spill] sm:$0xff] }
 0x1c4   : > { %1186 = vadd.xlane.f32.xlu1 %v998_v11  ;;  %vm871_vm3 = vcmp.eq.s32.totalorder %v6799_v30, %v4585_v16  ;;  %v6800_v11 = vld [vmem:[#allocation26_spill] sm:$0xff]  ;;  %v1461_v30 = vadd.s32 4294967280, %v4582_v37 }
 0x1c5   : > { %vm872_vm4 = vcmp.eq.s32.totalorder %v6800_v11, %v4585_v16  ;;  %v1005_v13 = vsel %vm871_vm3, %v4594_v34, 0.0  ;;  %v6806_v11 = vld [vmem:[#allocation30_spill] sm:$0xff]  ;;  %vm1487_vm3 = vcmask 392512  }
 0x1c6   : > { %vm877_vm9 = vcmp.eq.s32.totalorder %v6806_v11, %v4585_v16 }
 0x1c7   : > { %1188 = vadd.xlane.f32.xlu0 %v999_v19  ;;  %v6801_v19 = vld [vmem:[#allocation27_spill] sm:$0xff]  ;;  %v1011_v52 = vsel %vm877_vm9, %v4594_v34, 0.0  ;;  %vm885_vm9 = vcmp.eq.s32.totalorder %v4608_v12, %v4585_v16 }
 0x1c8   : > { %1190 = vadd.xlane.f32.xlu1 %v1000_v24  ;;  %vm873_vm5 = vcmp.eq.s32.totalorder %v6801_v19, %v4585_v16  ;;  %v1006_v24 = vsel %vm872_vm4, %v4594_v34, 0.0  ;;  %v1468_v19 = vadd.s32 4294967272, %v4582_v37  ;;  %vm1494_vm4 = vcmask 458112  }
 0x1c9   : > { %v1007_v58 = vsel %vm873_vm5, %v4594_v34, 0.0 }
 0x1cb   : > { %1192 = vadd.xlane.f32.xlu0 %v1001_v38  ;;  %v4899_v38 = vpop.permute.xlu0 %798 }
 0x1cc   : > { %1194 = vadd.xlane.f32.xlu1 %v1002_v39  ;;  %6804 = vst [vmem:[#allocation20_spill] sm:$0xff] %v4899_v38  ;;  %v1454_v39 = vadd.s32 4294967288, %v4582_v37 }
 0x1cf   : > { %1196 = vadd.xlane.f32.xlu0 %v1003_v0  ;;  %v1008_v0 = vsel %vm874_vm6, %v4594_v34, 0.0 }
 0x1d0   : > { %1198 = vadd.xlane.f32.xlu1 %v1004_v45 }
 0x1d3   : > { %1200 = vadd.xlane.f32.xlu0 %v1005_v13  ;;  %v4911_v13 = vpop.permute.xlu1 %802 }
 0x1d4   : > { %1202 = vadd.xlane.f32.xlu1 %v1006_v24  ;;  %6807 = vst [vmem:[#allocation21_spill] sm:$0xff] %v4911_v13  ;;  %v6808_v24 = vld [vmem:[#allocation10_spill] sm:$0xff]  ;;  %v6812_v13 = vld [vmem:[#allocation31_spill] sm:$0xff] }
 0x1d5   : > { %v4916_v51 = vsub.s32 %v4582_v37, %v6808_v24  ;;  %v4920_v1 = vsub.s32 %v1454_v39, %v6808_v24  ;;  %v4925_v11 = vsub.s32 %v1461_v30, %v6808_v24  ;;  %vm878_vm10 = vcmp.eq.s32.totalorder %v6812_v13, %v4585_v16 }
 0x1d6   : > { %v4931_v39 = vsub.s32 %v1468_v19, %v6808_v24  ;;  %v4937_v35 = vsub.s32 %v1475_v6, %v6808_v24  ;;  %v1012_v19 = vsel %vm878_vm10, %v4594_v34, 0.0  ;;  %v1496_v13 = vadd.s32 4294967240, %v4582_v37 }
 0x1d7   : > { %1204 = vadd.xlane.f32.xlu0 %v1007_v58  ;;  %6809 = vst [vmem:[#allocation22_spill] sm:$0xff] %v4916_v51  ;;  %v1009_v58 = vsel %vm875_vm7, %v4594_v34, 0.0  ;;  %6810 = vst [vmem:[#allocation23_spill] sm:$0xff] %v4920_v1  ;;  %vm1501_vm7 = vcmask 523712   ;;  %vm886_vm10 = vcmp.eq.s32.totalorder %v4613_v55, %v4585_v16 }
 0x1d8   : > { %1206 = vadd.xlane.f32.xlu1 %v1008_v0  ;;  %v1067_v45 = vpop.xlane.xlu0 %1066  ;;  %v1010_v0 = vsel %vm876_vm8, %v4594_v34, 0.0  ;;  %6811 = vst [vmem:[#allocation24_spill] sm:$0xff] %v4925_v11  ;;  %6813 = vst [vmem:[#allocation25_spill] sm:$0xff] %v4931_v39  ;;  %vm6700_vm8 = vcmask 589312  }
 0x1d9   : > { %v1453_v18 = vrot.slane %v1067_v45, %v4916_v51  ;;  %6814 = vst [vmem:[#allocation26_spill] sm:$0xff] %v4937_v35 }
 0x1db   : > { %1208 = vadd.xlane.f32.xlu0 %v1009_v58  ;;  %v1482_v58 = vadd.s32 4294967256, %v4582_v37 }
 0x1dc   : > { %1210 = vadd.xlane.f32.xlu1 %v1010_v0  ;;  %v1071_v38 = vpop.xlane.xlu0 %1070  ;;  %v1489_v0 = vadd.s32 4294967248, %v4582_v37 }
 0x1dd   : > { %v1069_v62 = vpop.xlane.xlu1 %1068  ;;  %v1465_v5 = vrot.slane %v1071_v38, %v4925_v11 }
 0x1de   : > { %v1458_v30 = vrot.slane %v1069_v62, %v4920_v1 }
 0x1df   : > { %1212 = vadd.xlane.f32.xlu0 %v1011_v52  ;;  %v4953_v52 = vsub.s32 %v1482_v58, %v6808_v24 }
 0x1e0   : > { %v1460_v62 = vsel %vm1459_vm11, %v1458_v30, %v1453_v18  ;;  %1214 = vadd.xlane.f32.xlu1 %v1012_v19  ;;  %v1073_v45 = vpop.xlane.xlu0 %1072  ;;  %v1013_v18 = vsel %vm879_vm13, %v4594_v34, 0.0  ;;  %v4962_v30 = vsub.s32 %v1489_v0, %v6808_v24  ;;  %v1014_v19 = vsel %vm880_vm14, %v4594_v34, 0.0 }
 0x1e1   : > { %v1467_v6 = vsel %vm1466_vm12, %v1465_v5, %v1460_v62  ;;  %v1472_v44 = vrot.slane %v1073_v45, %v4931_v39  ;;  %v1075_v38 = vpop.xlane.xlu1 %1074  ;;  %6816 = vst [vmem:[#allocation27_spill] sm:$0xff] %v4953_v52  ;;  %v1503_v5 = vadd.s32 4294967232, %v4582_v37  ;;  %v1510_v45 = vadd.s32 4294967224, %v4582_v37 }
 0x1e2   : > { %v1479_v59 = vrot.slane %v1075_v38, %v4937_v35  ;;  %6817 = vst [vmem:[#allocation28_spill] sm:$0xff] %v4962_v30  ;;  %vm6701_vm13 = vcmask 654912   ;;  %vm6697_vm14 = vcmask 720512  }
 0x1e3   : > { %v1474_v58 = vsel %vm1473_vm15, %v1472_v44, %v1467_v6  ;;  %1216 = vadd.xlane.f32.xlu0 %v1013_v18  ;;  %v4977_v44 = vsub.s32 %v1496_v13, %v6808_v24  ;;  %v1015_v6 = vsel %vm881_vm1, %v4594_v34, 0.0  ;;  %v4983_v38 = vsub.s32 %v1503_v5, %v6808_v24  ;;  %v6820_v18 = vld [vmem:[#allocation34_spill] sm:$0xff] }
 0x1e4   : > { %v1481_v50 = vsel %vm1480_vm0, %v1479_v59, %v1474_v58  ;;  %1218 = vadd.xlane.f32.xlu1 %v1014_v19  ;;  %v1077_v0 = vpop.xlane.xlu0 %1076  ;;  %v1517_v59 = vadd.s32 4294967216, %v4582_v37  ;;  %vm883_vm5 = vcmp.eq.s32.totalorder %v6820_v18, %v4585_v16  ;;  %v1016_v13 = vsel %vm882_vm2, %v4594_v34, 0.0  ;;  %v6821_v19 = vld [vmem:[#allocation35_spill] sm:$0xff] }
 0x1e5   : > { %v1486_v62 = vrot.slane %v1077_v0, %v4953_v52  ;;  %v1079_v2 = vpop.xlane.xlu1 %1078  ;;  %6818 = vst [vmem:[#allocation29_spill] sm:$0xff] %v4977_v44  ;;  %6819 = vst [vmem:[#allocation30_spill] sm:$0xff] %v4983_v38  ;;  %vm884_vm6 = vcmp.eq.s32.totalorder %v6821_v19, %v4585_v16  ;;  %vm887_vm1 = vcmp.eq.s32.totalorder %v4621_v15, %v4585_v16 }
 0x1e6   : > { %v1493_v8 = vrot.slane %v1079_v2, %v4962_v30  ;;  %v5004_v56 = vsub.s32 %v1517_v59, %v6808_v24  ;;  %vm888_vm2 = vcmp.eq.s32.totalorder %v4623_v3, %v4585_v16 }
 0x1e7   : > { %v1488_v58 = vsel %vm1487_vm3, %v1486_v62, %v1481_v50  ;;  %1220 = vadd.xlane.f32.xlu0 %v1015_v6  ;;  %v4998_v50 = vsub.s32 %v1510_v45, %v6808_v24  ;;  %v1524_v62 = vadd.s32 4294967208, %v4582_v37  ;;  %v1017_v6 = vsel %vm883_vm5, %v4594_v34, 0.0 }
 0x1e8   : > { %v1495_v0 = vsel %vm1494_vm4, %v1493_v8, %v1488_v58  ;;  %1222 = vadd.xlane.f32.xlu1 %v1016_v13  ;;  %v1081_v5 = vpop.xlane.xlu0 %1080  ;;  %6823 = vst [vmem:[#allocation31_spill] sm:$0xff] %v5004_v56  ;;  %v1531_v8 = vadd.s32 4294967200, %v4582_v37  ;;  %v1018_v45 = vsel %vm884_vm6, %v4594_v34, 0.0  ;;  %vm6699_vm5 = vcmask 786112  }
 0x1e9   : > { %v1500_v2 = vrot.slane %v1081_v5, %v4977_v44  ;;  %v1083_v18 = vpop.xlane.xlu1 %1082  ;;  %6822 = vst [vmem:[#allocation10_spill] sm:$0xff] %v4998_v50  ;;  %vm6698_vm6 = vcmask 851712  }
 0x1ea   : > { %v1507_v4 = vrot.slane %v1083_v18, %v4983_v38  ;;  %v1019_v18 = vsel %vm885_vm9, %v4594_v34, 0.0  ;;  %vm889_vm9 = vcmp.eq.s32.totalorder %v4634_v20, %v4585_v16 }
 0x1eb   : > { %v1502_v58 = vsel %vm1501_vm7, %v1500_v2, %v1495_v0  ;;  %1224 = vadd.xlane.f32.xlu0 %v1017_v6  ;;  %v5019_v0 = vsub.s32 %v1524_v62, %v6808_v24  ;;  %v1538_v2 = vadd.s32 4294967192, %v4582_v37  ;;  %v5025_v6 = vsub.s32 %v1531_v8, %v6808_v24 }
 0x1ec   : > { %v1509_v13 = vsel %vm6700_vm8, %v1507_v4, %v1502_v58  ;;  %1226 = vadd.xlane.f32.xlu1 %v1018_v45  ;;  %v1085_v59 = vpop.xlane.xlu0 %1084  ;;  %v1545_v4 = vadd.s32 4294967184, %v4582_v37  ;;  %v1020_v62 = vsel %vm886_vm10, %v4594_v34, 0.0  ;;  %vm890_vm10 = vcmp.eq.s32.totalorder %v4639_v21, %v4585_v16 }
 0x1ed   : > { %v1514_v5 = vrot.slane %v1085_v59, %v4998_v50  ;;  %v1087_v12 = vpop.xlane.xlu1 %1086  ;;  %6824 = vst [vmem:[#allocation32_spill] sm:$0xff] %v5019_v0  ;;  %6825 = vst [vmem:[#allocation34_spill] sm:$0xff] %v5025_v6  ;;  %v1023_v3 = vsel %vm889_vm9, %v4594_v34, 0.0  ;;  %vm893_vm9 = vcmp.eq.s32.totalorder %v4660_v26, %v4585_v16 }
 0x1ee   : > { %v1521_v19 = vrot.slane %v1087_v12, %v5004_v56  ;;  %v1021_v12 = vsel %vm887_vm1, %v4594_v34, 0.0  ;;  %vm1543_vm1 = vcmask 917312   ;;  %v1027_v26 = vsel %vm893_vm9, %v4594_v34, 0.0 }
 0x1ef   : > { %v1516_v58 = vsel %vm6701_vm13, %v1514_v5, %v1509_v13  ;;  %1228 = vadd.xlane.f32.xlu0 %v1019_v18  ;;  %v5040_v13 = vsub.s32 %v1538_v2, %v6808_v24  ;;  %v1552_v5 = vadd.s32 4294967176, %v4582_v37  ;;  %v5046_v18 = vsub.s32 %v1545_v4, %v6808_v24 }
 0x1f0   : > { %v1523_v45 = vsel %vm6697_vm14, %v1521_v19, %v1516_v58  ;;  %1230 = vadd.xlane.f32.xlu1 %v1020_v62  ;;  %v1089_v8 = vpop.xlane.xlu0 %1088  ;;  %v1022_v2 = vsel %vm888_vm2, %v4594_v34, 0.0  ;;  %vm1550_vm14 = vcmask 982912   ;;  %vm891_vm2 = vcmp.eq.s32.totalorder %v4647_v23, %v4585_v16 }
 0x1f1   : > { %v1528_v59 = vrot.slane %v1089_v8, %v5019_v0  ;;  %v1091_v15 = vpop.xlane.xlu1 %1090  ;;  %6826 = vst [vmem:[#allocation35_spill] sm:$0xff] %v5040_v13  ;;  %6827 = vst [vmem:[#allocation36_spill] sm:$0xff] %v5046_v18  ;;  %v5060_v62 = vsub.s32 %v1552_v5, %v6808_v24  ;;  %v1024_v8 = vsel %vm890_vm10, %v4594_v34, 0.0  ;;  %vm894_vm10 = vcmp.eq.s32.totalorder %v4665_v27, %v4585_v16 }
 0x1f2   : > { %v1535_v55 = vrot.slane %v1091_v15, %v5025_v6  ;;  %vm897_vm9 = vcmp.eq.s32.totalorder %v4686_v32, %v4585_v16 }
 0x1f3   : > { %v1530_v19 = vsel %vm6699_vm5, %v1528_v59, %v1523_v45  ;;  %1232 = vadd.xlane.f32.xlu0 %v1021_v12  ;;  %6828 = vst [vmem:[#allocation37_spill] sm:$0xff] %v5060_v62  ;;  %vm1557_vm5 = vcmask 1048512   ;;  %v1025_v12 = vsel %vm891_vm2, %v4594_v34, 0.0  ;;  %vm895_vm2 = vcmp.eq.s32.totalorder %v4673_v29, %v4585_v16 }
 0x1f4   : > { %v1537_v37 = vsel %vm6698_vm6, %v1535_v55, %v1530_v19  ;;  %1234 = vadd.xlane.f32.xlu1 %v1022_v2  ;;  %v1093_v4 = vpop.xlane.xlu0 %1092  ;;  %vm892_vm6 = vcmp.eq.s32.totalorder %v4649_v14, %v4585_v16 }
 0x1f5   : > { %v1542_v58 = vrot.slane %v1093_v4, %v5040_v13  ;;  %v1095_v20 = vpop.xlane.xlu1 %1094  ;;  %v1026_v19 = vsel %vm892_vm6, %v4594_v34, 0.0  ;;  %vm896_vm6 = vcmp.eq.s32.totalorder %v4675_v10, %v4585_v16 }
 0x1f6   : > { %v1549_v45 = vrot.slane %v1095_v20, %v5046_v18 }
 0x1f7   : > { %v1544_v21 = vsel %vm1543_vm1, %v1542_v58, %v1537_v37  ;;  %1236 = vadd.xlane.f32.xlu0 %v1023_v3 }
 0x1f8   : > { %v1551_v59 = vsel %vm1550_vm14, %v1549_v45, %v1544_v21  ;;  %1238 = vadd.xlane.f32.xlu1 %v1024_v8  ;;  %v1097_v15 = vpop.xlane.xlu0 %1096  ;;  %v1028_v45 = vsel %vm894_vm10, %v4594_v34, 0.0  ;;  %vm898_vm10 = vcmp.eq.s32.totalorder %v4691_v33, %v4585_v16 }
 0x1f9   : > { %v1556_v5 = vrot.slane %v1097_v15, %v5060_v62  ;;  %v1099_v55 = vpop.xlane.xlu1 %1098  ;;  %v1029_v15 = vsel %vm895_vm2, %v4594_v34, 0.0  ;;  %vm899_vm2 = vcmp.eq.s32.totalorder %v4699_v36, %v4585_v16 }
 0x1fa   : > { %v1562_v2 = vrot.slane %v1099_v55, %v4916_v51 }
 0x1fb   : > { %v5076_v23 = vsel %vm1557_vm5, %v1556_v5, %v1551_v59  ;;  %1240 = vadd.xlane.f32.xlu0 %v1025_v12  ;;  %v1030_v5 = vsel %vm896_vm6, %v4594_v34, 0.0  ;;  %vm900_vm6 = vcmp.eq.s32.totalorder %v4701_v17, %v4585_v16 }
 0x1fc   : > { %1242 = vadd.xlane.f32.xlu1 %v1026_v19  ;;  %v1101_v14 = vpop.xlane.xlu0 %1100 }
 0x1fd   : > { %v1566_v37 = vrot.slane %v1101_v14, %v4920_v1  ;;  %v1103_v4 = vpop.xlane.xlu1 %1102 }
 0x1fe   : > { %v1571_v58 = vrot.slane %v1103_v4, %v4925_v11 }
 0x1ff   : > { %v1567_v20 = vsel %vm1459_vm11, %v1566_v37, %v1562_v2  ;;  %1244 = vadd.xlane.f32.xlu0 %v1027_v26  ;;  %v1031_v2 = vsel %vm897_vm9, %v4594_v34, 0.0  ;;  %v1032_v37 = vsel %vm898_vm10, %v4594_v34, 0.0  ;;  %vm901_vm9 = vcmp.eq.s32.totalorder %v4712_v40, %v4585_v16 }
 0x200   : > { %v1572_v27 = vsel %vm1466_vm12, %v1571_v58, %v1567_v20  ;;  %1246 = vadd.xlane.f32.xlu1 %v1028_v45  ;;  %v1105_v3 = vpop.xlane.xlu0 %1104  ;;  %v1033_v45 = vsel %vm899_vm2, %v4594_v34, 0.0  ;;  %vm902_vm10 = vcmp.eq.s32.totalorder %v4717_v41, %v4585_v16  ;;  %vm903_vm2 = vcmp.eq.s32.totalorder %v4725_v43, %v4585_v16 }
 0x201   : > { %v1576_v21 = vrot.slane %v1105_v3, %v4931_v39  ;;  %v1107_v8 = vpop.xlane.xlu1 %1106 }
 0x202   : > { %v1581_v59 = vrot.slane %v1107_v8, %v4937_v35 }
 0x203   : > { %v1577_v29 = vsel %vm1473_vm15, %v1576_v21, %v1572_v27  ;;  %1248 = vadd.xlane.f32.xlu0 %v1029_v15  ;;  %v1034_v27 = vsel %vm900_vm6, %v4594_v34, 0.0  ;;  %v1035_v15 = vsel %vm901_vm9, %v4594_v34, 0.0  ;;  %vm904_vm6 = vcmp.eq.s32.totalorder %v4727_v28, %v4585_v16 }
 0x204   : > { %v1582_v10 = vsel %vm1480_vm0, %v1581_v59, %v1577_v29  ;;  %1250 = vadd.xlane.f32.xlu1 %v1030_v5  ;;  %v1109_v55 = vpop.xlane.xlu0 %1108  ;;  %v1036_v29 = vsel %vm902_vm10, %v4594_v34, 0.0  ;;  %vm905_vm9 = vcmp.eq.s32.totalorder %v4738_v46, %v4585_v16  ;;  %vm6831_vm10 = vcmask 851712  }
 0x205   : > { %v1586_v12 = vrot.slane %v1109_v55, %v4953_v52  ;;  %v1111_v19 = vpop.xlane.xlu1 %1110 }
 0x206   : > { %v1591_v14 = vrot.slane %v1111_v19, %v4962_v30  ;;  %v1037_v19 = vsel %vm903_vm2, %v4594_v34, 0.0  ;;  %vm908_vm2 = vcmp.eq.s32.totalorder %v4753_v22, %v4585_v16 }
 0x207   : > { %v1587_v32 = vsel %vm1487_vm3, %v1586_v12, %v1582_v10  ;;  %1252 = vadd.xlane.f32.xlu0 %v1031_v2  ;;  %v1042_v22 = vsel %vm908_vm2, %v4594_v34, 0.0  ;;  %vm913_vm2 = vcmp.eq.s32.totalorder %v4790_v60, %v4585_v16 }
 0x208   : > { %v1592_v33 = vsel %vm1494_vm4, %v1591_v14, %v1587_v32  ;;  %1254 = vadd.xlane.f32.xlu1 %v1032_v37  ;;  %v1113_v4 = vpop.xlane.xlu0 %1112  ;;  %v1038_v14 = vsel %vm904_vm6, %v4594_v34, 0.0  ;;  %vm6744_vm6 = vcmask 1041409  }
 0x209   : > { %v1596_v58 = vrot.slane %v1113_v4, %v4977_v44  ;;  %v1115_v26 = vpop.xlane.xlu1 %1114  ;;  %v1039_v4 = vsel %vm905_vm9, %v4594_v34, 0.0  ;;  %vm909_vm9 = vcmp.eq.s32.totalorder %v4764_v53, %v4585_v16  ;;  %v5174_v53 = vld [vmem:[%s4385_s8] ss:$0 sm:$0xff] }
 0x20a   : > { %v1601_v20 = vrot.slane %v1115_v26, %v4983_v38 }
 0x20b   : > { %v1597_v36 = vsel %vm1501_vm7, %v1596_v58, %v1592_v33  ;;  %1256 = vadd.xlane.f32.xlu0 %v1033_v45 }
 0x20c   : > { %v1602_v17 = vsel %vm6700_vm8, %v1601_v20, %v1597_v36  ;;  %1258 = vadd.xlane.f32.xlu1 %v1034_v27  ;;  %v1117_v3 = vpop.xlane.xlu0 %1116  ;;  %vm6829_vm8 = vcmask 720512  }
 0x20d   : > { %v1606_v21 = vrot.slane %v1117_v3, %v4998_v50  ;;  %v1119_v8 = vpop.xlane.xlu1 %1118 }
 0x20e   : > { %v1611_v59 = vrot.slane %v1119_v8, %v5004_v56 }
 0x20f   : > { %v1607_v40 = vsel %vm6701_vm13, %v1606_v21, %v1602_v17  ;;  %1260 = vadd.xlane.f32.xlu0 %v1035_v15  ;;  %vm6830_vm13 = vcmask 786112   ;;  %v1043_v21 = vsel %vm909_vm9, %v4594_v34, 0.0  ;;  %vm914_vm9 = vcmp.eq.s32.totalorder %v4795_v61, %v4585_v16 }
 0x210   : > { %v1612_v41 = vsel %vm6829_vm8, %v1611_v59, %v1607_v40  ;;  %1262 = vadd.xlane.f32.xlu1 %v1036_v29  ;;  %v1121_v5 = vpop.xlane.xlu0 %1120  ;;  %vm906_vm8 = vcmp.eq.s32.totalorder %v4743_v47, %v4585_v16  ;;  %v1047_v15 = vsel %vm913_vm2, %v5174_v53, 0.0  ;;  %v1048_v40 = vsel %vm914_vm9, %v5174_v53, 0.0 }
 0x211   : > { %v1616_v10 = vrot.slane %v1121_v5, %v5019_v0  ;;  %v1123_v55 = vpop.xlane.xlu1 %1122  ;;  %v1040_v58 = vsel %vm906_vm8, %v4594_v34, 0.0  ;;  %vm910_vm8 = vcmp.eq.s32.totalorder %v4769_v54, %v4585_v16  ;;  %vm918_vm2 = vcmp.eq.s32.totalorder %v4821_v9, %v4585_v16 }
 0x212   : > { %v1621_v12 = vrot.slane %v1123_v55, %v5025_v6  ;;  %v1044_v8 = vsel %vm910_vm8, %v5174_v53, 0.0  ;;  %vm915_vm8 = vcmp.eq.s32.totalorder %v4803_v63, %v4585_v16  ;;  %vm919_vm9 = vcmp.eq.s32.totalorder %v4829_v31, %v4585_v16  ;;  %v6834_v31 = vld [vmem:[#allocation12_spill] sm:$0xff] }
 0x213   : > { %v1617_v43 = vsel %vm6830_vm13, %v1616_v10, %v1612_v41  ;;  %1264 = vadd.xlane.f32.xlu0 %v1037_v19  ;;  %vm907_vm13 = vcmp.eq.s32.totalorder %v4751_v49, %v4585_v16  ;;  %v1049_v29 = vsel %vm915_vm8, %v5174_v53, 0.0  ;;  %v1052_v10 = vsel %vm918_vm2, %v5174_v53, 0.0 }
 0x214   : > { %v1622_v28 = vsel %vm6831_vm10, %v1621_v12, %v1617_v43  ;;  %1266 = vadd.xlane.f32.xlu1 %v1038_v14  ;;  %v1125_v2 = vpop.xlane.xlu0 %1124  ;;  %v1041_v49 = vsel %vm907_vm13, %v4594_v34, 0.0  ;;  %vm911_vm10 = vcmp.eq.s32.totalorder %v4777_v57, %v4585_v16  ;;  %vm912_vm13 = vcmp.eq.s32.totalorder %v4779_v25, %v4585_v16  ;;  %v6833_v12 = vld [vmem:[#allocation11_spill] sm:$0xff] }
 0x215   : > { %v1626_v32 = vrot.slane %v1125_v2, %v5040_v13  ;;  %v1127_v37 = vpop.xlane.xlu1 %1126  ;;  %v1045_v59 = vsel %vm911_vm10, %v5174_v53, 0.0  ;;  %v1046_v34 = vsel %vm912_vm13, %v5174_v53, 0.0  ;;  %vm916_vm10 = vcmp.eq.s32.totalorder %v4805_v42, %v4585_v16 }
 0x216   : > { %v1631_v33 = vrot.slane %v1127_v37, %v5046_v18  ;;  %vm917_vm13 = vcmp.eq.s32.totalorder %v4816_v7, %v4585_v16  ;;  %v1050_v41 = vsel %vm916_vm10, %v5174_v53, 0.0  ;;  %vm920_vm8 = vcmp.eq.s32.totalorder %v4831_v48, %v4585_v16 }
 0x217   : > { %v1627_v46 = vsel %vm1543_vm1, %v1626_v32, %v1622_v28  ;;  %1268 = vadd.xlane.f32.xlu0 %v1039_v4  ;;  %v1051_v5 = vsel %vm917_vm13, %v5174_v53, 0.0  ;;  %v1053_v55 = vsel %vm919_vm9, %v5174_v53, 0.0  ;;  %vm921_vm10 = vcmp.eq.s32.totalorder %v6833_v12, %v4585_v16  ;;  %v6836_v28 = vld [vmem:[#allocation13_spill] sm:$0xff]  ;;  %v6837_v32 = vld [vmem:[#allocation14_spill] sm:$0xff] }
 0x218   : > { %1270 = vadd.xlane.f32.xlu1 %v1040_v58  ;;  %v1129_v47 = vpop.xlane.xlu0 %1128  ;;  %v1632_v45 = vsel %vm1550_vm14, %v1631_v33, %v1627_v46  ;;  %v1054_v19 = vsel %vm920_vm8, %v5174_v53, 0.0  ;;  %vm922_vm13 = vcmp.eq.s32.totalorder %v6834_v31, %v4585_v16  ;;  %v1055_v14 = vsel %vm921_vm10, %v5174_v53, 0.0  ;;  %v6839_v46 = vld [vmem:[#allocation15_spill] sm:$0xff] }
 0x219   : > { %v1636_v26 = vrot.slane %v1129_v47, %v5060_v62  ;;  %v5152_v20 = vpop.xlane.xlu1 %1130  ;;  %vm923_vm2 = vcmp.eq.s32.totalorder %v6836_v28, %v4585_v16  ;;  %v1056_v2 = vsel %vm922_vm13, %v5174_v53, 0.0  ;;  %vm924_vm9 = vcmp.eq.s32.totalorder %v6837_v32, %v4585_v16  ;;  %v6840_v47 = vld [vmem:[#allocation16_spill] sm:$0xff] }
 0x21a   : > { %v1057_v4 = vsel %vm923_vm2, %v5174_v53, 0.0  ;;  %vm925_vm8 = vcmp.eq.s32.totalorder %v6839_v46, %v4585_v16  ;;  %v1058_v58 = vsel %vm924_vm9, %v5174_v53, 0.0  ;;  %vm926_vm10 = vcmp.eq.s32.totalorder %v6840_v47, %v4585_v16  ;;  %v5295_v46 = vld [vmem:[%s245_s24] sm:$0xff] }
 0x21b   : > { %v1637_v36 = vsel %vm1557_vm5, %v1636_v26, %v1632_v45  ;;  %1272 = vadd.xlane.f32.xlu0 %v1041_v49  ;;  %v1059_v49 = vsel %vm925_vm8, %v5174_v53, 0.0 }
 0x21c   : > { %v5164_v27 = vsel %vm6744_vm6, %v1637_v36, %v5076_v23  ;;  %1274 = vadd.xlane.f32.xlu1 %v1042_v22  ;;  %v5166_v17 = vpop.xlane.xlu0 %1132  ;;  %v6841_v36 = vld [vmem:[#allocation17_spill] sm:$0xff]  ;;  %v1060_v22 = vsel %vm926_vm10, %v5174_v53, 0.0  ;;  %vm6960_vm6 = vcmask 654912  }
 0x21d   : > { %6832 = vst [vmem:[#allocation38_spill] sm:$0xff] %v5164_v27  ;;  %v5168_v3 = vpop.xlane.xlu1 %1134  ;;  %vm927_vm13 = vcmp.eq.s32.totalorder %v6841_v36, %v4585_v16 }
 0x21f   : > { %1276 = vadd.xlane.f32.xlu0 %v1043_v21  ;;  %v6842_v21 = vld [vmem:[#allocation18_spill] sm:$0xff] }
 0x220   : > { %1278 = vadd.xlane.f32.xlu1 %v1044_v8  ;;  %v5179_v54 = vpop.xlane.xlu0 %1136  ;;  %vm928_vm2 = vcmp.eq.s32.totalorder %v6842_v21, %v4585_v16 }
 0x221   : > { %v5181_v23 = vpop.xlane.xlu1 %1138 }
 0x223   : > { %1280 = vadd.xlane.f32.xlu0 %v1045_v59 }
 0x224   : > { %1282 = vadd.xlane.f32.xlu1 %v1046_v34  ;;  %v5189_v57 = vpop.xlane.xlu0 %1140  ;;  %v1061_v34 = vsel %vm927_vm13, %v5174_v53, 0.0  ;;  %vm6853_vm13 = vcmask 589312  }
 0x225   : > { %v5191_v25 = vpop.xlane.xlu1 %1142 }
 0x227   : > { %1284 = vadd.xlane.f32.xlu0 %v1047_v15  ;;  %v6843_v15 = vld [vmem:[#allocation19_spill] sm:$0xff] }
 0x228   : > { %1286 = vadd.xlane.f32.xlu1 %v1048_v40  ;;  %v5199_v60 = vpop.xlane.xlu0 %1144  ;;  %vm929_vm9 = vcmp.eq.s32.totalorder %v6843_v15, %v4585_v16  ;;  %v1062_v40 = vsel %vm928_vm2, %v5174_v53, 0.0  ;;  %vm6854_vm2 = vcmask 654912  }
 0x229   : > { %v5201_v61 = vpop.xlane.xlu1 %1146 }
 0x22b   : > { %1288 = vadd.xlane.f32.xlu0 %v1049_v29  ;;  %v6844_v29 = vld [vmem:[#allocation20_spill] sm:$0xff] }
 0x22c   : > { %1290 = vadd.xlane.f32.xlu1 %v1050_v41  ;;  %v5209_v63 = vpop.xlane.xlu0 %1148  ;;  %vm930_vm8 = vcmp.eq.s32.totalorder %v6844_v29, %v4585_v16 }
 0x22d   : > { %v5211_v42 = vpop.xlane.xlu1 %1150  ;;  %v1064_v12 = vsel %vm930_vm8, %v5174_v53, 0.0  ;;  %vm6856_vm8 = vmmov %vm6853_vm13 }
 0x22f   : > { %1292 = vadd.xlane.f32.xlu0 %v1051_v5 }
 0x230   : > { %1294 = vadd.xlane.f32.xlu1 %v1052_v10  ;;  %v5219_v7 = vpop.xlane.xlu0 %1152  ;;  %v1063_v10 = vsel %vm929_vm9, %v5174_v53, 0.0  ;;  %vm6855_vm9 = vcmask 720512  }
 0x231   : > { %v5221_v9 = vpop.xlane.xlu1 %1154 }
 0x233   : > { %1296 = vadd.xlane.f32.xlu0 %v1053_v55  ;;  %v6845_v55 = vld [vmem:[#allocation21_spill] sm:$0xff] }
 0x234   : > { %1298 = vadd.xlane.f32.xlu1 %v1054_v19  ;;  %v5229_v43 = vpop.xlane.xlu0 %1156  ;;  %vm931_vm10 = vcmp.eq.s32.totalorder %v6845_v55, %v4585_v16  ;;  %v1645_v16 = vrot.slane %v5166_v17, %v4920_v1 }
 0x235   : > { %v5231_v48 = vpop.xlane.xlu1 %1158 }
 0x236   : > { %6835 = vst [vmem:[#allocation11_spill] sm:$0xff] %v5231_v48  ;;  %v1655_v48 = vrot.slane %v5179_v54, %v4931_v39 }
 0x237   : > { %1300 = vadd.xlane.f32.xlu0 %v1055_v14  ;;  %v1065_v14 = vsel %vm931_vm10, %v5174_v53, 0.0  ;;  %v6848_v53 = vsub.s32 0, %v6808_v24  ;;  %vm6857_vm10 = vmmov %vm6854_vm2 }
 0x238   : > { %1302 = vadd.xlane.f32.xlu1 %v1056_v2  ;;  %v5239_v37 = vpop.xlane.xlu0 %1160 }
 0x239   : > { %6838 = vst [vmem:[#allocation12_spill] sm:$0xff] %v5239_v37  ;;  %v5241_v33 = vpop.xlane.xlu1 %1162  ;;  %v1650_v37 = vrot.slane %v5168_v3, %v4925_v11 }
 0x23a   : > { %v1720_v54 = vrot.slane %v5241_v33, %v4916_v51  ;;  %v1670_v33 = vrot.slane %v5191_v25, %v4962_v30 }
 0x23b   : > { %1304 = vadd.xlane.f32.xlu0 %v1057_v4 }
 0x23c   : > { %1306 = vadd.xlane.f32.xlu1 %v1058_v58  ;;  %v5249_v26 = vpop.xlane.xlu0 %1164 }
 0x23d   : > { %v5251_v45 = vpop.xlane.xlu1 %1166  ;;  %v1724_v17 = vrot.slane %v5249_v26, %v4920_v1 }
 0x23e   : > { %v1729_v26 = vrot.slane %v5251_v45, %v4925_v11 }
 0x23f   : > { %1308 = vadd.xlane.f32.xlu0 %v1059_v49  ;;  %v2133_v49 = vrot.slane %v5295_v46, %v6848_v53 }
 0x240   : > { %1310 = vadd.xlane.f32.xlu1 %v1060_v22  ;;  %v5259_v8 = vpop.xlane.xlu0 %1168 }
 0x241   : > { %v5261_v59 = vpop.xlane.xlu1 %1170  ;;  %v1734_v45 = vrot.slane %v5259_v8, %v4931_v39 }
 0x242   : > { %v1739_v8 = vrot.slane %v5261_v59, %v4937_v35  ;;  %v1680_v59 = vrot.slane %v5201_v61, %v4983_v38 }
 0x243   : > { %1312 = vadd.xlane.f32.xlu0 %v1061_v34 }
 0x244   : > { %1314 = vadd.xlane.f32.xlu1 %v1062_v40  ;;  %v5269_v41 = vpop.xlane.xlu0 %1172 }
 0x245   : > { %v5271_v5 = vpop.xlane.xlu1 %1174 }
 0x247   : > { %1316 = vadd.xlane.f32.xlu0 %v1063_v10 }
 0x248   : > { %1318 = vadd.xlane.f32.xlu1 %v1064_v12  ;;  %v5277_v19 = vpop.xlane.xlu0 %1176 }
 0x249   : > { %v5279_v31 = vpop.xlane.xlu1 %1178 }
 0x24b   : > { %1320 = vadd.xlane.f32.xlu0 %v1065_v14 }
 0x24c   : > { %v5282_v28 = vpop.xlane.xlu0 %1180 }
 0x24d   : > { %v5284_v2 = vpop.xlane.xlu1 %1182 }
 0x250   : > { %v5286_v32 = vpop.xlane.xlu0 %1184 }
 0x251   : > { %v5288_v4 = vpop.xlane.xlu1 %1186 }
 0x254   : > { %v5297_v58 = vpop.xlane.xlu0 %1188 }
 0x255   : > { %6846 = vst [vmem:[#allocation13_spill] sm:$0xff] %v5297_v58  ;;  %v5299_v47 = vpop.xlane.xlu1 %1190 }
 0x256   : > { %6847 = vst [vmem:[#allocation14_spill] sm:$0xff] %v5299_v47 }
 0x258   : > { %v5304_v36 = vpop.xlane.xlu0 %1192 }
 0x259   : > { %6849 = vst [vmem:[#allocation15_spill] sm:$0xff] %v5304_v36  ;;  %v1195_v22 = vpop.xlane.xlu1 %1194  ;;  %2135 = vbcast.lane.b32.xlu1 %v2133_v49, 256  ;;  %v1641_v36 = vrot.slane %v5152_v20, %v4916_v51 }
 0x25b   : > { %v1646_v62 = vsel %vm1459_vm11, %v1645_v16, %v1641_v36  ;;  %v1665_v16 = vrot.slane %v5189_v57, %v4953_v52 }
 0x25c   : > { %v1197_v21 = vpop.xlane.xlu0 %1196  ;;  %v1651_v20 = vsel %vm1466_vm12, %v1650_v37, %v1646_v62  ;;  %v1725_v62 = vsel %vm1459_vm11, %v1724_v17, %v1720_v54 }
 0x25d   : > { %v5306_v34 = vpop.xlane.xlu1 %1198  ;;  %2143 = vbcast.lane.b32.xlu1 %v2133_v49, 272  ;;  %v1656_v3 = vsel %vm1473_vm15, %v1655_v48, %v1651_v20  ;;  %v1803_v36 = vrot.slane %v1197_v21, %v4920_v1  ;;  %v1799_v21 = vrot.slane %v1195_v22, %v4916_v51  ;;  %v1675_v20 = vrot.slane %v5199_v60, %v4977_v44 }
 0x25e   : > { %v1730_v54 = vsel %vm1466_vm12, %v1729_v26, %v1725_v62 }
 0x260   : > { %v5308_v15 = vpop.xlane.xlu0 %1200 }
 0x261   : > { %v5310_v40 = vpop.xlane.xlu1 %1202  ;;  %2147 = vbcast.lane.b32.xlu1 %v2133_v49, 280  ;;  %2139 = vbcast.lane.b32.xlu0 %v2133_v49, 264  ;;  %v1813_v25 = vrot.slane %v5308_v15, %v4931_v39  ;;  %v1744_v15 = vrot.slane %v5269_v41, %v4953_v52 }
 0x262   : > { %v1818_v62 = vrot.slane %v5310_v40, %v4937_v35 }
 0x264   : > { %v5312_v29 = vpop.xlane.xlu0 %1204 }
 0x265   : > { %v5314_v10 = vpop.xlane.xlu1 %1206  ;;  %2155 = vbcast.lane.b32.xlu1 %v2133_v49, 296  ;;  %2151 = vbcast.lane.b32.xlu0 %v2133_v49, 288  ;;  %v1823_v41 = vrot.slane %v5312_v29, %v4953_v52 }
 0x268   : > { %v5316_v55 = vpop.xlane.xlu0 %1208 }
 0x269   : > { %v5318_v12 = vpop.xlane.xlu1 %1210  ;;  %2163 = vbcast.lane.b32.xlu1 %v2133_v49, 312  ;;  %2159 = vbcast.lane.b32.xlu0 %v2133_v49, 304 }
 0x26c   : > { %v5320_v14 = vpop.xlane.xlu0 %1212 }
 0x26d   : > { %v5322_v53 = vpop.xlane.xlu1 %1214  ;;  %2171 = vbcast.lane.b32.xlu1 %v2133_v49, 328  ;;  %2167 = vbcast.lane.b32.xlu0 %v2133_v49, 320 }
 0x270   : > { %v5326_v27 = vpop.xlane.xlu0 %1216 }
 0x271   : > { %v5330_v47 = vpop.xlane.xlu1 %1218  ;;  %2179 = vbcast.lane.b32.xlu1 %v2133_v49, 344  ;;  %2175 = vbcast.lane.b32.xlu0 %v2133_v49, 336 }
 0x272   : > { %6850 = vst [vmem:[#allocation16_spill] sm:$0xff] %v5330_v47  ;;  %v1660_v47 = vrot.slane %v5181_v23, %v4937_v35  ;;  %v6852_v23 = vsub.s32 1, %v6808_v24 }
 0x274   : > { %v5337_v18 = vpop.xlane.xlu0 %1220  ;;  %v5360_v48 = vrot.slane %v5295_v46, %v6852_v23  ;;  %v1661_v57 = vsel %vm1480_vm0, %v1660_v47, %v1656_v3  ;;  %v1804_v47 = vsel %vm1459_vm11, %v1803_v36, %v1799_v21 }
 0x275   : > { %v5341_v58 = vpop.xlane.xlu1 %1222  ;;  %2187 = vbcast.lane.b32.xlu1 %v2133_v49, 360  ;;  %2183 = vbcast.lane.b32.xlu0 %v2133_v49, 352  ;;  %v1666_v17 = vsel %vm1487_vm3, %v1665_v16, %v1661_v57 }
 0x276   : > { %6851 = vst [vmem:[#allocation17_spill] sm:$0xff] %v5341_v58  ;;  %v1671_v60 = vsel %vm1494_vm4, %v1670_v33, %v1666_v17  ;;  %v1685_v33 = vrot.slane %v5209_v63, %v4998_v50  ;;  %v1749_v17 = vrot.slane %v5271_v5, %v4962_v30 }
 0x277   : > { %v1676_v57 = vsel %vm1501_vm7, %v1675_v20, %v1671_v60  ;;  %v1754_v20 = vrot.slane %v5277_v19, %v4977_v44 }
 0x278   : > { %v5354_v58 = vpop.xlane.xlu0 %1224 }
 0x279   : > { %v1227_v37 = vpop.xlane.xlu1 %1226  ;;  %2195 = vbcast.lane.b32.xlu1 %v2133_v49, 376  ;;  %2191 = vbcast.lane.b32.xlu0 %v2133_v49, 368  ;;  %v1808_v49 = vrot.slane %v5306_v34, %v4925_v11  ;;  %v1735_v34 = vsel %vm1473_vm15, %v1734_v45, %v1730_v54 }
 0x27a   : > { %v1878_v22 = vrot.slane %v1227_v37, %v4916_v51  ;;  %v1740_v61 = vsel %vm1480_vm0, %v1739_v8, %v1735_v34  ;;  %v1759_v34 = vrot.slane %v5279_v31, %v4983_v38  ;;  %v1838_v31 = vrot.slane %v5318_v12, %v4983_v38 }
 0x27b   : > { %v1809_v36 = vsel %vm1466_vm12, %v1808_v49, %v1804_v47  ;;  %v1745_v63 = vsel %vm1487_vm3, %v1744_v15, %v1740_v61  ;;  %v1681_v47 = vsel %vm6853_vm13, %v1680_v59, %v1676_v57  ;;  %v1695_v57 = vrot.slane %v5219_v7, %v5019_v0  ;;  %vm6858_vm13 = vmmov %vm6856_vm8 }
 0x27c   : > { %v1229_v3 = vpop.xlane.xlu0 %1228  ;;  %v1814_v45 = vsel %vm1473_vm15, %v1813_v25, %v1809_v36  ;;  %v1828_v25 = vrot.slane %v5314_v10, %v4962_v30  ;;  %v1686_v8 = vsel %vm6854_vm2, %v1685_v33, %v1681_v47  ;;  %v1750_v60 = vsel %vm1494_vm4, %v1749_v17, %v1745_v63 }
 0x27d   : > { %v1882_v16 = vrot.slane %v1229_v3, %v4920_v1  ;;  %v1231_v23 = vpop.xlane.xlu1 %1230  ;;  %2206 = vbcast.lane.b32.xlu1 %v5360_v48, 264  ;;  %2202 = vbcast.lane.b32.xlu0 %v5360_v48, 256  ;;  %v1819_v5 = vsel %vm1480_vm0, %v1818_v62, %v1814_v45  ;;  %v1774_v17 = vrot.slane %v5286_v32, %v5019_v0  ;;  %vm6859_vm2 = vcmask 786112  }
 0x27e   : > { %v1887_v26 = vrot.slane %v1231_v23, %v4925_v11  ;;  %v1824_v19 = vsel %vm1487_vm3, %v1823_v41, %v1819_v5  ;;  %v1848_v63 = vrot.slane %v5322_v53, %v5004_v56  ;;  %v1853_v47 = vrot.slane %v5326_v27, %v5019_v0 }
 0x27f   : > { %v1883_v37 = vsel %vm1459_vm11, %v1882_v16, %v1878_v22  ;;  %v1690_v22 = vrot.slane %v5211_v42, %v5004_v56  ;;  %v1833_v16 = vrot.slane %v5316_v55, %v4977_v44  ;;  %v1755_v42 = vsel %vm1501_vm7, %v1754_v20, %v1750_v60 }
 0x280   : > { %v1233_v21 = vpop.xlane.xlu0 %1232  ;;  %v1888_v29 = vsel %vm1466_vm12, %v1887_v26, %v1883_v37  ;;  %v1764_v26 = vrot.slane %v5282_v28, %v4998_v50  ;;  %v1829_v36 = vsel %vm1494_vm4, %v1828_v25, %v1824_v19  ;;  %v1843_v28 = vrot.slane %v5320_v14, %v4998_v50 }
 0x281   : > { %v1892_v40 = vrot.slane %v1233_v21, %v4931_v39  ;;  %v1235_v49 = vpop.xlane.xlu1 %1234  ;;  %2214 = vbcast.lane.b32.xlu1 %v5360_v48, 280  ;;  %2210 = vbcast.lane.b32.xlu0 %v5360_v48, 272  ;;  %v1691_v37 = vsel %vm6855_vm9, %v1690_v22, %v1686_v8  ;;  %v1834_v33 = vsel %vm1501_vm7, %v1833_v16, %v1829_v36  ;;  %vm6860_vm9 = vmmov %vm6857_vm10  ;;  %v6863_v8 = vld [vmem:[#allocation13_spill] sm:$0xff] }
 0x282   : > { %v1897_v54 = vrot.slane %v1235_v49, %v4937_v35  ;;  %v1760_v41 = vsel %vm6856_vm8, %v1759_v34, %v1755_v42  ;;  %v1769_v21 = vrot.slane %v5284_v2, %v5004_v56  ;;  %v1700_v49 = vrot.slane %v5221_v9, %v5025_v6  ;;  %v6869_v42 = vld [vmem:[#allocation11_spill] sm:$0xff] }
 0x283   : > { %v1893_v3 = vsel %vm1473_vm15, %v1892_v40, %v1888_v29  ;;  %v1765_v7 = vsel %vm6857_vm10, %v1764_v26, %v1760_v41  ;;  %v1839_v2 = vsel %vm6858_vm13, %v1838_v31, %v1834_v33  ;;  %v1696_v29 = vsel %vm6859_vm2, %v1695_v57, %v1691_v37  ;;  %vm6862_vm10 = vmmov %vm6859_vm2  ;;  %v6870_v31 = vld [vmem:[#allocation37_spill] sm:$0xff]  ;;  %v6873_v41 = vld [vmem:[#allocation14_spill] sm:$0xff] }
 0x284   : > { %v1237_v23 = vpop.xlane.xlu0 %1236  ;;  %v1898_v55 = vsel %vm1480_vm0, %v1897_v54, %v1893_v3  ;;  %v1705_v54 = vrot.slane %v5229_v43, %v5040_v13  ;;  %v1844_v32 = vsel %vm6860_vm9, %v1843_v28, %v1839_v2  ;;  %vm6861_vm8 = vcmask 720512  }
 0x285   : > { %v1902_v10 = vrot.slane %v1237_v23, %v4953_v52  ;;  %v1239_v15 = vpop.xlane.xlu1 %1238  ;;  %2222 = vbcast.lane.b32.xlu1 %v5360_v48, 296  ;;  %2218 = vbcast.lane.b32.xlu0 %v5360_v48, 288  ;;  %v1770_v9 = vsel %vm6861_vm8, %v1769_v21, %v1765_v7  ;;  %v1779_v25 = vrot.slane %v5288_v4, %v5025_v6  ;;  %vm6864_vm2 = vcmask 851712   ;;  %vm6865_vm9 = vmmov %vm6861_vm8  ;;  %v6866_v23 = vld [vmem:[#allocation16_spill] sm:$0xff] }
 0x286   : > { %v1907_v59 = vrot.slane %v1239_v15, %v4962_v30  ;;  %v1775_v43 = vsel %vm6862_vm10, %v1774_v17, %v1770_v9  ;;  %v1784_v22 = vrot.slane %v6863_v8, %v5040_v13  ;;  %v1701_v16 = vsel %vm6864_vm2, %v1700_v49, %v1696_v29  ;;  %v6868_v15 = vld [vmem:[#allocation36_spill] sm:$0xff] }
 0x287   : > { %v1903_v62 = vsel %vm1487_vm3, %v1902_v10, %v1898_v55  ;;  %v1849_v4 = vsel %vm6865_vm9, %v1848_v63, %v1844_v32  ;;  %v1858_v60 = vrot.slane %v6866_v23, %v5025_v6  ;;  %vm6867_vm8 = vcmask 654912  }
 0x288   : > { %v1241_v45 = vpop.xlane.xlu0 %1240  ;;  %v1908_v14 = vsel %vm1494_vm4, %v1907_v59, %v1903_v62  ;;  %v1706_v10 = vsel %vm1543_vm1, %v1705_v54, %v1701_v16  ;;  %v1710_v26 = vrot.slane %v6869_v42, %v6868_v15  ;;  %v1854_v55 = vsel %vm6862_vm10, %v1853_v47, %v1849_v4  ;;  %v6871_v62 = vld [vmem:[#allocation12_spill] sm:$0xff] }
 0x289   : > { %v1912_v12 = vrot.slane %v1241_v45, %v4977_v44  ;;  %v1243_v61 = vpop.xlane.xlu1 %1242  ;;  %2230 = vbcast.lane.b32.xlu1 %v5360_v48, 312  ;;  %2226 = vbcast.lane.b32.xlu0 %v5360_v48, 304  ;;  %v1863_v59 = vrot.slane %v5337_v18, %v5040_v13  ;;  %v1715_v37 = vrot.slane %v6871_v62, %v6870_v31  ;;  %v6881_v4 = vsub.s32 2, %v6808_v24 }
 0x28a   : > { %v1917_v40 = vrot.slane %v1243_v61, %v4983_v38  ;;  %v1789_v21 = vrot.slane %v6873_v41, %v6868_v15  ;;  %v6875_v61 = vld [vmem:[#allocation15_spill] sm:$0xff]  ;;  %v1873_v63 = vrot.slane %v5354_v58, %v6870_v31  ;;  %v1711_v54 = vsel %vm1550_vm14, %v1710_v26, %v1706_v10 }
 0x28b   : > { %v1913_v20 = vsel %vm1501_vm7, %v1912_v12, %v1908_v14  ;;  %v1794_v7 = vrot.slane %v6875_v61, %v6870_v31  ;;  %v6877_v14 = vld [vmem:[#allocation17_spill] sm:$0xff]  ;;  %v2267_v23 = vrot.slane %v5295_v46, %v6881_v4 }
 0x28c   : > { %v1245_v5 = vpop.xlane.xlu0 %1244  ;;  %v1918_v27 = vsel %vm6858_vm13, %v1917_v40, %v1913_v20  ;;  %vm6872_vm13 = vmmov %vm6864_vm2  ;;  %v1868_v40 = vrot.slane %v6877_v14, %v6868_v15  ;;  %v6882_v14 = vsub.s32 3, %v6808_v24 }
 0x28d   : > { %v1922_v53 = vrot.slane %v1245_v5, %v4998_v50  ;;  %v1247_v3 = vpop.xlane.xlu1 %1246  ;;  %2238 = vbcast.lane.b32.xlu1 %v5360_v48, 328  ;;  %2234 = vbcast.lane.b32.xlu0 %v5360_v48, 320  ;;  %v1780_v57 = vsel %vm6872_vm13, %v1779_v25, %v1775_v43  ;;  %vm6874_vm2 = vmmov %vm6865_vm9  ;;  %v1716_v5 = vsel %vm1557_vm5, %v1715_v37, %v1711_v54 }
 0x28e   : > { %v1927_v19 = vrot.slane %v1247_v3, %v5004_v56  ;;  %v1785_v45 = vsel %vm1543_vm1, %v1784_v22, %v1780_v57  ;;  %vm6876_vm9 = vmmov %vm6872_vm13  ;;  %vm6743_vm13 = vcmask 1042434   ;;  %v6880_v22 = vld [vmem:[#allocation38_spill] sm:$0xff] }
 0x28f   : > { %v1923_v34 = vsel %vm6867_vm8, %v1922_v53, %v1918_v27  ;;  %v1859_v17 = vsel %vm6876_vm9, %v1858_v60, %v1854_v55  ;;  %vm6878_vm8 = vmmov %vm6862_vm10  ;;  %v1790_v9 = vsel %vm1550_vm14, %v1789_v21, %v1785_v45  ;;  %v2115_v27 = vsel %vm6743_vm13, %v1716_v5, %v6880_v22 }
 0x290   : > { %v1249_v36 = vpop.xlane.xlu0 %1248  ;;  %v1928_v18 = vsel %vm6874_vm2, %v1927_v19, %v1923_v34  ;;  %v1864_v2 = vsel %vm1543_vm1, %v1863_v59, %v1859_v17  ;;  %vm6879_vm10 = vmmov %vm6876_vm9  ;;  %vm6710_vm2 = vcmask 1043459   ;;  %v1795_v58 = vsel %vm1557_vm5, %v1794_v7, %v1790_v9 }
 0x291   : > { %v1932_v33 = vrot.slane %v1249_v36, %v5019_v0  ;;  %v1251_v28 = vpop.xlane.xlu1 %1250  ;;  %2246 = vbcast.lane.b32.xlu1 %v5360_v48, 344  ;;  %2242 = vbcast.lane.b32.xlu0 %v5360_v48, 336  ;;  %v1869_v53 = vsel %vm1550_vm14, %v1868_v40, %v1864_v2  ;;  %vm6709_vm9 = vcmask 1044484   ;;  %v2117_v60 = vsel %vm6710_vm2, %v1795_v58, %v2115_v27 }
 0x292   : > { %v1937_v12 = vrot.slane %v1251_v28, %v5025_v6  ;;  %v1874_v43 = vsel %vm1557_vm5, %v1873_v63, %v1869_v53  ;;  %v5555_v40 = vrot.slane %v5295_v46, %v6882_v14  ;;  %vm6887_vm2 = vcmask 786112  }
 0x293   : > { %v1933_v49 = vsel %vm6878_vm8, %v1932_v33, %v1928_v18  ;;  %vm6708_vm8 = vcmask 1045509   ;;  %v2119_v10 = vsel %vm6709_vm9, %v1874_v43, %v2117_v60 }
 0x294   : > { %v1938_v20 = vsel %vm6879_vm10, %v1937_v12, %v1933_v49  ;;  %v1253_v29 = vpop.xlane.xlu0 %1252  ;;  %vm6883_vm10 = vcmask 589312  }
 0x295   : > { %v1942_v32 = vrot.slane %v1253_v29, %v5040_v13  ;;  %v1255_v47 = vpop.xlane.xlu1 %1254  ;;  %2254 = vbcast.lane.b32.xlu1 %v5360_v48, 360  ;;  %2250 = vbcast.lane.b32.xlu0 %v5360_v48, 352  ;;  %vm6885_vm9 = vmmov %vm6883_vm10 }
 0x296   : > { %v1947_v25 = vrot.slane %v1255_v47, %v6868_v15 }
 0x297   : > { %v1943_v3 = vsel %vm1543_vm1, %v1942_v32, %v1938_v20 }
 0x298   : > { %v1257_v8 = vpop.xlane.xlu0 %1256  ;;  %v1948_v34 = vsel %vm1550_vm14, %v1947_v25, %v1943_v3 }
 0x299   : > { %v1952_v19 = vrot.slane %v1257_v8, %v6870_v31  ;;  %v1259_v16 = vpop.xlane.xlu1 %1258  ;;  %2262 = vbcast.lane.b32.xlu1 %v5360_v48, 376  ;;  %2258 = vbcast.lane.b32.xlu0 %v5360_v48, 368 }
 0x29a   : > { %v1957_v49 = vrot.slane %v1259_v16, %v4916_v51 }
 0x29b   : > { %v1953_v42 = vsel %vm1557_vm5, %v1952_v19, %v1948_v34 }
 0x29c   : > { %v5533_v26 = vsel %vm6708_vm8, %v1953_v42, %v2119_v10  ;;  %v1261_v55 = vpop.xlane.xlu0 %1260  ;;  %vm6884_vm8 = vcmask 654912  }
 0x29d   : > { %v1263_v59 = vpop.xlane.xlu1 %1262  ;;  %2273 = vbcast.lane.b32.xlu1 %v2267_v23, 264  ;;  %2269 = vbcast.lane.b32.xlu0 %v2267_v23, 256  ;;  %v1961_v61 = vrot.slane %v1261_v55, %v4920_v1 }
 0x29e   : > { %v1966_v2 = vrot.slane %v1263_v59, %v4925_v11 }
 0x29f   : > { %v1962_v63 = vsel %vm1459_vm11, %v1961_v61, %v1957_v49 }
 0x2a0   : > { %v1265_v48 = vpop.xlane.xlu0 %1264  ;;  %v1967_v9 = vsel %vm1466_vm12, %v1966_v2, %v1962_v63 }
 0x2a1   : > { %v1267_v36 = vpop.xlane.xlu1 %1266  ;;  %2281 = vbcast.lane.b32.xlu1 %v2267_v23, 280  ;;  %2277 = vbcast.lane.b32.xlu0 %v2267_v23, 272  ;;  %v1971_v20 = vrot.slane %v1265_v48, %v4931_v39 }
 0x2a2   : > { %v1976_v25 = vrot.slane %v1267_v36, %v4937_v35 }
 0x2a3   : > { %v1972_v53 = vsel %vm1473_vm15, %v1971_v20, %v1967_v9 }
 0x2a4   : > { %v1269_v62 = vpop.xlane.xlu0 %1268  ;;  %v1977_v16 = vsel %vm1480_vm0, %v1976_v25, %v1972_v53 }
 0x2a5   : > { %v1271_v37 = vpop.xlane.xlu1 %1270  ;;  %2289 = vbcast.lane.b32.xlu1 %v2267_v23, 296  ;;  %2285 = vbcast.lane.b32.xlu0 %v2267_v23, 288  ;;  %v1981_v3 = vrot.slane %v1269_v62, %v4953_v52 }
 0x2a6   : > { %v1986_v4 = vrot.slane %v1271_v37, %v4962_v30 }
 0x2a7   : > { %v1982_v60 = vsel %vm1487_vm3, %v1981_v3, %v1977_v16 }
 0x2a8   : > { %v1273_v57 = vpop.xlane.xlu0 %1272  ;;  %v1987_v36 = vsel %vm1494_vm4, %v1986_v4, %v1982_v60 }
 0x2a9   : > { %v5535_v33 = vpop.xlane.xlu1 %1274  ;;  %2297 = vbcast.lane.b32.xlu1 %v2267_v23, 312  ;;  %2293 = vbcast.lane.b32.xlu0 %v2267_v23, 304  ;;  %v1991_v34 = vrot.slane %v1273_v57, %v4977_v44 }
 0x2aa   : > { %v1996_v62 = vrot.slane %v5535_v33, %v4983_v38 }
 0x2ab   : > { %v1992_v57 = vsel %vm1501_vm7, %v1991_v34, %v1987_v36 }
 0x2ac   : > { %v5537_v28 = vpop.xlane.xlu0 %1276  ;;  %v1997_v33 = vsel %vm6883_vm10, %v1996_v62, %v1992_v57  ;;  %vm6886_vm10 = vcmask 720512  }
 0x2ad   : > { %v5539_v45 = vpop.xlane.xlu1 %1278  ;;  %2305 = vbcast.lane.b32.xlu1 %v2267_v23, 328  ;;  %2301 = vbcast.lane.b32.xlu0 %v2267_v23, 320  ;;  %v2001_v61 = vrot.slane %v5537_v28, %v4998_v50 }
 0x2ae   : > { %v2006_v20 = vrot.slane %v5539_v45, %v5004_v56 }
 0x2af   : > { %v2002_v28 = vsel %vm6884_vm8, %v2001_v61, %v1997_v33 }
 0x2b0   : > { %v5541_v41 = vpop.xlane.xlu0 %1280  ;;  %v2007_v45 = vsel %vm6886_vm10, %v2006_v20, %v2002_v28 }
 0x2b1   : > { %v5543_v21 = vpop.xlane.xlu1 %1282  ;;  %2313 = vbcast.lane.b32.xlu1 %v2267_v23, 344  ;;  %2309 = vbcast.lane.b32.xlu0 %v2267_v23, 336 }
 0x2b4   : > { %v5545_v18 = vpop.xlane.xlu0 %1284 }
 0x2b5   : > { %v5547_v12 = vpop.xlane.xlu1 %1286  ;;  %2321 = vbcast.lane.b32.xlu1 %v2267_v23, 360  ;;  %2317 = vbcast.lane.b32.xlu0 %v2267_v23, 352  ;;  %v2021_v3 = vrot.slane %v5545_v18, %v5040_v13 }
 0x2b6   : > { %v2026_v16 = vrot.slane %v5547_v12, %v6868_v15 }
 0x2b8   : > { %v5550_v7 = vpop.xlane.xlu0 %1288 }
 0x2b9   : > { %v1291_v17 = vpop.xlane.xlu1 %1290  ;;  %2329 = vbcast.lane.b32.xlu1 %v2267_v23, 376  ;;  %2325 = vbcast.lane.b32.xlu0 %v2267_v23, 368 }
 0x2ba   : > { %v2036_v54 = vrot.slane %v1291_v17, %v4916_v51 }
 0x2bc   : > { %v1293_v29 = vpop.xlane.xlu0 %1292 }
 0x2bd   : > { %v2040_v32 = vrot.slane %v1293_v29, %v4920_v1  ;;  %v1295_v47 = vpop.xlane.xlu1 %1294  ;;  %2340 = vbcast.lane.b32.xlu1 %v5555_v40, 264  ;;  %2336 = vbcast.lane.b32.xlu0 %v5555_v40, 256 }
 0x2be   : > { %v2045_v5 = vrot.slane %v1295_v47, %v4925_v11 }
 0x2bf   : > { %v2041_v58 = vsel %vm1459_vm11, %v2040_v32, %v2036_v54  ;;  %v2011_v54 = vrot.slane %v5541_v41, %v5019_v0 }
 0x2c0   : > { %v1297_v43 = vpop.xlane.xlu0 %1296  ;;  %v2046_v27 = vsel %vm1466_vm12, %v2045_v5, %v2041_v58  ;;  %v2016_v58 = vrot.slane %v5543_v21, %v5025_v6 }
 0x2c1   : > { %v2050_v8 = vrot.slane %v1297_v43, %v4931_v39  ;;  %v1299_v22 = vpop.xlane.xlu1 %1298  ;;  %2348 = vbcast.lane.b32.xlu1 %v5555_v40, 280  ;;  %2344 = vbcast.lane.b32.xlu0 %v5555_v40, 272  ;;  %v2012_v41 = vsel %vm6887_vm2, %v2011_v54, %v2007_v45 }
 0x2c2   : > { %v2055_v19 = vrot.slane %v1299_v22, %v4937_v35 }
 0x2c3   : > { %v2051_v23 = vsel %vm1473_vm15, %v2050_v8, %v2046_v27 }
 0x2c4   : > { %v1301_v10 = vpop.xlane.xlu0 %1300  ;;  %v2056_v59 = vsel %vm1480_vm0, %v2055_v19, %v2051_v23  ;;  %v2031_v23 = vrot.slane %v5550_v7, %v6870_v31 }
 0x2c5   : > { %v2060_v42 = vrot.slane %v1301_v10, %v4953_v52  ;;  %v1303_v55 = vpop.xlane.xlu1 %1302  ;;  %2356 = vbcast.lane.b32.xlu1 %v5555_v40, 296  ;;  %2352 = vbcast.lane.b32.xlu0 %v5555_v40, 288 }
 0x2c6   : > { %v2065_v48 = vrot.slane %v1303_v55, %v4962_v30 }
 0x2c7   : > { %v2061_v37 = vsel %vm1487_vm3, %v2060_v42, %v2056_v59 }
 0x2c8   : > { %v1305_v17 = vpop.xlane.xlu0 %1304  ;;  %v2066_v2 = vsel %vm1494_vm4, %v2065_v48, %v2061_v37  ;;  %v6891_v37 = vsub.s32 4, %v6808_v24 }
 0x2c9   : > { %v2070_v14 = vrot.slane %v1305_v17, %v4977_v44  ;;  %v1307_v49 = vpop.xlane.xlu1 %1306  ;;  %2364 = vbcast.lane.b32.xlu1 %v5555_v40, 312  ;;  %2360 = vbcast.lane.b32.xlu0 %v5555_v40, 304  ;;  %v267_v17 = vld [vmem:[#allocation2] sm:$0xff] }
 0x2ca   : > { %v2075_v63 = vrot.slane %v1307_v49, %v4983_v38  ;;  %v2401_v57 = vrot.slane %v5295_v46, %v6891_v37 }
 0x2cb   : > { %v2071_v29 = vsel %vm1501_vm7, %v2070_v14, %v2066_v2 }
 0x2cc   : > { %v1309_v32 = vpop.xlane.xlu0 %1308  ;;  %v2076_v9 = vsel %vm6885_vm9, %v2075_v63, %v2071_v29  ;;  %vm6888_vm9 = vmmov %vm6886_vm10  ;;  %vm6889_vm10 = vcmask 851712  }
 0x2cd   : > { %v2080_v47 = vrot.slane %v1309_v32, %v4998_v50  ;;  %v1311_v5 = vpop.xlane.xlu1 %1310  ;;  %2372 = vbcast.lane.b32.xlu1 %v5555_v40, 328  ;;  %2368 = vbcast.lane.b32.xlu0 %v5555_v40, 320  ;;  %v2017_v21 = vsel %vm6889_vm10, %v2016_v58, %v2012_v41 }
 0x2ce   : > { %v2085_v25 = vrot.slane %v1311_v5, %v5004_v56  ;;  %v2022_v18 = vsel %vm1543_vm1, %v2021_v3, %v2017_v21  ;;  %v6892_v3 = vsub.s32 5, %v6808_v24 }
 0x2cf   : > { %v2081_v53 = vsel %vm6884_vm8, %v2080_v47, %v2076_v9  ;;  %vm6890_vm8 = vmmov %vm6889_vm10  ;;  %v2027_v12 = vsel %vm1550_vm14, %v2026_v16, %v2022_v18  ;;  %vm6741_vm10 = vcmask 1047559  }
 0x2d0   : > { %v1313_v43 = vpop.xlane.xlu0 %1312  ;;  %v2086_v27 = vsel %vm6888_vm9, %v2085_v25, %v2081_v53  ;;  %vm6742_vm9 = vcmask 1046534   ;;  %v2032_v48 = vsel %vm1557_vm5, %v2031_v23, %v2027_v12 }
 0x2d1   : > { %v2090_v8 = vrot.slane %v1313_v43, %v5019_v0  ;;  %v1315_v22 = vpop.xlane.xlu1 %1314  ;;  %2380 = vbcast.lane.b32.xlu1 %v5555_v40, 344  ;;  %2376 = vbcast.lane.b32.xlu0 %v5555_v40, 336  ;;  %v2123_v14 = vsel %vm6742_vm9, %v2032_v48, %v5533_v26  ;;  %v2468_v43 = vrot.slane %v5295_v46, %v6892_v3  ;;  %v6893_v48 = vsub.s32 6, %v6808_v24 }
 0x2d2   : > { %v2095_v19 = vrot.slane %v1315_v22, %v5025_v6  ;;  %v6894_v0 = vsub.s32 7, %v6808_v24 }
 0x2d3   : > { %v2091_v4 = vsel %vm6887_vm2, %v2090_v8, %v2086_v27 }
 0x2d4   : > { %v1317_v60 = vpop.xlane.xlu0 %1316  ;;  %v2096_v42 = vsel %vm6890_vm8, %v2095_v19, %v2091_v4  ;;  %v2602_v56 = vrot.slane %v5295_v46, %v6894_v0 }
 0x2d5   : > { %v2100_v34 = vrot.slane %v1317_v60, %v5040_v13  ;;  %2388 = vbcast.lane.b32.xlu1 %v5555_v40, 360  ;;  %v1319_v10 = vpop.xlane.xlu1 %1318  ;;  %2384 = vbcast.lane.b32.xlu0 %v5555_v40, 352 }
 0x2d6   : > { %v2105_v55 = vrot.slane %v1319_v10, %v6868_v15 }
 0x2d7   : > { %v2101_v59 = vsel %vm1543_vm1, %v2100_v34, %v2096_v42 }
 0x2d8   : > { %v1321_v7 = vpop.xlane.xlu0 %1320  ;;  %v2106_v61 = vsel %vm1550_vm14, %v2105_v55, %v2101_v59 }
 0x2d9   : > { %v2110_v36 = vrot.slane %v1321_v7, %v6870_v31  ;;  %2396 = vbcast.lane.b32.xlu1 %v5555_v40, 376  ;;  %v5639_v62 = vpop.permute.xlu1 %2135  ;;  %2392 = vbcast.lane.b32.xlu0 %v5555_v40, 368  ;;  %v2535_v7 = vrot.slane %v5295_v46, %v6893_v48 }
 0x2db   : > { %v2111_v49 = vsel %vm1557_vm5, %v2110_v36, %v2106_v61 }
 0x2dc   : > { %v2125_v2 = vsel %vm6741_vm10, %v2111_v49, %v2123_v14  ;;  %v5650_v63 = vpop.permute.xlu0 %2139 }
 0x2dd   : > { %v2127_v33 = vadd.f32 %v2125_v2, %v267_v17  ;;  %2407 = vbcast.lane.b32.xlu1 %v2401_v57, 264  ;;  %v5652_v20 = vpop.permute.xlu1 %2143  ;;  %2403 = vbcast.lane.b32.xlu0 %v2401_v57, 256 }
 0x2df   : > { %2128 = vst [vmem:[#allocation2] sm:$0xff] %v2127_v33 }
 0x2e0   : > { %v5654_v40 = vpop.permute.xlu0 %2151 }
 0x2e1   : > { %2415 = vbcast.lane.b32.xlu1 %v2401_v57, 280  ;;  %v5656_v29 = vpop.permute.xlu1 %2147  ;;  %2411 = vbcast.lane.b32.xlu0 %v2401_v57, 272 }
 0x2e4   : > { %v5658_v28 = vpop.permute.xlu0 %2159 }
 0x2e5   : > { %2423 = vbcast.lane.b32.xlu1 %v2401_v57, 296  ;;  %v5660_v26 = vpop.permute.xlu1 %2155  ;;  %2419 = vbcast.lane.b32.xlu0 %v2401_v57, 288 }
 0x2e8   : > { %v5662_v54 = vpop.permute.xlu0 %2167 }
 0x2e9   : > { %2431 = vbcast.lane.b32.xlu1 %v2401_v57, 312  ;;  %v5664_v32 = vpop.permute.xlu1 %2163  ;;  %2427 = vbcast.lane.b32.xlu0 %v2401_v57, 304 }
 0x2ec   : > { %v5666_v47 = vpop.permute.xlu0 %2175 }
 0x2ed   : > { %2439 = vbcast.lane.b32.xlu1 %v2401_v57, 328  ;;  %v5668_v5 = vpop.permute.xlu1 %2171  ;;  %2435 = vbcast.lane.b32.xlu0 %v2401_v57, 320 }
 0x2f0   : > { %v5670_v9 = vpop.permute.xlu0 %2183 }
 0x2f1   : > { %2447 = vbcast.lane.b32.xlu1 %v2401_v57, 344  ;;  %v5672_v25 = vpop.permute.xlu1 %2179  ;;  %2443 = vbcast.lane.b32.xlu0 %v2401_v57, 336 }
 0x2f4   : > { %v5674_v45 = vpop.permute.xlu0 %2191 }
 0x2f5   : > { %2455 = vbcast.lane.b32.xlu1 %v2401_v57, 360  ;;  %v5676_v58 = vpop.permute.xlu1 %2187  ;;  %2451 = vbcast.lane.b32.xlu0 %v2401_v57, 352 }
 0x2f8   : > { %v5678_v53 = vpop.permute.xlu0 %2202 }
 0x2f9   : > { %2463 = vbcast.lane.b32.xlu1 %v2401_v57, 376  ;;  %v5680_v41 = vpop.permute.xlu1 %2195  ;;  %2459 = vbcast.lane.b32.xlu0 %v2401_v57, 368 }
 0x2fc   : > { %v5685_v8 = vpop.permute.xlu0 %2210 }
 0x2fd   : > { %2474 = vbcast.lane.b32.xlu1 %v2468_v43, 264  ;;  %v5687_v22 = vpop.permute.xlu1 %2206  ;;  %2470 = vbcast.lane.b32.xlu0 %v2468_v43, 256 }
 0x300   : > { %v5689_v27 = vpop.permute.xlu0 %2218 }
 0x301   : > { %2482 = vbcast.lane.b32.xlu1 %v2468_v43, 280  ;;  %v5691_v19 = vpop.permute.xlu1 %2214  ;;  %2478 = vbcast.lane.b32.xlu0 %v2468_v43, 272 }
 0x304   : > { %v5693_v21 = vpop.permute.xlu0 %2226 }
 0x305   : > { %2490 = vbcast.lane.b32.xlu1 %v2468_v43, 296  ;;  %v5695_v16 = vpop.permute.xlu1 %2222  ;;  %2486 = vbcast.lane.b32.xlu0 %v2468_v43, 288 }
 0x308   : > { %v5697_v4 = vpop.permute.xlu0 %2234 }
 0x309   : > { %2498 = vbcast.lane.b32.xlu1 %v2468_v43, 312  ;;  %v5699_v18 = vpop.permute.xlu1 %2230  ;;  %2494 = vbcast.lane.b32.xlu0 %v2468_v43, 304 }
 0x30c   : > { %v5701_v23 = vpop.permute.xlu0 %2242 }
 0x30d   : > { %2506 = vbcast.lane.b32.xlu1 %v2468_v43, 328  ;;  %v5703_v60 = vpop.permute.xlu1 %2238  ;;  %2502 = vbcast.lane.b32.xlu0 %v2468_v43, 320 }
 0x310   : > { %v5705_v34 = vpop.permute.xlu0 %2250 }
 0x311   : > { %2514 = vbcast.lane.b32.xlu1 %v2468_v43, 344  ;;  %v5707_v10 = vpop.permute.xlu1 %2246  ;;  %2510 = vbcast.lane.b32.xlu0 %v2468_v43, 336 }
 0x314   : > { %v5709_v42 = vpop.permute.xlu0 %2258 }
 0x315   : > { %2522 = vbcast.lane.b32.xlu1 %v2468_v43, 360  ;;  %v5711_v55 = vpop.permute.xlu1 %2254  ;;  %2518 = vbcast.lane.b32.xlu0 %v2468_v43, 352 }
 0x318   : > { %v5713_v12 = vpop.permute.xlu0 %2269 }
 0x319   : > { %2530 = vbcast.lane.b32.xlu1 %v2468_v43, 376  ;;  %v5715_v59 = vpop.permute.xlu1 %2262  ;;  %2526 = vbcast.lane.b32.xlu0 %v2468_v43, 368 }
 0x31c   : > { %v5720_v36 = vpop.permute.xlu0 %2277 }
 0x31d   : > { %2541 = vbcast.lane.b32.xlu1 %v2535_v7, 264  ;;  %v5722_v37 = vpop.permute.xlu1 %2273  ;;  %2537 = vbcast.lane.b32.xlu0 %v2535_v7, 256 }
 0x320   : > { %v5724_v57 = vpop.permute.xlu0 %2285 }
 0x321   : > { %2549 = vbcast.lane.b32.xlu1 %v2535_v7, 280  ;;  %v5726_v61 = vpop.permute.xlu1 %2281  ;;  %2545 = vbcast.lane.b32.xlu0 %v2535_v7, 272 }
 0x324   : > { %v5728_v17 = vpop.permute.xlu0 %2293 }
 0x325   : > { %2557 = vbcast.lane.b32.xlu1 %v2535_v7, 296  ;;  %v5730_v14 = vpop.permute.xlu1 %2289  ;;  %2553 = vbcast.lane.b32.xlu0 %v2535_v7, 288 }
 0x328   : > { %v5732_v49 = vpop.permute.xlu0 %2301 }
 0x329   : > { %2565 = vbcast.lane.b32.xlu1 %v2535_v7, 312  ;;  %v5734_v2 = vpop.permute.xlu1 %2297  ;;  %2561 = vbcast.lane.b32.xlu0 %v2535_v7, 304 }
 0x32c   : > { %v5736_v33 = vpop.permute.xlu0 %2309 }
 0x32d   : > { %2573 = vbcast.lane.b32.xlu1 %v2535_v7, 328  ;;  %v5738_v3 = vpop.permute.xlu1 %2305  ;;  %2569 = vbcast.lane.b32.xlu0 %v2535_v7, 320 }
 0x330   : > { %v5740_v43 = vpop.permute.xlu0 %2317 }
 0x331   : > { %2581 = vbcast.lane.b32.xlu1 %v2535_v7, 344  ;;  %v5742_v48 = vpop.permute.xlu1 %2313  ;;  %2577 = vbcast.lane.b32.xlu0 %v2535_v7, 336 }
 0x334   : > { %v5744_v31 = vpop.permute.xlu0 %2325 }
 0x335   : > { %2589 = vbcast.lane.b32.xlu1 %v2535_v7, 360  ;;  %v5746_v15 = vpop.permute.xlu1 %2321  ;;  %2585 = vbcast.lane.b32.xlu0 %v2535_v7, 352 }
 0x338   : > { %v5748_v13 = vpop.permute.xlu0 %2336 }
 0x339   : > { %2597 = vbcast.lane.b32.xlu1 %v2535_v7, 376  ;;  %v5750_v6 = vpop.permute.xlu1 %2329  ;;  %2593 = vbcast.lane.b32.xlu0 %v2535_v7, 368 }
 0x33c   : > { %v5755_v50 = vpop.permute.xlu0 %2344 }
 0x33d   : > { %2608 = vbcast.lane.b32.xlu1 %v2602_v56, 264  ;;  %v5757_v38 = vpop.permute.xlu1 %2340  ;;  %2604 = vbcast.lane.b32.xlu0 %v2602_v56, 256 }
 0x340   : > { %v5759_v44 = vpop.permute.xlu0 %2352 }
 0x341   : > { %2616 = vbcast.lane.b32.xlu1 %v2602_v56, 280  ;;  %v5761_v30 = vpop.permute.xlu1 %2348  ;;  %2612 = vbcast.lane.b32.xlu0 %v2602_v56, 272 }
 0x344   : > { %v5763_v52 = vpop.permute.xlu0 %2360 }
 0x345   : > { %6895 = vst [vmem:[#allocation18_spill] sm:$0xff] %v5763_v52  ;;  %2624 = vbcast.lane.b32.xlu1 %v2602_v56, 296  ;;  %v5765_v7 = vpop.permute.xlu1 %2356  ;;  %2620 = vbcast.lane.b32.xlu0 %v2602_v56, 288 }
 0x346   : > { %6896 = vst [vmem:[#allocation19_spill] sm:$0xff] %v5765_v7 }
 0x348   : > { %v5767_v24 = vpop.permute.xlu0 %2368 }
 0x349   : > { %6897 = vst [vmem:[#allocation20_spill] sm:$0xff] %v5767_v24  ;;  %2632 = vbcast.lane.b32.xlu1 %v2602_v56, 312  ;;  %v5769_v0 = vpop.permute.xlu1 %2364  ;;  %2628 = vbcast.lane.b32.xlu0 %v2602_v56, 304 }
 0x34a   : > { %6898 = vst [vmem:[#allocation21_spill] sm:$0xff] %v5769_v0 }
 0x34c   : > { %v5771_v46 = vpop.permute.xlu0 %2376 }
 0x34d   : > { %6899 = vst [vmem:[#allocation13_spill] sm:$0xff] %v5771_v46  ;;  %2640 = vbcast.lane.b32.xlu1 %v2602_v56, 328  ;;  %v5773_v35 = vpop.permute.xlu1 %2372  ;;  %2636 = vbcast.lane.b32.xlu0 %v2602_v56, 320 }
 0x34e   : > { %6900 = vst [vmem:[#allocation16_spill] sm:$0xff] %v5773_v35 }
 0x350   : > { %v5775_v39 = vpop.permute.xlu0 %2384 }
 0x351   : > { %6901 = vst [vmem:[#allocation11_spill] sm:$0xff] %v5775_v39  ;;  %2648 = vbcast.lane.b32.xlu1 %v2602_v56, 344  ;;  %v5777_v11 = vpop.permute.xlu1 %2380  ;;  %2644 = vbcast.lane.b32.xlu0 %v2602_v56, 336 }
 0x352   : > { %6902 = vst [vmem:[#allocation12_spill] sm:$0xff] %v5777_v11 }
 0x354   : > { %v5779_v1 = vpop.permute.xlu0 %2392 }
 0x355   : > { %6903 = vst [vmem:[#allocation14_spill] sm:$0xff] %v5779_v1  ;;  %2656 = vbcast.lane.b32.xlu1 %v2602_v56, 360  ;;  %v5781_v51 = vpop.permute.xlu1 %2388  ;;  %2652 = vbcast.lane.b32.xlu0 %v2602_v56, 352 }
 0x356   : > { %6904 = vst [vmem:[#allocation15_spill] sm:$0xff] %v5781_v51 }
 0x358   : > { %v5783_v24 = vpop.permute.xlu0 %2403 }
 0x359   : > { %6905 = vst [vmem:[#allocation17_spill] sm:$0xff] %v5783_v24  ;;  %2664 = vbcast.lane.b32.xlu1 %v2602_v56, 376  ;;  %v5785_v46 = vpop.permute.xlu1 %2396  ;;  %2660 = vbcast.lane.b32.xlu0 %v2602_v56, 368 }
 0x35a   : > { %6906 = vst [vmem:[#allocation38_spill] sm:$0xff] %v5785_v46 }
 0x35c   : > { %v5787_v35 = vpop.permute.xlu0 %2411 }
 0x35d   : > { %6907 = vst [vmem:[#allocation39_spill] sm:$0xff] %v5787_v35  ;;  %v5789_v39 = vpop.permute.xlu1 %2407 }
 0x35e   : > { %6908 = vst [vmem:[#allocation40_spill] sm:$0xff] %v5789_v39  ;;  %v6915_v39 = vld [vmem:[#allocation33_spill] sm:$0xff] }
 0x35f   : > { %vm2666_vm2 = vcmp.eq.s32.totalorder %v5639_v62, %v6915_v39  ;;  %vm2668_vm8 = vcmp.eq.s32.totalorder %v5652_v20, %v6915_v39  ;;  %vm2667_vm10 = vcmp.eq.s32.totalorder %v5650_v63, %v6915_v39  ;;  %vm2669_vm9 = vcmp.eq.s32.totalorder %v5656_v29, %v6915_v39 }
 0x360   : > { %v5791_v0 = vpop.permute.xlu0 %2419  ;;  %vm2671_vm13 = vcmp.eq.s32.totalorder %v5660_v26, %v6915_v39 }
 0x361   : > { %6909 = vst [vmem:[#allocation41_spill] sm:$0xff] %v5791_v0  ;;  %v5793_v11 = vpop.permute.xlu1 %2415 }
 0x364   : > { %v5795_v1 = vpop.permute.xlu0 %2427 }
 0x365   : > { %6910 = vst [vmem:[#allocation42_spill] sm:$0xff] %v5795_v1  ;;  %v5797_v52 = vpop.permute.xlu1 %2423 }
 0x366   : > { %6911 = vst [vmem:[#allocation43_spill] sm:$0xff] %v5797_v52  ;;  %v5818_v52 = vld [vmem:[%s4385_s8] ss:$0 sm:$0xff] }
 0x367   : > { %v2796_v62 = vsel %vm2668_vm8, %v5818_v52, 0.0  ;;  %v2797_v63 = vsel %vm2669_vm9, %v5818_v52, 0.0  ;;  %vm2672_vm8 = vcmp.eq.s32.totalorder %v5658_v28, %v6915_v39  ;;  %vm2674_vm9 = vcmp.eq.s32.totalorder %v5662_v54, %v6915_v39 }
 0x368   : > { %v5799_v51 = vpop.permute.xlu0 %2435 }
 0x369   : > { %6912 = vst [vmem:[#allocation44_spill] sm:$0xff] %v5799_v51  ;;  %v5801_v24 = vpop.permute.xlu1 %2431  ;;  %v2794_v51 = vsel %vm2666_vm2, %v5818_v52, 0.0  ;;  %vm2670_vm2 = vcmp.eq.s32.totalorder %v5654_v40, %v6915_v39 }
 0x36c   : > { %v5803_v7 = vpop.permute.xlu0 %2443 }
 0x36d   : > { %6913 = vst [vmem:[#allocation45_spill] sm:$0xff] %v5803_v7  ;;  %v5805_v56 = vpop.permute.xlu1 %2439 }
 0x370   : > { %v5807_v46 = vpop.permute.xlu0 %2451 }
 0x371   : > { %6914 = vst [vmem:[#allocation46_spill] sm:$0xff] %v5807_v46  ;;  %v5809_v35 = vpop.permute.xlu1 %2447 }
 0x374   : > { %v5813_v0 = vpop.permute.xlu0 %2459 }
 0x375   : > { %6916 = vst [vmem:[#allocation33_spill] sm:$0xff] %v5813_v0  ;;  %v5815_v1 = vpop.permute.xlu1 %2455  ;;  %v2795_v0 = vsel %vm2667_vm10, %v5818_v52, 0.0  ;;  %vm2673_vm10 = vcmp.eq.s32.totalorder %v5664_v32, %v6915_v39 }
 0x376   : > { %v2801_v26 = vsel %vm2673_vm10, %v5818_v52, 0.0  ;;  %vm2678_vm10 = vcmp.eq.s32.totalorder %v5670_v9, %v6915_v39 }
 0x378   : > { %2922 = vadd.xlane.f32.xlu0 %v2794_v51  ;;  %v5823_v7 = vpop.permute.xlu0 %2470 }
 0x379   : > { %6917 = vst [vmem:[#allocation47_spill] sm:$0xff] %v5823_v7  ;;  %v5827_v46 = vpop.permute.xlu1 %2463  ;;  %v2798_v7 = vsel %vm2670_vm2, %v5818_v52, 0.0  ;;  %vm2675_vm2 = vcmp.eq.s32.totalorder %v5668_v5, %v6915_v39 }
 0x37c   : > { %2926 = vadd.xlane.f32.xlu0 %v2796_v62  ;;  %v5835_v20 = vpop.permute.xlu0 %2478  ;;  %v2799_v62 = vsel %vm2671_vm13, %v5818_v52, 0.0  ;;  %vm2676_vm13 = vcmp.eq.s32.totalorder %v5666_v47, %v6915_v39 }
 0x37d   : > { %v5837_v51 = vpop.permute.xlu1 %2474  ;;  %2924 = vadd.xlane.f32.xlu1 %v2795_v0  ;;  %v2800_v0 = vsel %vm2672_vm8, %v5818_v52, 0.0  ;;  %vm2677_vm8 = vcmp.eq.s32.totalorder %v5672_v25, %v6915_v39  ;;  %v2804_v54 = vsel %vm2676_vm13, %v5818_v52, 0.0  ;;  %vm2681_vm13 = vcmp.eq.s32.totalorder %v5680_v41, %v6915_v39 }
 0x37e   : > { %v2805_v47 = vsel %vm2677_vm8, %v5818_v52, 0.0  ;;  %vm2682_vm8 = vcmp.eq.s32.totalorder %v5678_v53, %v6915_v39 }
 0x380   : > { %2928 = vadd.xlane.f32.xlu0 %v2797_v63  ;;  %v5847_v40 = vpop.permute.xlu0 %2486  ;;  %v2803_v63 = vsel %vm2675_vm2, %v5818_v52, 0.0  ;;  %vm2680_vm2 = vcmp.eq.s32.totalorder %v5674_v45, %v6915_v39  ;;  %v2810_v45 = vsel %vm2682_vm8, %v5818_v52, 0.0  ;;  %vm2687_vm8 = vcmp.eq.s32.totalorder %v5695_v16, %v6915_v39 }
 0x381   : > { %2930 = vadd.xlane.f32.xlu1 %v2798_v7  ;;  %v5845_v29 = vpop.permute.xlu1 %2482  ;;  %v2802_v7 = vsel %vm2674_vm9, %v5818_v52, 0.0  ;;  %vm2679_vm9 = vcmp.eq.s32.totalorder %v5676_v58, %v6915_v39 }
 0x382   : > { %v2807_v25 = vsel %vm2679_vm9, %v5818_v52, 0.0  ;;  %vm2684_vm9 = vcmp.eq.s32.totalorder %v5685_v8, %v6915_v39 }
 0x384   : > { %2932 = vadd.xlane.f32.xlu0 %v2799_v62  ;;  %v5863_v32 = vpop.permute.xlu0 %2494 }
 0x385   : > { %2934 = vadd.xlane.f32.xlu1 %v2800_v0  ;;  %v5858_v28 = vpop.permute.xlu1 %2490  ;;  %v2806_v0 = vsel %vm2678_vm10, %v5818_v52, 0.0  ;;  %vm2683_vm10 = vcmp.eq.s32.totalorder %v5687_v22, %v6915_v39 }
 0x386   : > { %v2811_v53 = vsel %vm2683_vm10, %v5818_v52, 0.0  ;;  %vm2688_vm10 = vcmp.eq.s32.totalorder %v5693_v21, %v6915_v39 }
 0x388   : > { %2936 = vadd.xlane.f32.xlu0 %v2801_v26  ;;  %v5873_v62 = vpop.permute.xlu0 %2502  ;;  %v2808_v26 = vsel %vm2680_vm2, %v5818_v52, 0.0  ;;  %vm2685_vm2 = vcmp.eq.s32.totalorder %v5691_v19, %v6915_v39 }
 0x389   : > { %2938 = vadd.xlane.f32.xlu1 %v2802_v7  ;;  %v5871_v5 = vpop.permute.xlu1 %2498  ;;  %v2809_v7 = vsel %vm2681_vm13, %v5818_v52, 0.0  ;;  %vm2686_vm13 = vcmp.eq.s32.totalorder %v5689_v27, %v6915_v39  ;;  %v2813_v22 = vsel %vm2685_vm2, %v5818_v52, 0.0  ;;  %v2816_v27 = vsel %vm2688_vm10, %v5818_v52, 0.0 }
 0x38a   : > { %vm2690_vm2 = vcmp.eq.s32.totalorder %v5697_v4, %v6915_v39  ;;  %vm2693_vm10 = vcmp.eq.s32.totalorder %v5707_v10, %v6915_v39 }
 0x38c   : > { %2940 = vadd.xlane.f32.xlu0 %v2803_v63  ;;  %v5889_v58 = vpop.permute.xlu0 %2510 }
 0x38d   : > { %2942 = vadd.xlane.f32.xlu1 %v2804_v54  ;;  %v5884_v9 = vpop.permute.xlu1 %2506  ;;  %v2812_v54 = vsel %vm2684_vm9, %v5818_v52, 0.0  ;;  %vm2689_vm9 = vcmp.eq.s32.totalorder %v5699_v18, %v6915_v39 }
 0x38e   : > { %v2817_v21 = vsel %vm2689_vm9, %v5818_v52, 0.0  ;;  %vm2694_vm9 = vcmp.eq.s32.totalorder %v5705_v34, %v6915_v39 }
 0x390   : > { %2944 = vadd.xlane.f32.xlu0 %v2805_v47  ;;  %v5899_v63 = vpop.permute.xlu0 %2518  ;;  %v2814_v47 = vsel %vm2686_vm13, %v5818_v52, 0.0  ;;  %vm2691_vm13 = vcmp.eq.s32.totalorder %v5703_v60, %v6915_v39 }
 0x391   : > { %2946 = vadd.xlane.f32.xlu1 %v2806_v0  ;;  %v5897_v41 = vpop.permute.xlu1 %2514  ;;  %v2815_v0 = vsel %vm2687_vm8, %v5818_v52, 0.0  ;;  %vm2692_vm8 = vcmp.eq.s32.totalorder %v5701_v23, %v6915_v39  ;;  %v2819_v18 = vsel %vm2691_vm13, %v5818_v52, 0.0  ;;  %v2822_v23 = vsel %vm2694_vm9, %v5818_v52, 0.0 }
 0x392   : > { %vm2696_vm13 = vcmp.eq.s32.totalorder %v5709_v42, %v6915_v39  ;;  %vm2699_vm9 = vcmp.eq.s32.totalorder %v5722_v37, %v6915_v39 }
 0x394   : > { %2948 = vadd.xlane.f32.xlu0 %v2807_v25  ;;  %v5915_v19 = vpop.permute.xlu0 %2526 }
 0x395   : > { %2950 = vadd.xlane.f32.xlu1 %v2808_v26  ;;  %v5910_v8 = vpop.permute.xlu1 %2522  ;;  %v2818_v26 = vsel %vm2690_vm2, %v5818_v52, 0.0  ;;  %vm2695_vm2 = vcmp.eq.s32.totalorder %v5711_v55, %v6915_v39 }
 0x396   : > { %v2823_v34 = vsel %vm2695_vm2, %v5818_v52, 0.0  ;;  %vm2700_vm2 = vcmp.eq.s32.totalorder %v5720_v36, %v6915_v39 }
 0x398   : > { %2952 = vadd.xlane.f32.xlu0 %v2809_v7  ;;  %v5925_v25 = vpop.permute.xlu0 %2537  ;;  %v2820_v7 = vsel %vm2692_vm8, %v5818_v52, 0.0  ;;  %vm2697_vm8 = vcmp.eq.s32.totalorder %v5715_v59, %v6915_v39 }
 0x399   : > { %2954 = vadd.xlane.f32.xlu1 %v2810_v45  ;;  %v5923_v16 = vpop.permute.xlu1 %2530  ;;  %v2821_v45 = vsel %vm2693_vm10, %v5818_v52, 0.0  ;;  %vm2698_vm10 = vcmp.eq.s32.totalorder %v5713_v12, %v6915_v39  ;;  %v2825_v55 = vsel %vm2697_vm8, %v5818_v52, 0.0  ;;  %v2828_v12 = vsel %vm2700_vm2, %v5818_v52, 0.0 }
 0x39a   : > { %6918 = vst [vmem:[#allocation48_spill] sm:$0xff] %v5923_v16  ;;  %vm2702_vm8 = vcmp.eq.s32.totalorder %v5724_v57, %v6915_v39  ;;  %vm2705_vm2 = vcmp.eq.s32.totalorder %v5734_v2, %v6915_v39 }
 0x39c   : > { %2956 = vadd.xlane.f32.xlu0 %v2811_v53  ;;  %v5941_v60 = vpop.permute.xlu0 %2545 }
 0x39d   : > { %2958 = vadd.xlane.f32.xlu1 %v2812_v54  ;;  %v5936_v4 = vpop.permute.xlu1 %2541  ;;  %v2824_v54 = vsel %vm2696_vm13, %v5818_v52, 0.0  ;;  %vm2701_vm13 = vcmp.eq.s32.totalorder %v5726_v61, %v6915_v39 }
 0x39e   : > { %v2829_v36 = vsel %vm2701_vm13, %v5818_v52, 0.0  ;;  %vm2706_vm13 = vcmp.eq.s32.totalorder %v5732_v49, %v6915_v39 }
 0x3a0   : > { %2960 = vadd.xlane.f32.xlu0 %v2813_v22  ;;  %v5951_v53 = vpop.permute.xlu0 %2553  ;;  %v2826_v22 = vsel %vm2698_vm10, %v5818_v52, 0.0  ;;  %vm2703_vm10 = vcmp.eq.s32.totalorder %v5730_v14, %v6915_v39 }
 0x3a1   : > { %2962 = vadd.xlane.f32.xlu1 %v2814_v47  ;;  %v5949_v10 = vpop.permute.xlu1 %2549  ;;  %v2827_v47 = vsel %vm2699_vm9, %v5818_v52, 0.0  ;;  %vm2704_vm9 = vcmp.eq.s32.totalorder %v5728_v17, %v6915_v39  ;;  %v2831_v61 = vsel %vm2703_vm10, %v5818_v52, 0.0  ;;  %v2834_v17 = vsel %vm2706_vm13, %v5818_v52, 0.0 }
 0x3a2   : > { %vm2708_vm10 = vcmp.eq.s32.totalorder %v5736_v33, %v6915_v39  ;;  %vm2711_vm13 = vcmp.eq.s32.totalorder %v5746_v15, %v6915_v39 }
 0x3a4   : > { %2964 = vadd.xlane.f32.xlu0 %v2815_v0  ;;  %v5967_v59 = vpop.permute.xlu0 %2561 }
 0x3a5   : > { %2966 = vadd.xlane.f32.xlu1 %v2816_v27  ;;  %v5962_v42 = vpop.permute.xlu1 %2557  ;;  %v2830_v27 = vsel %vm2702_vm8, %v5818_v52, 0.0  ;;  %vm2707_vm8 = vcmp.eq.s32.totalorder %v5738_v3, %v6915_v39 }
 0x3a6   : > { %v2835_v49 = vsel %vm2707_vm8, %v5818_v52, 0.0  ;;  %vm2712_vm8 = vcmp.eq.s32.totalorder %v5744_v31, %v6915_v39 }
 0x3a8   : > { %2968 = vadd.xlane.f32.xlu0 %v2817_v21  ;;  %v5977_v0 = vpop.permute.xlu0 %2569  ;;  %v2832_v21 = vsel %vm2704_vm9, %v5818_v52, 0.0  ;;  %vm2709_vm9 = vcmp.eq.s32.totalorder %v5742_v48, %v6915_v39 }
 0x3a9   : > { %2970 = vadd.xlane.f32.xlu1 %v2818_v26  ;;  %v5975_v37 = vpop.permute.xlu1 %2565  ;;  %v2833_v26 = vsel %vm2705_vm2, %v5818_v52, 0.0  ;;  %vm2710_vm2 = vcmp.eq.s32.totalorder %v5740_v43, %v6915_v39  ;;  %v2837_v3 = vsel %vm2709_vm9, %v5818_v52, 0.0  ;;  %v2840_v43 = vsel %vm2712_vm8, %v5818_v52, 0.0 }
 0x3aa   : > { %vm2714_vm9 = vcmp.eq.s32.totalorder %v5748_v13, %v6915_v39  ;;  %vm2717_vm8 = vcmp.eq.s32.totalorder %v5761_v30, %v6915_v39  ;;  %v6923_v30 = vld [vmem:[#allocation18_spill] sm:$0xff] }
 0x3ac   : > { %2972 = vadd.xlane.f32.xlu0 %v2819_v18  ;;  %v5993_v14 = vpop.permute.xlu0 %2577 }
 0x3ad   : > { %2974 = vadd.xlane.f32.xlu1 %v2820_v7  ;;  %v5988_v57 = vpop.permute.xlu1 %2573  ;;  %v2836_v7 = vsel %vm2708_vm10, %v5818_v52, 0.0  ;;  %vm2713_vm10 = vcmp.eq.s32.totalorder %v5750_v6, %v6915_v39 }
 0x3ae   : > { %v2841_v31 = vsel %vm2713_vm10, %v5818_v52, 0.0  ;;  %vm2718_vm10 = vcmp.eq.s32.totalorder %v5759_v44, %v6915_v39 }
 0x3b0   : > { %2976 = vadd.xlane.f32.xlu0 %v2821_v45  ;;  %v6003_v18 = vpop.permute.xlu0 %2585  ;;  %v2838_v45 = vsel %vm2710_vm2, %v5818_v52, 0.0  ;;  %vm2715_vm2 = vcmp.eq.s32.totalorder %v5757_v38, %v6915_v39 }
 0x3b1   : > { %2978 = vadd.xlane.f32.xlu1 %v2822_v23  ;;  %v6001_v2 = vpop.permute.xlu1 %2581  ;;  %v2839_v23 = vsel %vm2711_vm13, %v5818_v52, 0.0  ;;  %vm2716_vm13 = vcmp.eq.s32.totalorder %v5755_v50, %v6915_v39  ;;  %v2843_v6 = vsel %vm2715_vm2, %v5818_v52, 0.0  ;;  %v6922_v50 = vld [vmem:[#allocation19_spill] sm:$0xff]  ;;  %vm2720_vm2 = vcmp.eq.s32.totalorder %v6923_v30, %v6915_v39  ;;  %v6931_v30 = vld [vmem:[#allocation14_spill] sm:$0xff] }
 0x3b4   : > { %2980 = vadd.xlane.f32.xlu0 %v2823_v34  ;;  %v6019_v48 = vpop.permute.xlu0 %2593 }
 0x3b5   : > { %2982 = vadd.xlane.f32.xlu1 %v2824_v54  ;;  %v6014_v33 = vpop.permute.xlu1 %2589  ;;  %6920 = vst [vmem:[#allocation50_spill] sm:$0xff] %v6019_v48  ;;  %v2842_v54 = vsel %vm2714_vm9, %v5818_v52, 0.0  ;;  %vm2719_vm9 = vcmp.eq.s32.totalorder %v6922_v50, %v6915_v39  ;;  %v6930_v50 = vld [vmem:[#allocation15_spill] sm:$0xff]  ;;  %v6950_v48 = vld [vmem:[#allocation26_spill] sm:$0xff] }
 0x3b6   : > { %6919 = vst [vmem:[#allocation49_spill] sm:$0xff] %v6014_v33  ;;  %v2847_v44 = vsel %vm2719_vm9, %v5818_v52, 0.0 }
 0x3b8   : > { %2984 = vadd.xlane.f32.xlu0 %v2825_v55  ;;  %v6029_v34 = vpop.permute.xlu0 %2604  ;;  %v2844_v55 = vsel %vm2716_vm13, %v5818_v52, 0.0 }
 0x3b9   : > { %2986 = vadd.xlane.f32.xlu1 %v2826_v22  ;;  %v6027_v15 = vpop.permute.xlu1 %2597  ;;  %v2845_v22 = vsel %vm2717_vm8, %v5818_v52, 0.0 }
 0x3ba   : > { %6921 = vst [vmem:[#allocation51_spill] sm:$0xff] %v6027_v15 }
 0x3bc   : > { %2988 = vadd.xlane.f32.xlu0 %v2827_v47  ;;  %v6045_v38 = vpop.permute.xlu0 %2612  ;;  %v2846_v47 = vsel %vm2718_vm10, %v5818_v52, 0.0 }
 0x3bd   : > { %2990 = vadd.xlane.f32.xlu1 %v2828_v12  ;;  %v6040_v13 = vpop.permute.xlu1 %2608 }
 0x3c0   : > { %2992 = vadd.xlane.f32.xlu0 %v2829_v36  ;;  %v6055_v36 = vpop.permute.xlu0 %2620 }
 0x3c1   : > { %2994 = vadd.xlane.f32.xlu1 %v2830_v27  ;;  %v6053_v12 = vpop.permute.xlu1 %2616  ;;  %v6924_v27 = vld [vmem:[#allocation21_spill] sm:$0xff] }
 0x3c2   : > { %vm2721_vm13 = vcmp.eq.s32.totalorder %v6924_v27, %v6915_v39  ;;  %v6932_v27 = vld [vmem:[#allocation38_spill] sm:$0xff] }
 0x3c4   : > { %2996 = vadd.xlane.f32.xlu0 %v2831_v61  ;;  %v2848_v61 = vsel %vm2720_vm2, %v5818_v52, 0.0 }
 0x3c5   : > { %2998 = vadd.xlane.f32.xlu1 %v2832_v21  ;;  %v6925_v21 = vld [vmem:[#allocation20_spill] sm:$0xff] }
 0x3c6   : > { %vm2722_vm8 = vcmp.eq.s32.totalorder %v6925_v21, %v6915_v39 }
 0x3c8   : > { %3000 = vadd.xlane.f32.xlu0 %v2833_v26  ;;  %v2849_v26 = vsel %vm2721_vm13, %v5818_v52, 0.0 }
 0x3c9   : > { %3002 = vadd.xlane.f32.xlu1 %v2834_v17  ;;  %v6926_v17 = vld [vmem:[#allocation16_spill] sm:$0xff] }
 0x3ca   : > { %vm2723_vm10 = vcmp.eq.s32.totalorder %v6926_v17, %v6915_v39 }
 0x3cc   : > { %3004 = vadd.xlane.f32.xlu0 %v2835_v49  ;;  %v6066_v49 = vpop.permute.xlu1 %2624 }
 0x3cd   : > { %3006 = vadd.xlane.f32.xlu1 %v2836_v7  ;;  %v2850_v7 = vsel %vm2722_vm8, %v5818_v52, 0.0  ;;  %vm2727_vm8 = vcmp.eq.s32.totalorder %v6930_v50, %v6915_v39 }
 0x3d0   : > { %3008 = vadd.xlane.f32.xlu0 %v2837_v3  ;;  %v6927_v3 = vld [vmem:[#allocation13_spill] sm:$0xff] }
 0x3d1   : > { %3010 = vadd.xlane.f32.xlu1 %v2838_v45  ;;  %vm2724_vm9 = vcmp.eq.s32.totalorder %v6927_v3, %v6915_v39  ;;  %v6071_v45 = vpop.permute.xlu0 %2628  ;;  %v6934_v3 = vld [vmem:[#allocation40_spill] sm:$0xff] }
 0x3d4   : > { %3012 = vadd.xlane.f32.xlu0 %v2839_v23  ;;  %v2851_v23 = vsel %vm2723_vm10, %v5818_v52, 0.0  ;;  %vm2728_vm10 = vcmp.eq.s32.totalorder %v6931_v30, %v6915_v39 }
 0x3d5   : > { %3014 = vadd.xlane.f32.xlu1 %v2840_v43  ;;  %v6928_v43 = vld [vmem:[#allocation12_spill] sm:$0xff]  ;;  %v2856_v21 = vsel %vm2728_vm10, %v5818_v52, 0.0  ;;  %vm2733_vm10 = vcmp.eq.s32.totalorder %v5793_v11, %v6915_v39 }
 0x3d6   : > { %vm2725_vm2 = vcmp.eq.s32.totalorder %v6928_v43, %v6915_v39  ;;  %v6935_v43 = vld [vmem:[#allocation39_spill] sm:$0xff]  ;;  %v2861_v30 = vsel %vm2733_vm10, %v5818_v52, 0.0 }
 0x3d8   : > { %3016 = vadd.xlane.f32.xlu0 %v2841_v31  ;;  %v2852_v31 = vsel %vm2724_vm9, %v5818_v52, 0.0  ;;  %vm2729_vm9 = vcmp.eq.s32.totalorder %v6932_v27, %v6915_v39 }
 0x3d9   : > { %3018 = vadd.xlane.f32.xlu1 %v2842_v54  ;;  %v6929_v54 = vld [vmem:[#allocation11_spill] sm:$0xff] }
 0x3da   : > { %vm2726_vm13 = vcmp.eq.s32.totalorder %v6929_v54, %v6915_v39 }
 0x3dc   : > { %3020 = vadd.xlane.f32.xlu0 %v2843_v6  ;;  %v6079_v6 = vpop.permute.xlu1 %2632 }
 0x3dd   : > { %3022 = vadd.xlane.f32.xlu1 %v2844_v55  ;;  %v6081_v55 = vpop.permute.xlu0 %2636 }
 0x3e0   : > { %3024 = vadd.xlane.f32.xlu0 %v2845_v22  ;;  %v2853_v22 = vsel %vm2725_vm2, %v5818_v52, 0.0 }
 0x3e1   : > { %3026 = vadd.xlane.f32.xlu1 %v2846_v47  ;;  %v2854_v47 = vsel %vm2726_vm13, %v5818_v52, 0.0  ;;  %v6097_v17 = vpop.permute.xlu0 %2644  ;;  %vm2731_vm13 = vcmp.eq.s32.totalorder %v6934_v3, %v6915_v39 }
 0x3e4   : > { %3028 = vadd.xlane.f32.xlu0 %v2847_v44  ;;  %v2855_v44 = vsel %vm2727_vm8, %v5818_v52, 0.0  ;;  %vm2732_vm8 = vcmp.eq.s32.totalorder %v6935_v43, %v6915_v39 }
 0x3e5   : > { %3030 = vadd.xlane.f32.xlu1 %v2848_v61  ;;  %v6092_v61 = vpop.permute.xlu1 %2640  ;;  %v6107_v54 = vpop.permute.xlu0 %2652  ;;  %v2860_v50 = vsel %vm2732_vm8, %v5818_v52, 0.0  ;;  %vm2737_vm8 = vcmp.eq.s32.totalorder %v5801_v24, %v6915_v39  ;;  %v6944_v24 = vld [vmem:[#allocation45_spill] sm:$0xff] }
 0x3e6   : > { %6936 = vst [vmem:[#allocation19_spill] sm:$0xff] %v6107_v54 }
 0x3e8   : > { %3032 = vadd.xlane.f32.xlu0 %v2849_v26  ;;  %v6933_v26 = vld [vmem:[#allocation17_spill] sm:$0xff] }
 0x3e9   : > { %3034 = vadd.xlane.f32.xlu1 %v2850_v7  ;;  %vm2730_vm2 = vcmp.eq.s32.totalorder %v6933_v26, %v6915_v39  ;;  %v2857_v7 = vsel %vm2729_vm9, %v5818_v52, 0.0  ;;  %v6940_v26 = vld [vmem:[#allocation42_spill] sm:$0xff]  ;;  %v6123_v11 = vpop.permute.xlu0 %2660 }
 0x3ea   : > { %6941 = vst [vmem:[#allocation21_spill] sm:$0xff] %v6123_v11  ;;  %v6948_v11 = vld [vmem:[#allocation46_spill] sm:$0xff] }
 0x3ec   : > { %3036 = vadd.xlane.f32.xlu0 %v2851_v23  ;;  %v2858_v23 = vsel %vm2730_vm2, %v5818_v52, 0.0 }
 0x3ed   : > { %3038 = vadd.xlane.f32.xlu1 %v2852_v31  ;;  %v6105_v31 = vpop.permute.xlu1 %2648 }
 0x3f0   : > { %3040 = vadd.xlane.f32.xlu0 %v2853_v22  ;;  %v2859_v22 = vsel %vm2731_vm13, %v5818_v52, 0.0  ;;  %vm2736_vm13 = vcmp.eq.s32.totalorder %v6940_v26, %v6915_v39 }
 0x3f1   : > { %3042 = vadd.xlane.f32.xlu1 %v2854_v47  ;;  %v6937_v47 = vld [vmem:[#allocation41_spill] sm:$0xff]  ;;  %v6118_v27 = vpop.permute.xlu1 %2656  ;;  %v2864_v3 = vsel %vm2736_vm13, %v5818_v52, 0.0  ;;  %vm2741_vm13 = vcmp.eq.s32.totalorder %v5809_v35, %v6915_v39 }
 0x3f2   : > { %vm2734_vm9 = vcmp.eq.s32.totalorder %v6937_v47, %v6915_v39  ;;  %6939 = vst [vmem:[#allocation18_spill] sm:$0xff] %v6118_v27  ;;  %v2869_v35 = vsel %vm2741_vm13, %v5818_v52, 0.0 }
 0x3f4   : > { %3044 = vadd.xlane.f32.xlu0 %v2855_v44  ;;  %v6938_v44 = vld [vmem:[#allocation43_spill] sm:$0xff] }
 0x3f5   : > { %3046 = vadd.xlane.f32.xlu1 %v2856_v21  ;;  %vm2735_vm2 = vcmp.eq.s32.totalorder %v6938_v44, %v6915_v39  ;;  %v2862_v21 = vsel %vm2734_vm9, %v5818_v52, 0.0  ;;  %vm2739_vm9 = vcmp.eq.s32.totalorder %v5805_v56, %v6915_v39 }
 0x3f8   : > { %3048 = vadd.xlane.f32.xlu0 %v2857_v7  ;;  %v2863_v7 = vsel %vm2735_vm2, %v5818_v52, 0.0  ;;  %vm2740_vm2 = vcmp.eq.s32.totalorder %v6944_v24, %v6915_v39 }
 0x3f9   : > { %3050 = vadd.xlane.f32.xlu1 %v2858_v23  ;;  %v6942_v23 = vld [vmem:[#allocation44_spill] sm:$0xff] }
 0x3fa   : > { %vm2738_vm10 = vcmp.eq.s32.totalorder %v6942_v23, %v6915_v39  ;;  %v2867_v23 = vsel %vm2739_vm9, %v5818_v52, 0.0 }
 0x3fb   : > { %v2866_v47 = vsel %vm2738_vm10, %v5818_v52, 0.0  ;;  %vm2743_vm10 = vcmp.eq.s32.totalorder %v5815_v1, %v6915_v39 }
 0x3fc   : > { %3052 = vadd.xlane.f32.xlu0 %v2859_v22  ;;  %v6131_v22 = vpop.permute.xlu1 %2664  ;;  %v2871_v54 = vsel %vm2743_vm10, %v5818_v52, 0.0  ;;  %vm2748_vm10 = vcmp.eq.s32.totalorder %v5835_v20, %v6915_v39 }
 0x3fd   : > { %3054 = vadd.xlane.f32.xlu1 %v2860_v50  ;;  %6943 = vst [vmem:[#allocation20_spill] sm:$0xff] %v6131_v22  ;;  %v2865_v50 = vsel %vm2737_vm8, %v5818_v52, 0.0  ;;  %v6947_v22 = vld [vmem:[#allocation24_spill] sm:$0xff]  ;;  %vm2742_vm8 = vcmp.eq.s32.totalorder %v6948_v11, %v6915_v39 }
 0x3fe   : > { %v2870_v11 = vsel %vm2742_vm8, %v5818_v52, 0.0  ;;  %vm2747_vm8 = vcmp.eq.s32.totalorder %v5837_v51, %v6915_v39 }
 0x400   : > { %3056 = vadd.xlane.f32.xlu0 %v2861_v30 }
 0x401   : > { %3058 = vadd.xlane.f32.xlu1 %v2862_v21  ;;  %v6945_v21 = vld [vmem:[#allocation22_spill] sm:$0xff] }
 0x404   : > { %3060 = vadd.xlane.f32.xlu0 %v2863_v7  ;;  %v6946_v7 = vld [vmem:[#allocation23_spill] sm:$0xff] }
 0x405   : > { %3062 = vadd.xlane.f32.xlu1 %v2864_v3  ;;  %v2923_v43 = vpop.xlane.xlu0 %2922 }
 0x406   : > { %v3309_v26 = vrot.slane %v2923_v43, %v6945_v21 }
 0x408   : > { %3064 = vadd.xlane.f32.xlu0 %v2865_v50  ;;  %v2868_v50 = vsel %vm2740_vm2, %v5818_v52, 0.0  ;;  %vm2745_vm2 = vcmp.eq.s32.totalorder %v5827_v46, %v6915_v39 }
 0x409   : > { %3066 = vadd.xlane.f32.xlu1 %v2866_v47  ;;  %v2927_v30 = vpop.xlane.xlu0 %2926  ;;  %v2873_v33 = vsel %vm2745_vm2, %v5818_v52, 0.0  ;;  %vm2762_vm2 = vcmp.eq.s32.totalorder %v5925_v25, %v6915_v39 }
 0x40a   : > { %v2925_v44 = vpop.xlane.xlu1 %2924  ;;  %v3318_v56 = vrot.slane %v2927_v30, %v6947_v22 }
 0x40b   : > { %v3313_v3 = vrot.slane %v2925_v44, %v6946_v7  ;;  %v6949_v44 = vld [vmem:[#allocation25_spill] sm:$0xff] }
 0x40c   : > { %3068 = vadd.xlane.f32.xlu0 %v2867_v23 }
 0x40d   : > { %v3314_v47 = vsel %vm1459_vm11, %v3313_v3, %v3309_v26  ;;  %3070 = vadd.xlane.f32.xlu1 %v2868_v50  ;;  %v2929_v24 = vpop.xlane.xlu0 %2928  ;;  %v6951_v26 = vld [vmem:[#allocation33_spill] sm:$0xff] }
 0x40e   : > { %v3319_v43 = vsel %vm1466_vm12, %v3318_v56, %v3314_v47  ;;  %v3323_v15 = vrot.slane %v2929_v24, %v6949_v44  ;;  %v2931_v27 = vpop.xlane.xlu1 %2930  ;;  %vm2744_vm9 = vcmp.eq.s32.totalorder %v6951_v26, %v6915_v39  ;;  %v6952_v56 = vld [vmem:[#allocation27_spill] sm:$0xff]  ;;  %v6953_v47 = vld [vmem:[#allocation28_spill] sm:$0xff] }
 0x40f   : > { %v3328_v16 = vrot.slane %v2931_v27, %v6950_v48 }
 0x410   : > { %v3324_v30 = vsel %vm1473_vm15, %v3323_v15, %v3319_v43  ;;  %3072 = vadd.xlane.f32.xlu0 %v2869_v35  ;;  %v2872_v15 = vsel %vm2744_vm9, %v5818_v52, 0.0  ;;  %v6954_v43 = vld [vmem:[#allocation47_spill] sm:$0xff]  ;;  %vm6957_vm9 = vcmask 589312  }
 0x411   : > { %v3329_v3 = vsel %vm1480_vm0, %v3328_v16, %v3324_v30  ;;  %3074 = vadd.xlane.f32.xlu1 %v2870_v11  ;;  %v2933_v23 = vpop.xlane.xlu0 %2932  ;;  %vm2746_vm13 = vcmp.eq.s32.totalorder %v6954_v43, %v6915_v39  ;;  %v6955_v30 = vld [vmem:[#allocation29_spill] sm:$0xff]  ;;  %v6959_v43 = vld [vmem:[#allocation31_spill] sm:$0xff] }
 0x412   : > { %v3333_v50 = vrot.slane %v2933_v23, %v6952_v56  ;;  %v2935_v27 = vpop.xlane.xlu1 %2934  ;;  %v6956_v23 = vld [vmem:[#allocation30_spill] sm:$0xff] }
 0x413   : > { %v3338_v24 = vrot.slane %v2935_v27, %v6953_v47 }
 0x414   : > { %v3334_v1 = vsel %vm1487_vm3, %v3333_v50, %v3329_v3  ;;  %3076 = vadd.xlane.f32.xlu0 %v2871_v54  ;;  %v2874_v54 = vsel %vm2746_vm13, %v5818_v52, 0.0  ;;  %vm2763_vm13 = vcmp.eq.s32.totalorder %v5936_v4, %v6915_v39 }
 0x415   : > { %v3339_v16 = vsel %vm1494_vm4, %v3338_v24, %v3334_v1  ;;  %3078 = vadd.xlane.f32.xlu1 %v2872_v15  ;;  %v2937_v35 = vpop.xlane.xlu0 %2936  ;;  %v6958_v24 = vld [vmem:[#allocation10_spill] sm:$0xff] }
 0x416   : > { %v3343_v11 = vrot.slane %v2937_v35, %v6955_v30  ;;  %v2939_v26 = vpop.xlane.xlu1 %2938 }
 0x417   : > { %v3348_v27 = vrot.slane %v2939_v26, %v6956_v23  ;;  %v2875_v26 = vsel %vm2747_vm8, %v5818_v52, 0.0  ;;  %vm6964_vm8 = vcmask 786112  }
 0x418   : > { %v3344_v46 = vsel %vm1501_vm7, %v3343_v11, %v3339_v16  ;;  %3080 = vadd.xlane.f32.xlu0 %v2873_v33  ;;  %v2876_v33 = vsel %vm2748_vm10, %v5818_v52, 0.0  ;;  %v6962_v11 = vld [vmem:[#allocation32_spill] sm:$0xff]  ;;  %vm2764_vm10 = vcmp.eq.s32.totalorder %v5941_v60, %v6915_v39 }
 0x419   : > { %v3349_v3 = vsel %vm6957_vm9, %v3348_v27, %v3344_v46  ;;  %3082 = vadd.xlane.f32.xlu1 %v2874_v54  ;;  %v2941_v50 = vpop.xlane.xlu0 %2940  ;;  %vm6961_vm9 = vcmask 720512   ;;  %v6963_v54 = vld [vmem:[#allocation34_spill] sm:$0xff] }
 0x41a   : > { %v3353_v1 = vrot.slane %v2941_v50, %v6958_v24  ;;  %v2943_v15 = vpop.xlane.xlu1 %2942 }
 0x41b   : > { %v3358_v35 = vrot.slane %v2943_v15, %v6959_v43  ;;  %v2890_v15 = vsel %vm2762_vm2, %v5818_v52, 0.0  ;;  %vm2778_vm2 = vcmp.eq.s32.totalorder %v6029_v34, %v6915_v39 }
 0x41c   : > { %v3354_v51 = vsel %vm6960_vm6, %v3353_v1, %v3349_v3  ;;  %3084 = vadd.xlane.f32.xlu0 %v2875_v26  ;;  %vm2749_vm6 = vcmp.eq.s32.totalorder %v5845_v29, %v6915_v39  ;;  %v2891_v3 = vsel %vm2763_vm13, %v5818_v52, 0.0  ;;  %vm2779_vm13 = vcmp.eq.s32.totalorder %v6040_v13, %v6915_v39 }
 0x41d   : > { %v3359_v20 = vsel %vm6961_vm9, %v3358_v35, %v3354_v51  ;;  %3086 = vadd.xlane.f32.xlu1 %v2876_v33  ;;  %v2945_v16 = vpop.xlane.xlu0 %2944  ;;  %vm6965_vm9 = vcmask 851712   ;;  %v6966_v35 = vld [vmem:[#allocation35_spill] sm:$0xff]  ;;  %v6967_v33 = vld [vmem:[#allocation36_spill] sm:$0xff] }
 0x41e   : > { %v3363_v27 = vrot.slane %v2945_v16, %v6962_v11  ;;  %v2947_v46 = vpop.xlane.xlu1 %2946 }
 0x41f   : > { %v3368_v50 = vrot.slane %v2947_v46, %v6963_v54  ;;  %v2877_v46 = vsel %vm2749_vm6, %v5818_v52, 0.0  ;;  %vm2750_vm6 = vcmp.eq.s32.totalorder %v5847_v40, %v6915_v39 }
 0x420   : > { %v3364_v25 = vsel %vm6964_vm8, %v3363_v27, %v3359_v20  ;;  %3114 = vadd.xlane.f32.xlu0 %v2890_v15  ;;  %v2892_v20 = vsel %vm2764_vm10, %v5818_v52, 0.0  ;;  %vm2765_vm8 = vcmp.eq.s32.totalorder %v5949_v10, %v6915_v39  ;;  %v2878_v40 = vsel %vm2750_vm6, %v5818_v52, 0.0 }
 0x421   : > { %v3369_v4 = vsel %vm6965_vm9, %v3368_v50, %v3364_v25  ;;  %3116 = vadd.xlane.f32.xlu1 %v2891_v3  ;;  %v2949_v1 = vpop.xlane.xlu0 %2948  ;;  %v6968_v50 = vld [vmem:[#allocation37_spill] sm:$0xff]  ;;  %v2906_v3 = vsel %vm2778_vm2, %v5818_v52, 0.0  ;;  %vm2780_vm10 = vcmp.eq.s32.totalorder %v6045_v38, %v6915_v39  ;;  %vm2751_vm9 = vcmp.eq.s32.totalorder %v5858_v28, %v6915_v39 }
 0x422   : > { %v3373_v26 = vrot.slane %v2949_v1, %v6966_v35  ;;  %v2951_v51 = vpop.xlane.xlu1 %2950  ;;  %vm2766_vm2 = vcmp.eq.s32.totalorder %v5951_v53, %v6915_v39  ;;  %vm2752_vm6 = vcmp.eq.s32.totalorder %v5863_v32, %v6915_v39 }
 0x423   : > { %v3378_v16 = vrot.slane %v2951_v51, %v6967_v33 }
 0x424   : > { %v3374_v29 = vsel %vm1543_vm1, %v3373_v26, %v3369_v4  ;;  %3088 = vadd.xlane.f32.xlu0 %v2877_v46  ;;  %v2907_v4 = vsel %vm2779_vm13, %v5818_v52, 0.0  ;;  %vm2781_vm13 = vcmp.eq.s32.totalorder %v6053_v12, %v6915_v39 }
 0x425   : > { %v3379_v60 = vsel %vm1550_vm14, %v3378_v16, %v3374_v29  ;;  %3118 = vadd.xlane.f32.xlu1 %v2892_v20  ;;  %v2953_v27 = vpop.xlane.xlu0 %2952  ;;  %v2893_v29 = vsel %vm2765_vm8, %v5818_v52, 0.0  ;;  %vm2767_vm8 = vcmp.eq.s32.totalorder %v5962_v42, %v6915_v39 }
 0x426   : > { %v3383_v15 = vrot.slane %v2953_v27, %v6968_v50  ;;  %v2955_v25 = vpop.xlane.xlu1 %2954 }
 0x427   : > { %v3388_v1 = vrot.slane %v2955_v25, %v6945_v21  ;;  %v2908_v25 = vsel %vm2780_vm10, %v5818_v52, 0.0  ;;  %vm2782_vm10 = vcmp.eq.s32.totalorder %v6055_v36, %v6915_v39 }
 0x428   : > { %v6215_v34 = vsel %vm1557_vm5, %v3383_v15, %v3379_v60  ;;  %3146 = vadd.xlane.f32.xlu0 %v2906_v3  ;;  %v2879_v3 = vsel %vm2751_vm9, %v5818_v52, 0.0  ;;  %vm2753_vm9 = vcmp.eq.s32.totalorder %v5871_v5, %v6915_v39 }
 0x429   : > { %3148 = vadd.xlane.f32.xlu1 %v2907_v4  ;;  %v2957_v13 = vpop.xlane.xlu0 %2956 }
 0x42a   : > { %v3392_v26 = vrot.slane %v2957_v13, %v6946_v7  ;;  %v2959_v51 = vpop.xlane.xlu1 %2958 }
 0x42b   : > { %v3397_v16 = vrot.slane %v2959_v51, %v6947_v22  ;;  %v2894_v51 = vsel %vm2766_vm2, %v5818_v52, 0.0  ;;  %vm6969_vm2 = vcmask 589312  }
 0x42c   : > { %v3393_v46 = vsel %vm1459_vm11, %v3392_v26, %v3388_v1  ;;  %3090 = vadd.xlane.f32.xlu0 %v2878_v40 }
 0x42d   : > { %v3398_v10 = vsel %vm1466_vm12, %v3397_v16, %v3393_v46  ;;  %3120 = vadd.xlane.f32.xlu1 %v2893_v29  ;;  %v2961_v20 = vpop.xlane.xlu0 %2960  ;;  %v2909_v16 = vsel %vm2781_vm13, %v5818_v52, 0.0  ;;  %vm2768_vm13 = vcmp.eq.s32.totalorder %v5967_v59, %v6915_v39 }
 0x42e   : > { %v3402_v60 = vrot.slane %v2961_v20, %v6949_v44  ;;  %v2963_v27 = vpop.xlane.xlu1 %2962  ;;  %v2880_v20 = vsel %vm2752_vm6, %v5818_v52, 0.0  ;;  %vm6970_vm6 = vcmask 654912  }
 0x42f   : > { %v3407_v15 = vrot.slane %v2963_v27, %v6950_v48 }
 0x430   : > { %v3403_v38 = vsel %vm1473_vm15, %v3402_v60, %v3398_v10  ;;  %3150 = vadd.xlane.f32.xlu0 %v2908_v25  ;;  %v2895_v60 = vsel %vm2767_vm8, %v5818_v52, 0.0  ;;  %vm2783_vm8 = vcmp.eq.s32.totalorder %v6066_v49, %v6915_v39 }
 0x431   : > { %v3408_v28 = vsel %vm1480_vm0, %v3407_v15, %v3403_v38  ;;  %3092 = vadd.xlane.f32.xlu1 %v2879_v3  ;;  %v2965_v4 = vpop.xlane.xlu0 %2964  ;;  %v2910_v3 = vsel %vm2782_vm10, %v5818_v52, 0.0  ;;  %vm2754_vm10 = vcmp.eq.s32.totalorder %v5873_v62, %v6915_v39 }
 0x432   : > { %v3412_v13 = vrot.slane %v2965_v4, %v6952_v56  ;;  %v2967_v1 = vpop.xlane.xlu1 %2966 }
 0x433   : > { %v3417_v26 = vrot.slane %v2967_v1, %v6953_v47 }
 0x434   : > { %v3413_v53 = vsel %vm1487_vm3, %v3412_v13, %v3408_v28  ;;  %3122 = vadd.xlane.f32.xlu0 %v2894_v51  ;;  %v2881_v28 = vsel %vm2753_vm9, %v5818_v52, 0.0  ;;  %v2896_v51 = vsel %vm2768_vm13, %v5818_v52, 0.0  ;;  %vm2769_vm9 = vcmp.eq.s32.totalorder %v5975_v37, %v6915_v39 }
 0x435   : > { %v3418_v12 = vsel %vm1494_vm4, %v3417_v26, %v3413_v53  ;;  %3152 = vadd.xlane.f32.xlu1 %v2909_v16  ;;  %v2969_v40 = vpop.xlane.xlu0 %2968  ;;  %v2911_v53 = vsel %vm2783_vm8, %v5818_v52, 0.0  ;;  %vm2784_vm13 = vcmp.eq.s32.totalorder %v6071_v45, %v6915_v39  ;;  %vm2755_vm8 = vcmp.eq.s32.totalorder %v5884_v9, %v6915_v39 }
 0x436   : > { %v3422_v46 = vrot.slane %v2969_v40, %v6955_v30  ;;  %v2971_v29 = vpop.xlane.xlu1 %2970 }
 0x437   : > { %v3427_v10 = vrot.slane %v2971_v29, %v6956_v23  ;;  %v2882_v29 = vsel %vm2754_vm10, %v5818_v52, 0.0  ;;  %vm2770_vm10 = vcmp.eq.s32.totalorder %v5977_v0, %v6915_v39 }
 0x438   : > { %v3423_v32 = vsel %vm1501_vm7, %v3422_v46, %v3418_v12  ;;  %3094 = vadd.xlane.f32.xlu0 %v2880_v20 }
 0x439   : > { %v3428_v42 = vsel %vm6969_vm2, %v3427_v10, %v3423_v32  ;;  %3124 = vadd.xlane.f32.xlu1 %v2895_v60  ;;  %v2973_v27 = vpop.xlane.xlu0 %2972  ;;  %vm6971_vm2 = vcmask 720512   ;;  %v2897_v10 = vsel %vm2769_vm9, %v5818_v52, 0.0  ;;  %vm6974_vm9 = vcmask 1041409  }
 0x43a   : > { %v3432_v15 = vrot.slane %v2973_v27, %v6958_v24  ;;  %v2975_v25 = vpop.xlane.xlu1 %2974  ;;  %v2883_v27 = vsel %vm2755_vm8, %v5818_v52, 0.0  ;;  %vm2786_vm8 = vcmp.eq.s32.totalorder %v6081_v55, %v6915_v39 }
 0x43b   : > { %v3437_v38 = vrot.slane %v2975_v25, %v6959_v43 }
 0x43c   : > { %v3433_v36 = vsel %vm6970_vm6, %v3432_v15, %v3428_v42  ;;  %3154 = vadd.xlane.f32.xlu0 %v2910_v3  ;;  %vm6972_vm6 = vcmask 786112   ;;  %v2912_v42 = vsel %vm2784_vm13, %v5818_v52, 0.0  ;;  %vm2771_vm13 = vcmp.eq.s32.totalorder %v5988_v57, %v6915_v39 }
 0x43d   : > { %v3438_v5 = vsel %vm6971_vm2, %v3437_v38, %v3433_v36  ;;  %3096 = vadd.xlane.f32.xlu1 %v2881_v28  ;;  %v2977_v4 = vpop.xlane.xlu0 %2976  ;;  %vm6973_vm2 = vcmask 851712   ;;  %v2898_v36 = vsel %vm2770_vm10, %v5818_v52, 0.0  ;;  %vm2757_vm10 = vcmp.eq.s32.totalorder %v5897_v41, %v6915_v39 }
 0x43e   : > { %v3442_v13 = vrot.slane %v2977_v4, %v6962_v11  ;;  %v2979_v1 = vpop.xlane.xlu1 %2978 }
 0x43f   : > { %v3447_v26 = vrot.slane %v2979_v1, %v6963_v54 }
 0x440   : > { %v3443_v59 = vsel %vm6972_vm6, %v3442_v13, %v3438_v5  ;;  %3126 = vadd.xlane.f32.xlu0 %v2896_v51  ;;  %vm2785_vm6 = vcmp.eq.s32.totalorder %v6079_v6, %v6915_v39  ;;  %v2899_v51 = vsel %vm2771_vm13, %v5818_v52, 0.0  ;;  %vm2773_vm13 = vcmp.eq.s32.totalorder %v6001_v2, %v6915_v39 }
 0x441   : > { %v3448_v49 = vsel %vm6973_vm2, %v3447_v26, %v3443_v59  ;;  %3156 = vadd.xlane.f32.xlu1 %v2911_v53  ;;  %v2981_v16 = vpop.xlane.xlu0 %2980  ;;  %vm2756_vm2 = vcmp.eq.s32.totalorder %v5889_v58, %v6915_v39 }
 0x442   : > { %v3452_v12 = vrot.slane %v2981_v16, %v6966_v35  ;;  %v2983_v40 = vpop.xlane.xlu1 %2982  ;;  %v2884_v26 = vsel %vm2756_vm2, %v5818_v52, 0.0  ;;  %vm2758_vm2 = vcmp.eq.s32.totalorder %v5899_v63, %v6915_v39 }
 0x443   : > { %v3457_v46 = vrot.slane %v2983_v40, %v6967_v33  ;;  %v2885_v40 = vsel %vm2757_vm10, %v5818_v52, 0.0  ;;  %vm2788_vm10 = vcmp.eq.s32.totalorder %v6097_v17, %v6915_v39 }
 0x444   : > { %v3453_v62 = vsel %vm1543_vm1, %v3452_v12, %v3448_v49  ;;  %3098 = vadd.xlane.f32.xlu0 %v2882_v29  ;;  %v2914_v12 = vsel %vm2786_vm8, %v5818_v52, 0.0  ;;  %vm6975_vm8 = vcmask 589312  }
 0x445   : > { %v3458_v37 = vsel %vm1550_vm14, %v3457_v46, %v3453_v62  ;;  %3128 = vadd.xlane.f32.xlu1 %v2897_v10  ;;  %v2985_v20 = vpop.xlane.xlu0 %2984 }
 0x446   : > { %v3462_v32 = vrot.slane %v2985_v20, %v6968_v50  ;;  %v2987_v60 = vpop.xlane.xlu1 %2986 }
 0x447   : > { %v3467_v25 = vrot.slane %v2987_v60, %v6945_v21 }
 0x448   : > { %v3463_v45 = vsel %vm1557_vm5, %v3462_v32, %v3458_v37  ;;  %3158 = vadd.xlane.f32.xlu0 %v2912_v42 }
 0x449   : > { %v6301_v9 = vsel %vm6974_vm9, %v3463_v45, %v6215_v34  ;;  %3100 = vadd.xlane.f32.xlu1 %v2883_v27  ;;  %v2989_v15 = vpop.xlane.xlu0 %2988  ;;  %v2913_v34 = vsel %vm2785_vm6, %v5818_v52, 0.0  ;;  %vm2772_vm6 = vcmp.eq.s32.totalorder %v5993_v14, %v6915_v39  ;;  %vm2787_vm9 = vcmp.eq.s32.totalorder %v6092_v61, %v6915_v39  ;;  %v6347_v27 = vld [vmem:[%s4385_s8] ss:$0 sm:$0xff] }
 0x44a   : > { %v3471_v38 = vrot.slane %v2989_v15, %v6946_v7  ;;  %v2991_v3 = vpop.xlane.xlu1 %2990  ;;  %v2900_v14 = vsel %vm2772_vm6, %v5818_v52, 0.0  ;;  %v2915_v61 = vsel %vm2787_vm9, %v5818_v52, 0.0  ;;  %v2886_v63 = vsel %vm2758_vm2, %v6347_v27, 0.0 }
 0x44b   : > { %v3476_v0 = vrot.slane %v2991_v3, %v6947_v22  ;;  %vm6976_vm6 = vcmask 654912   ;;  %v2901_v2 = vsel %vm2773_vm13, %v6347_v27, 0.0  ;;  %vm2759_vm9 = vcmp.eq.s32.totalorder %v5910_v8, %v6915_v39 }
 0x44c   : > { %v3472_v6 = vsel %vm1459_vm11, %v3471_v38, %v3467_v25  ;;  %3130 = vadd.xlane.f32.xlu0 %v2898_v36  ;;  %v2916_v36 = vsel %vm2788_vm10, %v6347_v27, 0.0  ;;  %vm2774_vm2 = vcmp.eq.s32.totalorder %v6003_v18, %v6915_v39  ;;  %vm2789_vm13 = vcmp.eq.s32.totalorder %v6105_v31, %v6915_v39  ;;  %v6980_v31 = vld [vmem:[#allocation49_spill] sm:$0xff] }
 0x44d   : > { %v3477_v28 = vsel %vm1466_vm12, %v3476_v0, %v3472_v6  ;;  %3160 = vadd.xlane.f32.xlu1 %v2913_v34  ;;  %v2993_v5 = vpop.xlane.xlu0 %2992  ;;  %v2887_v6 = vsel %vm2759_vm9, %v6347_v27, 0.0  ;;  %vm2760_vm10 = vcmp.eq.s32.totalorder %v5915_v19, %v6915_v39  ;;  %vm2775_vm9 = vcmp.eq.s32.totalorder %v6980_v31, %v6915_v39 }
 0x44e   : > { %v3481_v4 = vrot.slane %v2993_v5, %v6949_v44  ;;  %v2995_v13 = vpop.xlane.xlu1 %2994 }
 0x44f   : > { %v3486_v1 = vrot.slane %v2995_v13, %v6950_v48  ;;  %v2902_v13 = vsel %vm2774_vm2, %v6347_v27, 0.0 }
 0x450   : > { %v3482_v58 = vsel %vm1473_vm15, %v3481_v4, %v3477_v28  ;;  %3102 = vadd.xlane.f32.xlu0 %v2884_v26 }
 0x451   : > { %v3487_v57 = vsel %vm1480_vm0, %v3486_v1, %v3482_v58  ;;  %3132 = vadd.xlane.f32.xlu1 %v2899_v51  ;;  %v2997_v59 = vpop.xlane.xlu0 %2996  ;;  %v2917_v1 = vsel %vm2789_vm13, %v6347_v27, 0.0  ;;  %vm6983_vm13 = vcmask 1042434  }
 0x452   : > { %v3491_v53 = vrot.slane %v2997_v59, %v6952_v56  ;;  %v2999_v49 = vpop.xlane.xlu1 %2998  ;;  %v2888_v59 = vsel %vm2760_vm10, %v6347_v27, 0.0 }
 0x453   : > { %v3496_v16 = vrot.slane %v2999_v49, %v6953_v47  ;;  %v2903_v49 = vsel %vm2775_vm9, %v6347_v27, 0.0 }
 0x454   : > { %v3492_v55 = vsel %vm1487_vm3, %v3491_v53, %v3487_v57  ;;  %3162 = vadd.xlane.f32.xlu0 %v2914_v12  ;;  %v6981_v53 = vld [vmem:[#allocation19_spill] sm:$0xff] }
 0x455   : > { %v3497_v41 = vsel %vm1494_vm4, %v3496_v16, %v3492_v55  ;;  %3104 = vadd.xlane.f32.xlu1 %v2885_v40  ;;  %v3001_v46 = vpop.xlane.xlu0 %3000  ;;  %vm2790_vm2 = vcmp.eq.s32.totalorder %v6981_v53, %v6915_v39  ;;  %v6982_v16 = vld [vmem:[#allocation48_spill] sm:$0xff] }
 0x456   : > { %v3501_v29 = vrot.slane %v3001_v46, %v6955_v30  ;;  %v3003_v62 = vpop.xlane.xlu1 %3002 }
 0x457   : > { %v3506_v10 = vrot.slane %v3003_v62, %v6956_v23  ;;  %v2918_v62 = vsel %vm2790_vm2, %v6347_v27, 0.0 }
 0x458   : > { %v3502_v37 = vsel %vm1501_vm7, %v3501_v29, %v3497_v41  ;;  %3134 = vadd.xlane.f32.xlu0 %v2900_v14 }
 0x459   : > { %v3507_v20 = vsel %vm6975_vm8, %v3506_v10, %v3502_v37  ;;  %3164 = vadd.xlane.f32.xlu1 %v2915_v61  ;;  %v3005_v32 = vpop.xlane.xlu0 %3004  ;;  %vm6977_vm8 = vcmask 720512   ;;  %v6984_v10 = vld [vmem:[#allocation50_spill] sm:$0xff] }
 0x45a   : > { %v3511_v60 = vrot.slane %v3005_v32, %v6958_v24  ;;  %v3007_v42 = vpop.xlane.xlu1 %3006  ;;  %v6985_v37 = vld [vmem:[#allocation18_spill] sm:$0xff] }
 0x45b   : > { %v3516_v45 = vrot.slane %v3007_v42, %v6959_v43  ;;  %vm2791_vm10 = vcmp.eq.s32.totalorder %v6985_v37, %v6915_v39 }
 0x45c   : > { %v3512_v52 = vsel %vm6976_vm6, %v3511_v60, %v3507_v20  ;;  %3106 = vadd.xlane.f32.xlu0 %v2886_v63  ;;  %vm6978_vm6 = vcmask 786112   ;;  %v6986_v63 = vld [vmem:[#allocation51_spill] sm:$0xff] }
 0x45d   : > { %v3517_v15 = vsel %vm6977_vm8, %v3516_v45, %v3512_v52  ;;  %3136 = vadd.xlane.f32.xlu1 %v2901_v2  ;;  %v3009_v25 = vpop.xlane.xlu0 %3008  ;;  %vm6979_vm8 = vcmask 851712   ;;  %vm2777_vm9 = vcmp.eq.s32.totalorder %v6986_v63, %v6915_v39  ;;  %v2919_v2 = vsel %vm2791_vm10, %v6347_v27, 0.0 }
 0x45e   : > { %v3521_v38 = vrot.slane %v3009_v25, %v6962_v11  ;;  %v3011_v3 = vpop.xlane.xlu1 %3010  ;;  %vm6991_vm10 = vcmask 720512  }
 0x45f   : > { %v3526_v0 = vrot.slane %v3011_v3, %v6963_v54 }
 0x460   : > { %v3522_v17 = vsel %vm6978_vm6, %v3521_v38, %v3517_v15  ;;  %3166 = vadd.xlane.f32.xlu0 %v2916_v36  ;;  %vm2761_vm6 = vcmp.eq.s32.totalorder %v6982_v16, %v6915_v39  ;;  %v6987_v15 = vld [vmem:[#allocation21_spill] sm:$0xff] }
 0x461   : > { %v3527_v8 = vsel %vm6979_vm8, %v3526_v0, %v3522_v17  ;;  %3108 = vadd.xlane.f32.xlu1 %v2887_v6  ;;  %v3013_v34 = vpop.xlane.xlu0 %3012  ;;  %vm2776_vm8 = vcmp.eq.s32.totalorder %v6984_v10, %v6915_v39  ;;  %vm2792_vm2 = vcmp.eq.s32.totalorder %v6987_v15, %v6915_v39  ;;  %v2905_v17 = vsel %vm2777_vm9, %v6347_v27, 0.0  ;;  %v6988_v6 = vld [vmem:[#allocation20_spill] sm:$0xff] }
 0x462   : > { %v3531_v28 = vrot.slane %v3013_v34, %v6966_v35  ;;  %v3015_v5 = vpop.xlane.xlu1 %3014  ;;  %v2904_v45 = vsel %vm2776_vm8, %v6347_v27, 0.0  ;;  %v2920_v34 = vsel %vm2792_vm2, %v6347_v27, 0.0  ;;  %vm6990_vm8 = vcmask 654912  }
 0x463   : > { %v3536_v4 = vrot.slane %v3015_v5, %v6967_v33  ;;  %vm6992_vm9 = vcmask 786112   ;;  %vm6993_vm2 = vcmask 851712  }
 0x464   : > { %v3532_v18 = vsel %vm1543_vm1, %v3531_v28, %v3527_v8  ;;  %3138 = vadd.xlane.f32.xlu0 %v2902_v13 }
 0x465   : > { %v3537_v26 = vsel %vm1550_vm14, %v3536_v4, %v3532_v18  ;;  %3168 = vadd.xlane.f32.xlu1 %v2917_v1  ;;  %v3017_v58 = vpop.xlane.xlu0 %3016 }
 0x466   : > { %v3541_v51 = vrot.slane %v3017_v58, %v6968_v50  ;;  %v3019_v57 = vpop.xlane.xlu1 %3018 }
 0x467   : > { %v3546_v40 = vrot.slane %v3019_v57, %v6945_v21 }
 0x468   : > { %v3542_v19 = vsel %vm1557_vm5, %v3541_v51, %v3537_v26  ;;  %3110 = vadd.xlane.f32.xlu0 %v2888_v59 }
 0x469   : > { %v6387_v12 = vsel %vm6983_vm13, %v3542_v19, %v6301_v9  ;;  %3140 = vadd.xlane.f32.xlu1 %v2903_v49  ;;  %v3021_v55 = vpop.xlane.xlu0 %3020  ;;  %v2889_v9 = vsel %vm2761_vm6, %v6347_v27, 0.0  ;;  %vm2793_vm6 = vcmp.eq.s32.totalorder %v6988_v6, %v6915_v39  ;;  %vm6989_vm13 = vcmask 589312  }
 0x46a   : > { %v3550_v41 = vrot.slane %v3021_v55, %v6946_v7  ;;  %v3023_v46 = vpop.xlane.xlu1 %3022  ;;  %v2921_v1 = vsel %vm2793_vm6, %v6347_v27, 0.0  ;;  %vm6994_vm6 = vcmask 1043459  }
 0x46b   : > { %v3555_v29 = vrot.slane %v3023_v46, %v6947_v22 }
 0x46c   : > { %v3551_v14 = vsel %vm1459_vm11, %v3550_v41, %v3546_v40  ;;  %3170 = vadd.xlane.f32.xlu0 %v2918_v62 }
 0x46d   : > { %v3556_v61 = vsel %vm1466_vm12, %v3555_v29, %v3551_v14  ;;  %3112 = vadd.xlane.f32.xlu1 %v2889_v9  ;;  %v3025_v20 = vpop.xlane.xlu0 %3024 }
 0x46e   : > { %v3560_v32 = vrot.slane %v3025_v20, %v6949_v44  ;;  %v3027_v60 = vpop.xlane.xlu1 %3026 }
 0x46f   : > { %v3565_v42 = vrot.slane %v3027_v60, %v6950_v48 }
 0x470   : > { %v3561_v52 = vsel %vm1473_vm15, %v3560_v32, %v3556_v61  ;;  %3142 = vadd.xlane.f32.xlu0 %v2904_v45 }
 0x471   : > { %v3566_v25 = vsel %vm1480_vm0, %v3565_v42, %v3561_v52  ;;  %3172 = vadd.xlane.f32.xlu1 %v2919_v2  ;;  %v3029_v38 = vpop.xlane.xlu0 %3028 }
 0x472   : > { %v3570_v3 = vrot.slane %v3029_v38, %v6952_v56  ;;  %v3031_v0 = vpop.xlane.xlu1 %3030 }
 0x473   : > { %v3575_v36 = vrot.slane %v3031_v0, %v6953_v47 }
 0x474   : > { %v3571_v8 = vsel %vm1487_vm3, %v3570_v3, %v3566_v25  ;;  %3144 = vadd.xlane.f32.xlu0 %v2905_v17 }
 0x475   : > { %v3576_v28 = vsel %vm1494_vm4, %v3575_v36, %v3571_v8  ;;  %3174 = vadd.xlane.f32.xlu1 %v2920_v34  ;;  %v3033_v5 = vpop.xlane.xlu0 %3032 }
 0x476   : > { %v3580_v4 = vrot.slane %v3033_v5, %v6955_v30  ;;  %v3035_v13 = vpop.xlane.xlu1 %3034 }
 0x477   : > { %v3585_v18 = vrot.slane %v3035_v13, %v6956_v23 }
 0x478   : > { %v3581_v31 = vsel %vm1501_vm7, %v3580_v4, %v3576_v28  ;;  %3176 = vadd.xlane.f32.xlu0 %v2921_v1 }
 0x479   : > { %v3586_v39 = vsel %vm6989_vm13, %v3585_v18, %v3581_v31  ;;  %v3037_v26 = vpop.xlane.xlu0 %3036 }
 0x47a   : > { %v3590_v58 = vrot.slane %v3037_v26, %v6958_v24  ;;  %v3039_v51 = vpop.xlane.xlu1 %3038 }
 0x47b   : > { %v3595_v57 = vrot.slane %v3039_v51, %v6959_v43 }
 0x47c   : > { %v3591_v59 = vsel %vm6990_vm8, %v3590_v58, %v3586_v39 }
 0x47d   : > { %v3596_v53 = vsel %vm6991_vm10, %v3595_v57, %v3591_v59  ;;  %v3041_v19 = vpop.xlane.xlu0 %3040 }
 0x47e   : > { %v3600_v49 = vrot.slane %v3041_v19, %v6962_v11  ;;  %v3043_v16 = vpop.xlane.xlu1 %3042 }
 0x47f   : > { %v3605_v27 = vrot.slane %v3043_v16, %v6963_v54 }
 0x480   : > { %v3601_v55 = vsel %vm6992_vm9, %v3600_v49, %v3596_v53 }
 0x481   : > { %v3606_v40 = vsel %vm6993_vm2, %v3605_v27, %v3601_v55  ;;  %v3045_v41 = vpop.xlane.xlu0 %3044 }
 0x482   : > { %v3610_v46 = vrot.slane %v3045_v41, %v6966_v35  ;;  %v3047_v29 = vpop.xlane.xlu1 %3046 }
 0x483   : > { %v3615_v62 = vrot.slane %v3047_v29, %v6967_v33 }
 0x484   : > { %v3611_v10 = vsel %vm1543_vm1, %v3610_v46, %v3606_v40 }
 0x485   : > { %v3616_v14 = vsel %vm1550_vm14, %v3615_v62, %v3611_v10  ;;  %v3049_v9 = vpop.xlane.xlu0 %3048 }
 0x486   : > { %v3620_v37 = vrot.slane %v3049_v9, %v6968_v50  ;;  %v3051_v61 = vpop.xlane.xlu1 %3050 }
 0x487   : > { %v3625_v42 = vrot.slane %v3051_v61, %v6945_v21 }
 0x488   : > { %v3621_v20 = vsel %vm1557_vm5, %v3620_v37, %v3616_v14 }
 0x489   : > { %v3940_v32 = vsel %vm6994_vm6, %v3621_v20, %v6387_v12  ;;  %v3053_v60 = vpop.xlane.xlu0 %3052  ;;  %vm6995_vm6 = vcmask 1044484  }
 0x48a   : > { %v3629_v45 = vrot.slane %v3053_v60, %v6946_v7  ;;  %v3055_v63 = vpop.xlane.xlu1 %3054 }
 0x48b   : > { %v3634_v52 = vrot.slane %v3055_v63, %v6947_v22 }
 0x48c   : > { %v3630_v2 = vsel %vm1459_vm11, %v3629_v45, %v3625_v42 }
 0x48d   : > { %v3635_v15 = vsel %vm1466_vm12, %v3634_v52, %v3630_v2  ;;  %v3057_v25 = vpop.xlane.xlu0 %3056 }
 0x48e   : > { %v3639_v38 = vrot.slane %v3057_v25, %v6949_v44  ;;  %v3059_v3 = vpop.xlane.xlu1 %3058 }
 0x48f   : > { %v3644_v0 = vrot.slane %v3059_v3, %v6950_v48 }
 0x490   : > { %v3640_v12 = vsel %vm1473_vm15, %v3639_v38, %v3635_v15 }
 0x491   : > { %v3645_v36 = vsel %vm1480_vm0, %v3644_v0, %v3640_v12  ;;  %v3061_v17 = vpop.xlane.xlu0 %3060 }
 0x492   : > { %v3649_v6 = vrot.slane %v3061_v17, %v6952_v56  ;;  %v3063_v8 = vpop.xlane.xlu1 %3062 }
 0x493   : > { %v3654_v34 = vrot.slane %v3063_v8, %v6953_v47 }
 0x494   : > { %v3650_v28 = vsel %vm1487_vm3, %v3649_v6, %v3645_v36 }
 0x495   : > { %v3655_v5 = vsel %vm1494_vm4, %v3654_v34, %v3650_v28  ;;  %v3065_v4 = vpop.xlane.xlu0 %3064 }
 0x496   : > { %v3659_v13 = vrot.slane %v3065_v4, %v6955_v30  ;;  %v3067_v18 = vpop.xlane.xlu1 %3066 }
 0x497   : > { %v3664_v1 = vrot.slane %v3067_v18, %v6956_v23 }
 0x498   : > { %v3660_v31 = vsel %vm1501_vm7, %v3659_v13, %v3655_v5 }
 0x499   : > { %v3665_v39 = vsel %vm6989_vm13, %v3664_v1, %v3660_v31  ;;  %v3069_v26 = vpop.xlane.xlu0 %3068 }
 0x49a   : > { %v3669_v58 = vrot.slane %v3069_v26, %v6958_v24  ;;  %v3071_v51 = vpop.xlane.xlu1 %3070 }
 0x49b   : > { %v3674_v57 = vrot.slane %v3071_v51, %v6959_v43 }
 0x49c   : > { %v3670_v59 = vsel %vm6990_vm8, %v3669_v58, %v3665_v39 }
 0x49d   : > { %v3675_v53 = vsel %vm6991_vm10, %v3674_v57, %v3670_v59  ;;  %v3073_v19 = vpop.xlane.xlu0 %3072 }
 0x49e   : > { %v3679_v49 = vrot.slane %v3073_v19, %v6962_v11  ;;  %v3075_v16 = vpop.xlane.xlu1 %3074 }
 0x49f   : > { %v3684_v27 = vrot.slane %v3075_v16, %v6963_v54 }
 0x4a0   : > { %v3680_v55 = vsel %vm6992_vm9, %v3679_v49, %v3675_v53 }
 0x4a1   : > { %v3685_v40 = vsel %vm6993_vm2, %v3684_v27, %v3680_v55  ;;  %v3077_v41 = vpop.xlane.xlu0 %3076 }
 0x4a2   : > { %v3689_v46 = vrot.slane %v3077_v41, %v6966_v35  ;;  %v3079_v29 = vpop.xlane.xlu1 %3078 }
 0x4a3   : > { %v3694_v62 = vrot.slane %v3079_v29, %v6967_v33 }
 0x4a4   : > { %v3690_v10 = vsel %vm1543_vm1, %v3689_v46, %v3685_v40 }
 0x4a5   : > { %v3695_v14 = vsel %vm1550_vm14, %v3694_v62, %v3690_v10  ;;  %v3081_v9 = vpop.xlane.xlu0 %3080 }
 0x4a6   : > { %v3699_v37 = vrot.slane %v3081_v9, %v6968_v50  ;;  %v3083_v61 = vpop.xlane.xlu1 %3082 }
 0x4a7   : > { %v3704_v45 = vrot.slane %v3083_v61, %v6945_v21 }
 0x4a8   : > { %v3700_v20 = vsel %vm1557_vm5, %v3699_v37, %v3695_v14 }
 0x4a9   : > { %v6471_v60 = vsel %vm6995_vm6, %v3700_v20, %v3940_v32  ;;  %v3085_v42 = vpop.xlane.xlu0 %3084 }
 0x4aa   : > { %v3708_v63 = vrot.slane %v3085_v42, %v6946_v7  ;;  %v3087_v52 = vpop.xlane.xlu1 %3086 }
 0x4ab   : > { %v3713_v2 = vrot.slane %v3087_v52, %v6947_v22 }
 0x4ac   : > { %v3709_v15 = vsel %vm1459_vm11, %v3708_v63, %v3704_v45 }
 0x4ad   : > { %v3714_v25 = vsel %vm1466_vm12, %v3713_v2, %v3709_v15  ;;  %v3115_v38 = vpop.xlane.xlu0 %3114 }
 0x4ae   : > { %v3783_v3 = vrot.slane %v3115_v38, %v6945_v21  ;;  %v3117_v0 = vpop.xlane.xlu1 %3116 }
 0x4af   : > { %v3787_v12 = vrot.slane %v3117_v0, %v6946_v7 }
 0x4b1   : > { %v3788_v32 = vsel %vm1459_vm11, %v3787_v12, %v3783_v3  ;;  %v3089_v36 = vpop.xlane.xlu0 %3088 }
 0x4b2   : > { %v3718_v17 = vrot.slane %v3089_v36, %v6949_v44  ;;  %v3119_v6 = vpop.xlane.xlu1 %3118 }
 0x4b3   : > { %v3792_v8 = vrot.slane %v3119_v6, %v6947_v22 }
 0x4b4   : > { %v3719_v34 = vsel %vm1473_vm15, %v3718_v17, %v3714_v25 }
 0x4b5   : > { %v3793_v28 = vsel %vm1466_vm12, %v3792_v8, %v3788_v32  ;;  %v3147_v5 = vpop.xlane.xlu0 %3146 }
 0x4b6   : > { %v3149_v4 = vpop.xlane.xlu1 %3148  ;;  %v3862_v42 = vrot.slane %v3147_v5, %v6945_v21 }
 0x4b7   : > { %v3866_v45 = vrot.slane %v3149_v4, %v6946_v7 }
 0x4b9   : > { %v3091_v13 = vpop.xlane.xlu0 %3090  ;;  %v3867_v0 = vsel %vm1459_vm11, %v3866_v45, %v3862_v42  ;;  %vm6996_vm11 = vmmov %vm6989_vm13 }
 0x4ba   : > { %v3121_v18 = vpop.xlane.xlu1 %3120  ;;  %v3723_v63 = vrot.slane %v3091_v13, %v6950_v48  ;;  %vm6997_vm13 = vmmov %vm6990_vm8 }
 0x4bb   : > { %v3797_v15 = vrot.slane %v3121_v18, %v6949_v44  ;;  %vm6998_vm8 = vmmov %vm6991_vm10  ;;  %vm7003_vm10 = vcmask 1045509  }
 0x4bc   : > { %v3724_v12 = vsel %vm1480_vm0, %v3723_v63, %v3719_v34 }
 0x4bd   : > { %v3151_v1 = vpop.xlane.xlu0 %3150  ;;  %v3798_v8 = vsel %vm1473_vm15, %v3797_v15, %v3793_v28 }
 0x4be   : > { %v3093_v31 = vpop.xlane.xlu1 %3092  ;;  %v3871_v32 = vrot.slane %v3151_v1, %v6947_v22 }
 0x4bf   : > { %v3728_v2 = vrot.slane %v3093_v31, %v6952_v56 }
 0x4c1   : > { %v3123_v39 = vpop.xlane.xlu0 %3122  ;;  %v3729_v36 = vsel %vm1487_vm3, %v3728_v2, %v3724_v12 }
 0x4c2   : > { %v3153_v26 = vpop.xlane.xlu1 %3152  ;;  %v3802_v17 = vrot.slane %v3123_v39, %v6950_v48 }
 0x4c3   : > { %v3876_v5 = vrot.slane %v3153_v26, %v6949_v44 }
 0x4c5   : > { %v3095_v58 = vpop.xlane.xlu0 %3094 }
 0x4c6   : > { %v3125_v51 = vpop.xlane.xlu1 %3124  ;;  %v3733_v25 = vrot.slane %v3095_v58, %v6953_v47 }
 0x4c7   : > { %v3807_v13 = vrot.slane %v3125_v51, %v6952_v56  ;;  %v3872_v51 = vsel %vm1466_vm12, %v3871_v32, %v3867_v0  ;;  %vm6999_vm12 = vmmov %vm6992_vm9 }
 0x4c8   : > { %v3734_v4 = vsel %vm1494_vm4, %v3733_v25, %v3729_v36  ;;  %vm7004_vm9 = vmmov %vm6998_vm8 }
 0x4c9   : > { %v3155_v57 = vpop.xlane.xlu0 %3154 }
 0x4ca   : > { %v3097_v59 = vpop.xlane.xlu1 %3096  ;;  %v3881_v18 = vrot.slane %v3155_v57, %v6950_v48  ;;  %v3803_v48 = vsel %vm1480_vm0, %v3802_v17, %v3798_v8 }
 0x4cb   : > { %v3738_v38 = vrot.slane %v3097_v59, %v6955_v30 }
 0x4cd   : > { %v6485_v53 = vpop.xlane.xlu0 %3126  ;;  %v3739_v22 = vsel %vm1501_vm7, %v3738_v38, %v3734_v4 }
 0x4ce   : > { %v6487_v19 = vpop.xlane.xlu1 %3156  ;;  %v3812_v39 = vrot.slane %v6485_v53, %v6953_v47 }
 0x4cf   : > { %v3886_v28 = vrot.slane %v6487_v19, %v6952_v56 }
 0x4d1   : > { %v3099_v49 = vpop.xlane.xlu0 %3098 }
 0x4d2   : > { %v6489_v16 = vpop.xlane.xlu1 %3128  ;;  %v3743_v21 = vrot.slane %v3099_v49, %v6956_v23  ;;  %v3877_v49 = vsel %vm1473_vm15, %v3876_v5, %v3872_v51  ;;  %vm7000_vm15 = vmmov %vm6993_vm2 }
 0x4d3   : > { %v3817_v53 = vrot.slane %v6489_v16, %v6955_v30  ;;  %vm7005_vm2 = vmmov %vm6999_vm12 }
 0x4d4   : > { %v3744_v44 = vsel %vm6996_vm11, %v3743_v21, %v3739_v22 }
 0x4d5   : > { %v6491_v27 = vpop.xlane.xlu0 %3158 }
 0x4d6   : > { %v3101_v55 = vpop.xlane.xlu1 %3100  ;;  %v3891_v15 = vrot.slane %v6491_v27, %v6953_v47 }
 0x4d7   : > { %v3748_v6 = vrot.slane %v3101_v55, %v6958_v24  ;;  %v3808_v55 = vsel %vm1487_vm3, %v3807_v13, %v3803_v48  ;;  %v2129_v48 = vld [vmem:[#allocation3] sm:$0xff] }
 0x4d8   : > { %v3813_v45 = vsel %vm1494_vm4, %v3812_v39, %v3808_v55 }
 0x4d9   : > { %v6493_v40 = vpop.xlane.xlu0 %3130  ;;  %v3749_v57 = vsel %vm6997_vm13, %v3748_v6, %v3744_v44  ;;  %v3818_v0 = vsel %vm1501_vm7, %v3817_v53, %v3813_v45 }
 0x4da   : > { %v6495_v41 = vpop.xlane.xlu1 %3160 }
 0x4db   : > { %v3896_v12 = vrot.slane %v6495_v41, %v6955_v30 }
 0x4dd   : > { %v3103_v46 = vpop.xlane.xlu0 %3102 }
 0x4de   : > { %v6497_v29 = vpop.xlane.xlu1 %3132  ;;  %v3753_v34 = vrot.slane %v3103_v46, %v6959_v43  ;;  %v3882_v46 = vsel %vm1480_vm0, %v3881_v18, %v3877_v49  ;;  %vm7001_vm0 = vmmov %vm6996_vm11  ;;  %v3952_v49 = vld [vmem:[#allocation2] sm:$0xff] (!%p4087_p1) }
 0x4df   : > { %v3887_v63 = vsel %vm1487_vm3, %v3886_v28, %v3882_v46  ;;  %v3827_v16 = vrot.slane %v6497_v29, %v6958_v24  ;;  %vm7002_vm3 = vmmov %vm6997_vm13 }
 0x4e0   : > { %v3754_v56 = vsel %vm6998_vm8, %v3753_v34, %v3749_v57  ;;  %v3892_v8 = vsel %vm1494_vm4, %v3891_v15, %v3887_v63  ;;  %vm7006_vm6 = vmmov %vm7001_vm0 }
 0x4e1   : > { %v6499_v62 = vpop.xlane.xlu0 %3162  ;;  %v3897_v5 = vsel %vm1501_vm7, %v3896_v12, %v3892_v8  ;;  %vm7007_vm11 = vmmov %vm7000_vm15 }
 0x4e2   : > { %v3105_v10 = vpop.xlane.xlu1 %3104  ;;  %v3901_v47 = vrot.slane %v6499_v62, %v6956_v23  ;;  %vm7008_vm4 = vmmov %vm7002_vm3 }
 0x4e3   : > { %v3758_v1 = vrot.slane %v3105_v10, %v6962_v11  ;;  %v3822_v10 = vrot.slane %v6493_v40, %v6956_v23  ;;  %vm7009_vm7 = vmmov %vm6998_vm8 }
 0x4e4   : > { %vm7010_vm13 = vmmov %vm7005_vm2 }
 0x4e5   : > { %v6501_v14 = vpop.xlane.xlu0 %3134  ;;  %v3823_v32 = vsel %vm7001_vm0, %v3822_v10, %v3818_v0  ;;  %vm7011_vm8 = vmmov %vm7007_vm11 }
 0x4e6   : > { %v6503_v9 = vpop.xlane.xlu1 %3164  ;;  %v3832_v25 = vrot.slane %v6501_v14, %v6959_v43  ;;  %v3828_v17 = vsel %vm7002_vm3, %v3827_v16, %v3823_v32 }
 0x4e7   : > { %v3906_v30 = vrot.slane %v6503_v9, %v6958_v24  ;;  %v3902_v9 = vsel %vm7006_vm6, %v3901_v47, %v3897_v5 }
 0x4e8   : > { %v3833_v23 = vsel %vm7004_vm9, %v3832_v25, %v3828_v17 }
 0x4e9   : > { %v3107_v37 = vpop.xlane.xlu0 %3106  ;;  %v3907_v18 = vsel %vm7008_vm4, %v3906_v30, %v3902_v9 }
 0x4ea   : > { %v6505_v61 = vpop.xlane.xlu1 %3136  ;;  %v3763_v26 = vrot.slane %v3107_v37, %v6963_v54  ;;  %v3759_v37 = vsel %vm6999_vm12, %v3758_v1, %v3754_v56  ;;  %vm7012_vm12 = vcmask 1046534  }
 0x4eb   : > { %v3837_v29 = vrot.slane %v6505_v61, %v6962_v11 }
 0x4ed   : > { %v6507_v20 = vpop.xlane.xlu0 %3166  ;;  %v3838_v4 = vsel %vm7005_vm2, %v3837_v29, %v3833_v23 }
 0x4ee   : > { %v3109_v52 = vpop.xlane.xlu1 %3108  ;;  %v3911_v62 = vrot.slane %v6507_v20, %v6959_v43 }
 0x4ef   : > { %v3768_v59 = vrot.slane %v3109_v52, %v6966_v35  ;;  %v3764_v52 = vsel %vm7000_vm15, %v3763_v26, %v3759_v37  ;;  %vm7013_vm15 = vcmask 1047559  }
 0x4f1   : > { %v6516_v3 = vpop.xlane.xlu0 %3138  ;;  %v3769_v40 = vsel %vm1543_vm1, %v3768_v59, %v3764_v52 }
 0x4f2   : > { %v6521_v7 = vpop.xlane.xlu1 %3168  ;;  %v3842_v27 = vrot.slane %v6516_v3, %v6963_v54 }
 0x4f3   : > { %v3916_v24 = vrot.slane %v6521_v7, %v6962_v11 }
 0x4f5   : > { %v3111_v31 = vpop.xlane.xlu0 %3110 }
 0x4f6   : > { %v3141_v58 = vpop.xlane.xlu1 %3140  ;;  %v3773_v19 = vrot.slane %v3111_v31, %v6967_v33  ;;  %v3912_v31 = vsel %vm7009_vm7, %v3911_v62, %v3907_v18 }
 0x4f7   : > { %v3847_v41 = vrot.slane %v3141_v58, %v6966_v35  ;;  %v3917_v39 = vsel %vm7010_vm13, %v3916_v24, %v3912_v31 }
 0x4f8   : > { %v3774_v21 = vsel %vm1550_vm14, %v3773_v19, %v3769_v40 }
 0x4f9   : > { %v3171_v42 = vpop.xlane.xlu0 %3170 }
 0x4fa   : > { %v3113_v2 = vpop.xlane.xlu1 %3112  ;;  %v3921_v34 = vrot.slane %v3171_v42, %v6963_v54 }
 0x4fb   : > { %v3778_v38 = vrot.slane %v3113_v2, %v6968_v50 }
 0x4fc   : > { %v3922_v28 = vsel %vm7011_vm8, %v3921_v34, %v3917_v39 }
 0x4fd   : > { %v3779_v14 = vsel %vm1557_vm5, %v3778_v38, %v3774_v21  ;;  %v3143_v36 = vpop.xlane.xlu0 %3142 }
 0x4fe   : > { %v3942_v61 = vsel %vm7003_vm10, %v3779_v14, %v6471_v60  ;;  %v3173_v6 = vpop.xlane.xlu1 %3172  ;;  %v3852_v3 = vrot.slane %v3143_v36, %v6967_v33  ;;  %v3843_v60 = vsel %vm7007_vm11, %v3842_v27, %v3838_v4 }
 0x4ff   : > { %v3848_v43 = vsel %vm1543_vm1, %v3847_v41, %v3843_v60  ;;  %v3926_v20 = vrot.slane %v3173_v6, %v6966_v35 }
 0x500   : > { %v3853_v11 = vsel %vm1550_vm14, %v3852_v3, %v3848_v43 }
 0x501   : > { %v3145_v13 = vpop.xlane.xlu0 %3144  ;;  %v3927_v35 = vsel %vm1543_vm1, %v3926_v20, %v3922_v28 }
 0x502   : > { %v3857_v22 = vrot.slane %v3145_v13, %v6968_v50  ;;  %v3175_v1 = vpop.xlane.xlu1 %3174 }
 0x503   : > { %v3931_v7 = vrot.slane %v3175_v1, %v6967_v33 }
 0x504   : > { %v3858_v54 = vsel %vm1557_vm5, %v3857_v22, %v3853_v11 }
 0x505   : > { %v3943_v44 = vsel %vm7012_vm12, %v3858_v54, %v3942_v61  ;;  %v3177_v26 = vpop.xlane.xlu0 %3176  ;;  %v3932_v51 = vsel %vm1550_vm14, %v3931_v7, %v3927_v35 }
 0x506   : > { %v3936_v58 = vrot.slane %v3177_v26, %v6968_v50  ;;  %3951 = sbr.rel (%p4087_p1) target bundleno = 1303 (0x517), region = 44  ;;  %v3953_v50 = vld [vmem:[%s249_s6] sm:$0xff] (!%p4087_p1) }
 0x507   : > { %v3954_v56 = vmul.f32 (!%p4087_p1), %v3953_v50, %v3952_v49 }
 0x508   : > { %v3937_v57 = vsel %vm1557_vm5, %v3936_v58, %v3932_v51 }
 0x509   : > { %v3944_v33 = vsel %vm7013_vm15, %v3937_v57, %v3943_v44 }
 0x50a   : > { %v3946_v59 = vadd.f32 %v3944_v33, %v2129_v48 }
 0x50c   : > { %3947 = vst [vmem:[#allocation3] sm:$0xff] %v3946_v59 }
 0x513   : > { %v3955_v53 = vld [vmem:[#allocation3] sm:$0xff] }
 0x514   : > { %v3956_v19 = vmul.f32 %v3955_v53, %v3954_v56 }
 0x516   : > { %3957 = vst [vmem:[%s237_s21] sm:$0xff] %v3956_v19 }
 0x517 PF: > { %s4089_s18 = sshll.u32 %s4249_s19, 7  ;;  %s3972_s10 = sshll.u32 %s237_s21, 4  ;;  %s3973_s10 = int_to_ptr.vmem [resolvable:$true] %s3972_s10 }
 0x518   : > { %s6624_s23 = scalar_lea.hbm %s6679_s4, %s4089_s18  ;;  %s7014_s6 = sand.u32 1, %s4237_s16  }
 0x519   : > { %s3959_s24 = scalar_lea.sflag [#allocation5], %s7014_s6  ;;  %s4167_s29 = scalar_lea.vmem %s3973_s10, 128 }
 0x51a   : > { %p4168_p2 = scmp.ne.s32.totalorder %s3973_s10, %s4167_s29  ;;  %s4264_s30 = smov [#allocation4]  }
 0x51b   : > { %s4171_s8 = sshll.u32 %s4264_s30, 4  ;;  %s4172_s8 = int_to_ptr.vmem [resolvable:$false] %s4171_s8 }
 0x51c   : > { %p4169_p4 = pnand %p4168_p2, %p4339_p3  ;;  %s4173_s25 = scalar_lea.vmem %s4172_s8, 256 }
 0x51d   : > { %p4174_p6 = scmp.lt.s32.totalorder %s3973_s10, %s4172_s8  ;;  %p4175_p7 = scmp.lt.s32.totalorder %s4173_s25, %s4167_s29 }
 0x51e   : > { %p4170_p5 = pneg %p4169_p4 }
 0x51f   : > { %p4176_p8 = por %p4175_p7, %p4174_p6 }
 0x521   : > { %p4177_p10 = pnand %p4176_p8, %p4170_p5 }
 0x523   : > { %4180 = shalt.err (!%p4177_p10)
}
 0x524   : > { %s4181_s19 = scalar_lea.hbm %s6624_s23, 128  ;;  %s4185_s26 = scalar_lea.hbm %s6679_s4, 256 }
 0x525   : > { %p4182_p11 = scmp.ne.s32.totalorder %s6624_s23, %s4181_s19  ;;  %p4186_p0 = scmp.lt.u32.totalorder %s6624_s23, %s6679_s4 }
 0x526   : > { %p4187_p1 = scmp.lt.u32.totalorder %s4185_s26, %s4181_s19  ;;  %p4189_p4 = scmp.lt.u32.totalorder %s4181_s19, %s6624_s23 }
 0x527   : > { %p4183_p12 = pnand %p4182_p11, %p4339_p3 }
 0x528   : > { %p4188_p2 = por %p4187_p1, %p4186_p0 }
 0x529   : > { %p4184_p13 = pneg %p4183_p12 }
 0x52a   : > { %p4190_p5 = por %p4189_p4, %p4188_p2 }
 0x52c   : > { %p4191_p6 = pnand %p4190_p5, %p4184_p13 }
 0x52e   : > { %4194 = shalt.err (!%p4191_p6)
}
 0x52f   : > { %4092 = dma.vmem_to_hbm [thread:$0]  (%p4339_p3), %s3973_s10, 128, %s6624_s23, %s3959_s24  }
 0x530 PF: > { %p4098_p7 = scmp.ge.s32.totalorder %s4261_s22, 2  ;;  %s3984_s12 = sand.u32 1, %s4233_s15  }
 0x531   : > { %s3985_s18 = scalar_lea.sflag [#allocation5], %s3984_s12 }
 0x532   : > { %p4095_p8 = pnand %p4098_p7, %p4349_p9 }
 0x534   : > { %4228 = dma.done.wait (!%p4095_p8), %s3985_s18, 128  }
 0x535   : > { %4230 = vsyncadd (!%p4095_p8), %s3985_s18, 4294967168  ;;  %s17_s22 = sadd.s32 1, %s4261_s22   ;;  %s7015_s19 = sld [smem:[#allocation7_spill]] }
 0x536   : > { %p14_p10 = scmp.ge.s32.totalorder %s17_s22, 6   ;;  %s7016_s27 = sld [smem:[#allocation8_spill]] }
 0x537   : > { %s7017_s21 = sld [smem:[#allocation9_spill]]  ;;  %s7018_s15 = smov %s4237_s16 }
 0x538   : > { %s7019_s16 = smov %s4241_s17  ;;  %s7020_s17 = smov %s4357_s5 }
 0x539   : > { %s7021_s18 = smov %s4253_s20  ;;  %16 = sbr.rel (!%p14_p10) target bundleno = 5 (0x5), region = 88 }
 0x53c   : > { %s7022_s20 = smov %s7016_s27 }
 0x540   :  { %3990 = vsyncpa [#allocation5], 1 }
 0x541   :  { %3992 = vsyncpa [#allocation5 + $0x1], 1 }

</bundles_post_ra>
